<compile_context>
chip_gen: v6e
topology: v6e:2x2x1
jax: 0.10.0
libtpu: 0.0.40
codegen_flags: <defaults>
</compile_context>

<pallas_src>
import functools

import jax
import jax.numpy as jnp
from jax import lax
from jax.experimental import pallas as pl
from jax.experimental.pallas import tpu as pltpu


# ----------------------------------------------------------------------------- kernel

def _moe_experts_kernel(idx_ref, x_ref, w_ref, m_ref, y_ref, *, E, C_t, HW, W, K):
    """Per-(batch, channel-tile): K selected depthwise experts + shared expert, fused LSE combine.

    idx_ref: [B*K] int32 (SMEM, scalar-prefetch)  flattened top-k expert ids
    x_ref  : [1, C_t, HW]                         unpadded input, spatial flattened onto lanes
    w_ref  : [E+1, C_t, 50]                       packed depthwise weights: 49 taps + bias column
    m_ref  : [49, HW] f32 {0,1}                   per-tap validity masks in output coordinates
    y_ref  : [1, C_t, HW]                         combined output (lane-dense single store)
    """
    b = pl.program_id(0)
    x = x_ref[0].astype(jnp.float32)                                  # [C_t, HW]

    # K selected expert weight rows (dynamic leading-axis index from SMEM) + shared (index E).
    w_rows = [w_ref[idx_ref[b * K + j]].astype(jnp.float32) for j in range(K)]
    w_rows.append(w_ref[E].astype(jnp.float32))

    # Per-expert accumulators, initialised with the bias (packed as tap column 49).
    accs = [jnp.broadcast_to(w[:, 49:50], (C_t, HW)) for w in w_rows]

    # 49-tap depthwise conv, lane-dense: the shifted window for tap (dy,dx) is a rotation of the
    # flattened spatial axis by dy*W+dx (valid output positions never cross a row boundary); the
    # precomputed mask zeroes outputs whose source pixel falls in the conv padding / wrap-around.
    # The rotation + mask are computed ONCE per tap and shared by all K+1 experts.
    # TODO(synk): at realistic C (>=128 per tile) switch to lax.fori_loop(0, 49, unroll=True)
    #             over taps to bound live ranges and compile time.
    for dyi in range(7):
        for dxi in range(7):
            t = dyi * 7 + dxi
            off = (dyi - 3) * W + (dxi - 3)
            if off == 0:
                shifted = x                                           # centre tap: no shift/mask
            else:
                shifted = pltpu.roll(x, shift=(-off) % HW, axis=1) * m_ref[t:t + 1, :]
            for i in range(K + 1):
                accs[i] = accs[i] + w_rows[i][:, t:t + 1] * shifted

    # Unweighted log-sum-exp over the K selected experts (multiply_by_gates=False in the
    # reference combine), plus the shared expert.  Max-subtraction keeps exp() in range.
    m_max = accs[0]
    for j in range(1, K):
        m_max = jnp.maximum(m_max, accs[j])
    s = jnp.zeros_like(m_max)
    for j in range(K):
        s = s + jnp.exp(accs[j] - m_max)
    y = m_max + jnp.log(s) + accs[K]                                  # accs[K] == shared expert

    y_ref[0] = y.astype(y_ref.dtype)                                  # single lane-dense store


# ----------------------------------------------------------------------------- glue (plain XLA)

def _cv_squared(x):
    x = x.astype(jnp.float32)
    if x.shape[0] == 1:
        return jnp.zeros((), jnp.float32)
    return jnp.var(x, ddof=1) / (jnp.mean(x) ** 2 + 1e-10)            # torch .var() is unbiased


def _router_gating(z, params, *, k, loss_coef):
    """Router 7x7 conv + gating matmul + top-k + load-balancing loss (tiny; MXU via XLA)."""
    B, C, H, W = z.shape
    E = params["expert_w"].shape[0]
    z32 = z.astype(jnp.float32)
    rw = params["router_w"].astype(jnp.float32)[None]                  # [1, C, 7, 7]
    rb = params["router_b"].astype(jnp.float32).reshape(1, 1, 1, 1)
    router = lax.conv_general_dilated(
        z32, rw, (1, 1), ((3, 3), (3, 3)),
        dimension_numbers=("NCHW", "OIHW", "NCHW")) + rb               # [B, 1, H, W]
    logits = router.reshape(B, H * W) @ params["w_gate"].astype(jnp.float32)   # [B, E]

    kk = min(k + 1, E)
    top_vals, top_idx = jax.lax.top_k(logits, kk)
    top_k_gates = jax.nn.softmax(top_vals[:, :k], axis=1)
    top_k_idx = top_idx[:, :k].astype(jnp.int32)                       # [B, k]
    gates = jnp.zeros((B, E), jnp.float32).at[
        jnp.arange(B)[:, None], top_k_idx].set(top_k_gates)

    importance = gates.sum(axis=0)
    load = (gates > 0).sum(axis=0).astype(jnp.float32)
    loss = loss_coef * (_cv_squared(importance) + _cv_squared(load))
    return top_k_idx, loss


# ----------------------------------------------------------------------------- wrapper

def moe_forward(z, params, *, k=2, loss_coef=0.01,
                storage_dtype=jnp.bfloat16, c_tile=None):
    B, C, H, W = z.shape
    HW = H * W
    E = params["expert_w"].shape[0]
    E1 = E + 1
    k = min(k, E)
    if c_tile is None:
        c_tile = C                                   # single channel tile at demo sizes
    assert C % c_tile == 0 and (c_tile == C or c_tile % 8 == 0), "c_tile must divide C (mult of 8)"

    # ---- routing first (plain XLA) ----
    top_k_idx, loss = _router_gating(z, params, k=k, loss_coef=loss_coef)

    # ---- parameter packing: [E1, C, 50] = 49 flattened taps + bias as the 50th column ----
    w_taps = jnp.concatenate([params["expert_w"].reshape(E, C, 49),
                              params["shared_w"].reshape(1, C, 49)], axis=0)       # [E1, C, 49]
    b_col = jnp.concatenate([params["expert_b"],
                             params["shared_b"][None]], axis=0)[:, :, None]         # [E1, C, 1]
    w_packed = jnp.concatenate([w_taps, b_col], axis=-1).astype(storage_dtype)      # [E1, C, 50]

    # Unpadded, lane-dense input: [B, C, H*W] (row-major reshape is free layout plumbing).
    z_flat = z.reshape(B, C, HW).astype(storage_dtype)

    # Per-tap validity masks in OUTPUT coordinates: mask[t, h*W+w] = 1 iff the source pixel
    # (h+dy, w+dx) exists (otherwise it lies in the conv zero-padding / row wrap).  Tiny, built
    # once in XLA, shared across the whole grid.
    pos = jnp.arange(HW, dtype=jnp.int32)
    row, col = pos // W, pos % W
    masks = []
    for dy in range(-3, 4):
        for dx in range(-3, 4):
            masks.append((row + dy >= 0) & (row + dy < H) & (col + dx >= 0) & (col + dx < W))
    mask49 = jnp.stack(masks).astype(jnp.float32)                                    # [49, HW]

    kernel = functools.partial(_moe_experts_kernel, E=E, C_t=c_tile, HW=HW, W=W, K=k)

    grid_spec = pltpu.PrefetchScalarGridSpec(
        num_scalar_prefetch=1,                        # flattened top-k ids land in SMEM
        grid=(B, C // c_tile),
        in_specs=[
            pl.BlockSpec((1, c_tile, HW), lambda b, ci, idx: (b, ci, 0)),
            pl.BlockSpec((E1, c_tile, 50), lambda b, ci, idx: (0, ci, 0)),
            pl.BlockSpec((49, HW), lambda b, ci, idx: (0, 0)),
        ],
        out_specs=pl.BlockSpec((1, c_tile, HW), lambda b, ci, idx: (b, ci, 0)),
    )
    # vmem_limit: above v5e's 16 MiB scoped default, below v7x's 64 MiB physical; on v6e this can
    # be raised further (128 MiB VMEM) if c_tile / blocks are grown.
    cparams = pltpu.CompilerParams(
        dimension_semantics=("parallel", "parallel"),
        vmem_limit_bytes=48 * 1024 * 1024)

    y_flat = pl.pallas_call(
        kernel,
        out_shape=jax.ShapeDtypeStruct((B, C, HW), jnp.float32),
        grid_spec=grid_spec,
        compiler_params=cparams,
    )(top_k_idx.reshape(-1), z_flat, w_packed, mask49)

    y = y_flat.reshape(B, C, H, W)                    # free layout plumbing back to NCHW
    return y, loss


# ----------------------------------------------------------------------------- pure-JAX reference

def _depthwise_conv7(x, w, b):
    """x:[B,C,H,W] f32, w:[C,7,7], b:[C] -> depthwise 7x7 conv, pad 3 (torch groups=dim)."""
    C = x.shape[1]
    return lax.conv_general_dilated(
        x, w[:, None], (1, 1), ((3, 3), (3, 3)),
        dimension_numbers=("NCHW", "OIHW", "NCHW"),
        feature_group_count=C) + b.reshape(1, C, 1, 1)


def moe_reference(z, params, *, k=2, loss_coef=0.01, storage_dtype=jnp.bfloat16):
    B, C, H, W = z.shape
    E = params["expert_w"].shape[0]
    k = min(k, E)
    top_k_idx, loss = _router_gating(z, params, k=k, loss_coef=loss_coef)

    rd = lambda a: a.astype(storage_dtype).astype(jnp.float32)        # same rounding as kernel
    zs = rd(z)
    shared = _depthwise_conv7(zs, rd(params["shared_w"]), rd(params["shared_b"]))
    experts = jnp.stack(
        [_depthwise_conv7(zs, rd(params["expert_w"][e]), rd(params["expert_b"][e]))
         for e in range(E)], axis=1)                                   # [B, E, C, H, W]
    sel = jnp.take_along_axis(experts, top_k_idx[:, :, None, None, None], axis=1)  # [B,k,C,H,W]
    m = sel.max(axis=1)
    y = m + jnp.log(jnp.sum(jnp.exp(sel - m[:, None]), axis=1)) + shared
    return y, loss


# ----------------------------------------------------------------------------- demo

if __name__ == "__main__":
    B, C, HH, E, K = 2, 4, 16, 4, 2          # w_gate expects HW == weight_h**2

    key = jax.random.PRNGKey(0)
    ks = jax.random.split(key, 8)
    z = jax.random.normal(ks[0], (B, C, HH, HH), jnp.float32)
    params = dict(
        expert_w=0.1 * jax.random.normal(ks[1], (E, C, 7, 7), jnp.float32),  # Conv2d(dim,dim,7,groups=dim)
        expert_b=0.1 * jax.random.normal(ks[2], (E, C), jnp.float32),
        shared_w=0.1 * jax.random.normal(ks[3], (C, 7, 7), jnp.float32),
        shared_b=0.1 * jax.random.normal(ks[4], (C,), jnp.float32),
        router_w=0.1 * jax.random.normal(ks[5], (C, 7, 7), jnp.float32),     # Conv2d(dim,1,7)
        router_b=0.1 * jax.random.normal(ks[6], (1,), jnp.float32),
        w_gate=0.1 * jax.random.normal(ks[7], (HH * HH, E), jnp.float32),
    )

    y, loss = moe_forward(z, params, k=K, loss_coef=0.01)
    y = jax.block_until_ready(y)
    loss = jax.block_until_ready(loss)

    assert y.shape == (B, C, HH, HH), y.shape
    assert bool(jnp.all(jnp.isfinite(y))) and bool(jnp.isfinite(loss))

    # Correctness check against a pure-JAX/XLA reference of the same math.
    y_ref, loss_ref = moe_reference(z, params, k=K, loss_coef=0.01)
    y_ref = jax.block_until_ready(y_ref)
    err = float(jnp.max(jnp.abs(y - y_ref)))
    assert err < 2e-3, f"max abs error vs reference: {err}"
    assert abs(float(loss) - float(loss_ref)) < 1e-5

    print("KERNEL_OK")
</pallas_src>

<mosaic_0001>
module attributes {stable_mosaic.version = 11 : i64} {
  func.func @_moe_experts_kernel(%arg0: i32, %arg1: i32, %arg2: memref<4xi32, #tpu.memory_space<smem>>, %arg3: memref<1x4x256xbf16, #tpu.memory_space<vmem>>, %arg4: memref<5x4x50xbf16, #tpu.memory_space<vmem>>, %arg5: memref<49x256xf32, #tpu.memory_space<vmem>>, %arg6: memref<1x4x256xf32, #tpu.memory_space<vmem>>) attributes {dimension_semantics = [#tpu.dimension_semantics<parallel>, #tpu.dimension_semantics<parallel>], iteration_bounds = array<i64: 2, 1>, scalar_prefetch = 1 : i64, scratch_operands = 0 : i64, tpu.core_type = #tpu.core_type<tc>, window_params = [{transform_indices = @transform_0, window_bounds = array<i64: 1, 4, 256>}, {transform_indices = @transform_1, window_bounds = array<i64: 5, 4, 50>}, {pipeline_mode = #tpu.pipeline_mode<synchronous>, transform_indices = @transform_2, window_bounds = array<i64: 49, 256>}, {transform_indices = @transform_3, window_bounds = array<i64: 1, 4, 256>}]} {
    %c0 = arith.constant 0 : index
    %c0_0 = arith.constant 0 : index
    %c0_1 = arith.constant 0 : index
    %0 = vector.load %arg3[%c0, %c0_0, %c0_1] : memref<1x4x256xbf16, #tpu.memory_space<vmem>>, vector<1x4x256xbf16>
    %1 = vector.shape_cast %0 : vector<1x4x256xbf16> to vector<4x256xbf16>
    %2 = arith.extf %1 : vector<4x256xbf16> to vector<4x256xf32>
    %c2_i32 = arith.constant 2 : i32
    %3 = arith.muli %arg0, %c2_i32 : i32
    %c0_i32 = arith.constant 0 : i32
    %4 = arith.addi %3, %c0_i32 : i32
    %5 = arith.index_cast %4 : i32 to index
    %6 = memref.load %arg2[%5] : memref<4xi32, #tpu.memory_space<smem>>
    %7 = arith.index_cast %6 : i32 to index
    %c0_2 = arith.constant 0 : index
    %c0_3 = arith.constant 0 : index
    %8 = vector.load %arg4[%7, %c0_2, %c0_3] : memref<5x4x50xbf16, #tpu.memory_space<vmem>>, vector<1x4x50xbf16>
    %9 = vector.shape_cast %8 : vector<1x4x50xbf16> to vector<4x50xbf16>
    %10 = arith.extf %9 : vector<4x50xbf16> to vector<4x50xf32>
    %c2_i32_4 = arith.constant 2 : i32
    %11 = arith.muli %arg0, %c2_i32_4 : i32
    %c1_i32 = arith.constant 1 : i32
    %12 = arith.addi %11, %c1_i32 : i32
    %13 = arith.index_cast %12 : i32 to index
    %14 = memref.load %arg2[%13] : memref<4xi32, #tpu.memory_space<smem>>
    %15 = arith.index_cast %14 : i32 to index
    %c0_5 = arith.constant 0 : index
    %c0_6 = arith.constant 0 : index
    %16 = vector.load %arg4[%15, %c0_5, %c0_6] : memref<5x4x50xbf16, #tpu.memory_space<vmem>>, vector<1x4x50xbf16>
    %17 = vector.shape_cast %16 : vector<1x4x50xbf16> to vector<4x50xbf16>
    %18 = arith.extf %17 : vector<4x50xbf16> to vector<4x50xf32>
    %c4 = arith.constant 4 : index
    %c0_7 = arith.constant 0 : index
    %c0_8 = arith.constant 0 : index
    %19 = vector.load %arg4[%c4, %c0_7, %c0_8] : memref<5x4x50xbf16, #tpu.memory_space<vmem>>, vector<1x4x50xbf16>
    %20 = vector.shape_cast %19 : vector<1x4x50xbf16> to vector<4x50xbf16>
    %21 = arith.extf %20 : vector<4x50xbf16> to vector<4x50xf32>
    %22 = vector.extract_strided_slice %10 {offsets = [0, 49], sizes = [4, 1], strides = [1, 1]} : vector<4x50xf32> to vector<4x1xf32>
    %23 = vector.shape_cast %22 : vector<4x1xf32> to vector<4x1xf32>
    %24 = vector.broadcast %23 : vector<4x1xf32> to vector<4x256xf32>
    %25 = vector.extract_strided_slice %18 {offsets = [0, 49], sizes = [4, 1], strides = [1, 1]} : vector<4x50xf32> to vector<4x1xf32>
    %26 = vector.shape_cast %25 : vector<4x1xf32> to vector<4x1xf32>
    %27 = vector.broadcast %26 : vector<4x1xf32> to vector<4x256xf32>
    %28 = vector.extract_strided_slice %21 {offsets = [0, 49], sizes = [4, 1], strides = [1, 1]} : vector<4x50xf32> to vector<4x1xf32>
    %29 = vector.shape_cast %28 : vector<4x1xf32> to vector<4x1xf32>
    %30 = vector.broadcast %29 : vector<4x1xf32> to vector<4x256xf32>
    %c51_i32 = arith.constant 51 : i32
    %31 = tpu.dynamic_rotate %2 by %c51_i32 dim 1 : vector<4x256xf32>, i32 -> vector<4x256xf32>
    %c0_9 = arith.constant 0 : index
    %c0_10 = arith.constant 0 : index
    %32 = vector.load %arg5[%c0_9, %c0_10] : memref<49x256xf32, #tpu.memory_space<vmem>>, vector<1x256xf32>
    %33 = vector.broadcast %32 : vector<1x256xf32> to vector<4x256xf32>
    %34 = arith.mulf %31, %33 : vector<4x256xf32>
    %35 = vector.extract_strided_slice %10 {offsets = [0, 0], sizes = [4, 1], strides = [1, 1]} : vector<4x50xf32> to vector<4x1xf32>
    %36 = vector.broadcast %35 : vector<4x1xf32> to vector<4x256xf32>
    %37 = arith.mulf %36, %34 : vector<4x256xf32>
    %38 = arith.addf %24, %37 : vector<4x256xf32>
    %39 = vector.extract_strided_slice %18 {offsets = [0, 0], sizes = [4, 1], strides = [1, 1]} : vector<4x50xf32> to vector<4x1xf32>
    %40 = vector.broadcast %39 : vector<4x1xf32> to vector<4x256xf32>
    %41 = arith.mulf %40, %34 : vector<4x256xf32>
    %42 = arith.addf %27, %41 : vector<4x256xf32>
    %43 = vector.extract_strided_slice %21 {offsets = [0, 0], sizes = [4, 1], strides = [1, 1]} : vector<4x50xf32> to vector<4x1xf32>
    %44 = vector.broadcast %43 : vector<4x1xf32> to vector<4x256xf32>
    %45 = arith.mulf %44, %34 : vector<4x256xf32>
    %46 = arith.addf %30, %45 : vector<4x256xf32>
    %c50_i32 = arith.constant 50 : i32
    %47 = tpu.dynamic_rotate %2 by %c50_i32 dim 1 : vector<4x256xf32>, i32 -> vector<4x256xf32>
    %c1 = arith.constant 1 : index
    %c0_11 = arith.constant 0 : index
    %48 = vector.load %arg5[%c1, %c0_11] : memref<49x256xf32, #tpu.memory_space<vmem>>, vector<1x256xf32>
    %49 = vector.broadcast %48 : vector<1x256xf32> to vector<4x256xf32>
    %50 = arith.mulf %47, %49 : vector<4x256xf32>
    %51 = vector.extract_strided_slice %10 {offsets = [0, 1], sizes = [4, 1], strides = [1, 1]} : vector<4x50xf32> to vector<4x1xf32>
    %52 = vector.broadcast %51 : vector<4x1xf32> to vector<4x256xf32>
    %53 = arith.mulf %52, %50 : vector<4x256xf32>
    %54 = arith.addf %38, %53 : vector<4x256xf32>
    %55 = vector.extract_strided_slice %18 {offsets = [0, 1], sizes = [4, 1], strides = [1, 1]} : vector<4x50xf32> to vector<4x1xf32>
    %56 = vector.broadcast %55 : vector<4x1xf32> to vector<4x256xf32>
    %57 = arith.mulf %56, %50 : vector<4x256xf32>
    %58 = arith.addf %42, %57 : vector<4x256xf32>
    %59 = vector.extract_strided_slice %21 {offsets = [0, 1], sizes = [4, 1], strides = [1, 1]} : vector<4x50xf32> to vector<4x1xf32>
    %60 = vector.broadcast %59 : vector<4x1xf32> to vector<4x256xf32>
    %61 = arith.mulf %60, %50 : vector<4x256xf32>
    %62 = arith.addf %46, %61 : vector<4x256xf32>
    %c49_i32 = arith.constant 49 : i32
    %63 = tpu.dynamic_rotate %2 by %c49_i32 dim 1 : vector<4x256xf32>, i32 -> vector<4x256xf32>
    %c2 = arith.constant 2 : index
    %c0_12 = arith.constant 0 : index
    %64 = vector.load %arg5[%c2, %c0_12] : memref<49x256xf32, #tpu.memory_space<vmem>>, vector<1x256xf32>
    %65 = vector.broadcast %64 : vector<1x256xf32> to vector<4x256xf32>
    %66 = arith.mulf %63, %65 : vector<4x256xf32>
    %67 = vector.extract_strided_slice %10 {offsets = [0, 2], sizes = [4, 1], strides = [1, 1]} : vector<4x50xf32> to vector<4x1xf32>
    %68 = vector.broadcast %67 : vector<4x1xf32> to vector<4x256xf32>
    %69 = arith.mulf %68, %66 : vector<4x256xf32>
    %70 = arith.addf %54, %69 : vector<4x256xf32>
    %71 = vector.extract_strided_slice %18 {offsets = [0, 2], sizes = [4, 1], strides = [1, 1]} : vector<4x50xf32> to vector<4x1xf32>
    %72 = vector.broadcast %71 : vector<4x1xf32> to vector<4x256xf32>
    %73 = arith.mulf %72, %66 : vector<4x256xf32>
    %74 = arith.addf %58, %73 : vector<4x256xf32>
    %75 = vector.extract_strided_slice %21 {offsets = [0, 2], sizes = [4, 1], strides = [1, 1]} : vector<4x50xf32> to vector<4x1xf32>
    %76 = vector.broadcast %75 : vector<4x1xf32> to vector<4x256xf32>
    %77 = arith.mulf %76, %66 : vector<4x256xf32>
    %78 = arith.addf %62, %77 : vector<4x256xf32>
    %c48_i32 = arith.constant 48 : i32
    %79 = tpu.dynamic_rotate %2 by %c48_i32 dim 1 : vector<4x256xf32>, i32 -> vector<4x256xf32>
    %c3 = arith.constant 3 : index
    %c0_13 = arith.constant 0 : index
    %80 = vector.load %arg5[%c3, %c0_13] : memref<49x256xf32, #tpu.memory_space<vmem>>, vector<1x256xf32>
    %81 = vector.broadcast %80 : vector<1x256xf32> to vector<4x256xf32>
    %82 = arith.mulf %79, %81 : vector<4x256xf32>
    %83 = vector.extract_strided_slice %10 {offsets = [0, 3], sizes = [4, 1], strides = [1, 1]} : vector<4x50xf32> to vector<4x1xf32>
    %84 = vector.broadcast %83 : vector<4x1xf32> to vector<4x256xf32>
    %85 = arith.mulf %84, %82 : vector<4x256xf32>
    %86 = arith.addf %70, %85 : vector<4x256xf32>
    %87 = vector.extract_strided_slice %18 {offsets = [0, 3], sizes = [4, 1], strides = [1, 1]} : vector<4x50xf32> to vector<4x1xf32>
    %88 = vector.broadcast %87 : vector<4x1xf32> to vector<4x256xf32>
    %89 = arith.mulf %88, %82 : vector<4x256xf32>
    %90 = arith.addf %74, %89 : vector<4x256xf32>
    %91 = vector.extract_strided_slice %21 {offsets = [0, 3], sizes = [4, 1], strides = [1, 1]} : vector<4x50xf32> to vector<4x1xf32>
    %92 = vector.broadcast %91 : vector<4x1xf32> to vector<4x256xf32>
    %93 = arith.mulf %92, %82 : vector<4x256xf32>
    %94 = arith.addf %78, %93 : vector<4x256xf32>
    %c47_i32 = arith.constant 47 : i32
    %95 = tpu.dynamic_rotate %2 by %c47_i32 dim 1 : vector<4x256xf32>, i32 -> vector<4x256xf32>
    %c4_14 = arith.constant 4 : index
    %c0_15 = arith.constant 0 : index
    %96 = vector.load %arg5[%c4_14, %c0_15] : memref<49x256xf32, #tpu.memory_space<vmem>>, vector<1x256xf32>
    %97 = vector.broadcast %96 : vector<1x256xf32> to vector<4x256xf32>
    %98 = arith.mulf %95, %97 : vector<4x256xf32>
    %99 = vector.extract_strided_slice %10 {offsets = [0, 4], sizes = [4, 1], strides = [1, 1]} : vector<4x50xf32> to vector<4x1xf32>
    %100 = vector.broadcast %99 : vector<4x1xf32> to vector<4x256xf32>
    %101 = arith.mulf %100, %98 : vector<4x256xf32>
    %102 = arith.addf %86, %101 : vector<4x256xf32>
    %103 = vector.extract_strided_slice %18 {offsets = [0, 4], sizes = [4, 1], strides = [1, 1]} : vector<4x50xf32> to vector<4x1xf32>
    %104 = vector.broadcast %103 : vector<4x1xf32> to vector<4x256xf32>
    %105 = arith.mulf %104, %98 : vector<4x256xf32>
    %106 = arith.addf %90, %105 : vector<4x256xf32>
    %107 = vector.extract_strided_slice %21 {offsets = [0, 4], sizes = [4, 1], strides = [1, 1]} : vector<4x50xf32> to vector<4x1xf32>
    %108 = vector.broadcast %107 : vector<4x1xf32> to vector<4x256xf32>
    %109 = arith.mulf %108, %98 : vector<4x256xf32>
    %110 = arith.addf %94, %109 : vector<4x256xf32>
    %c46_i32 = arith.constant 46 : i32
    %111 = tpu.dynamic_rotate %2 by %c46_i32 dim 1 : vector<4x256xf32>, i32 -> vector<4x256xf32>
    %c5 = arith.constant 5 : index
    %c0_16 = arith.constant 0 : index
    %112 = vector.load %arg5[%c5, %c0_16] : memref<49x256xf32, #tpu.memory_space<vmem>>, vector<1x256xf32>
    %113 = vector.broadcast %112 : vector<1x256xf32> to vector<4x256xf32>
    %114 = arith.mulf %111, %113 : vector<4x256xf32>
    %115 = vector.extract_strided_slice %10 {offsets = [0, 5], sizes = [4, 1], strides = [1, 1]} : vector<4x50xf32> to vector<4x1xf32>
    %116 = vector.broadcast %115 : vector<4x1xf32> to vector<4x256xf32>
    %117 = arith.mulf %116, %114 : vector<4x256xf32>
    %118 = arith.addf %102, %117 : vector<4x256xf32>
    %119 = vector.extract_strided_slice %18 {offsets = [0, 5], sizes = [4, 1], strides = [1, 1]} : vector<4x50xf32> to vector<4x1xf32>
    %120 = vector.broadcast %119 : vector<4x1xf32> to vector<4x256xf32>
    %121 = arith.mulf %120, %114 : vector<4x256xf32>
    %122 = arith.addf %106, %121 : vector<4x256xf32>
    %123 = vector.extract_strided_slice %21 {offsets = [0, 5], sizes = [4, 1], strides = [1, 1]} : vector<4x50xf32> to vector<4x1xf32>
    %124 = vector.broadcast %123 : vector<4x1xf32> to vector<4x256xf32>
    %125 = arith.mulf %124, %114 : vector<4x256xf32>
    %126 = arith.addf %110, %125 : vector<4x256xf32>
    %c45_i32 = arith.constant 45 : i32
    %127 = tpu.dynamic_rotate %2 by %c45_i32 dim 1 : vector<4x256xf32>, i32 -> vector<4x256xf32>
    %c6 = arith.constant 6 : index
    %c0_17 = arith.constant 0 : index
    %128 = vector.load %arg5[%c6, %c0_17] : memref<49x256xf32, #tpu.memory_space<vmem>>, vector<1x256xf32>
    %129 = vector.broadcast %128 : vector<1x256xf32> to vector<4x256xf32>
    %130 = arith.mulf %127, %129 : vector<4x256xf32>
    %131 = vector.extract_strided_slice %10 {offsets = [0, 6], sizes = [4, 1], strides = [1, 1]} : vector<4x50xf32> to vector<4x1xf32>
    %132 = vector.broadcast %131 : vector<4x1xf32> to vector<4x256xf32>
    %133 = arith.mulf %132, %130 : vector<4x256xf32>
    %134 = arith.addf %118, %133 : vector<4x256xf32>
    %135 = vector.extract_strided_slice %18 {offsets = [0, 6], sizes = [4, 1], strides = [1, 1]} : vector<4x50xf32> to vector<4x1xf32>
    %136 = vector.broadcast %135 : vector<4x1xf32> to vector<4x256xf32>
    %137 = arith.mulf %136, %130 : vector<4x256xf32>
    %138 = arith.addf %122, %137 : vector<4x256xf32>
    %139 = vector.extract_strided_slice %21 {offsets = [0, 6], sizes = [4, 1], strides = [1, 1]} : vector<4x50xf32> to vector<4x1xf32>
    %140 = vector.broadcast %139 : vector<4x1xf32> to vector<4x256xf32>
    %141 = arith.mulf %140, %130 : vector<4x256xf32>
    %142 = arith.addf %126, %141 : vector<4x256xf32>
    %c35_i32 = arith.constant 35 : i32
    %143 = tpu.dynamic_rotate %2 by %c35_i32 dim 1 : vector<4x256xf32>, i32 -> vector<4x256xf32>
    %c7 = arith.constant 7 : index
    %c0_18 = arith.constant 0 : index
    %144 = vector.load %arg5[%c7, %c0_18] : memref<49x256xf32, #tpu.memory_space<vmem>>, vector<1x256xf32>
    %145 = vector.broadcast %144 : vector<1x256xf32> to vector<4x256xf32>
    %146 = arith.mulf %143, %145 : vector<4x256xf32>
    %147 = vector.extract_strided_slice %10 {offsets = [0, 7], sizes = [4, 1], strides = [1, 1]} : vector<4x50xf32> to vector<4x1xf32>
    %148 = vector.broadcast %147 : vector<4x1xf32> to vector<4x256xf32>
    %149 = arith.mulf %148, %146 : vector<4x256xf32>
    %150 = arith.addf %134, %149 : vector<4x256xf32>
    %151 = vector.extract_strided_slice %18 {offsets = [0, 7], sizes = [4, 1], strides = [1, 1]} : vector<4x50xf32> to vector<4x1xf32>
    %152 = vector.broadcast %151 : vector<4x1xf32> to vector<4x256xf32>
    %153 = arith.mulf %152, %146 : vector<4x256xf32>
    %154 = arith.addf %138, %153 : vector<4x256xf32>
    %155 = vector.extract_strided_slice %21 {offsets = [0, 7], sizes = [4, 1], strides = [1, 1]} : vector<4x50xf32> to vector<4x1xf32>
    %156 = vector.broadcast %155 : vector<4x1xf32> to vector<4x256xf32>
    %157 = arith.mulf %156, %146 : vector<4x256xf32>
    %158 = arith.addf %142, %157 : vector<4x256xf32>
    %c34_i32 = arith.constant 34 : i32
    %159 = tpu.dynamic_rotate %2 by %c34_i32 dim 1 : vector<4x256xf32>, i32 -> vector<4x256xf32>
    %c8 = arith.constant 8 : index
    %c0_19 = arith.constant 0 : index
    %160 = vector.load %arg5[%c8, %c0_19] : memref<49x256xf32, #tpu.memory_space<vmem>>, vector<1x256xf32>
    %161 = vector.broadcast %160 : vector<1x256xf32> to vector<4x256xf32>
    %162 = arith.mulf %159, %161 : vector<4x256xf32>
    %163 = vector.extract_strided_slice %10 {offsets = [0, 8], sizes = [4, 1], strides = [1, 1]} : vector<4x50xf32> to vector<4x1xf32>
    %164 = vector.broadcast %163 : vector<4x1xf32> to vector<4x256xf32>
    %165 = arith.mulf %164, %162 : vector<4x256xf32>
    %166 = arith.addf %150, %165 : vector<4x256xf32>
    %167 = vector.extract_strided_slice %18 {offsets = [0, 8], sizes = [4, 1], strides = [1, 1]} : vector<4x50xf32> to vector<4x1xf32>
    %168 = vector.broadcast %167 : vector<4x1xf32> to vector<4x256xf32>
    %169 = arith.mulf %168, %162 : vector<4x256xf32>
    %170 = arith.addf %154, %169 : vector<4x256xf32>
    %171 = vector.extract_strided_slice %21 {offsets = [0, 8], sizes = [4, 1], strides = [1, 1]} : vector<4x50xf32> to vector<4x1xf32>
    %172 = vector.broadcast %171 : vector<4x1xf32> to vector<4x256xf32>
    %173 = arith.mulf %172, %162 : vector<4x256xf32>
    %174 = arith.addf %158, %173 : vector<4x256xf32>
    %c33_i32 = arith.constant 33 : i32
    %175 = tpu.dynamic_rotate %2 by %c33_i32 dim 1 : vector<4x256xf32>, i32 -> vector<4x256xf32>
    %c9 = arith.constant 9 : index
    %c0_20 = arith.constant 0 : index
    %176 = vector.load %arg5[%c9, %c0_20] : memref<49x256xf32, #tpu.memory_space<vmem>>, vector<1x256xf32>
    %177 = vector.broadcast %176 : vector<1x256xf32> to vector<4x256xf32>
    %178 = arith.mulf %175, %177 : vector<4x256xf32>
    %179 = vector.extract_strided_slice %10 {offsets = [0, 9], sizes = [4, 1], strides = [1, 1]} : vector<4x50xf32> to vector<4x1xf32>
    %180 = vector.broadcast %179 : vector<4x1xf32> to vector<4x256xf32>
    %181 = arith.mulf %180, %178 : vector<4x256xf32>
    %182 = arith.addf %166, %181 : vector<4x256xf32>
    %183 = vector.extract_strided_slice %18 {offsets = [0, 9], sizes = [4, 1], strides = [1, 1]} : vector<4x50xf32> to vector<4x1xf32>
    %184 = vector.broadcast %183 : vector<4x1xf32> to vector<4x256xf32>
    %185 = arith.mulf %184, %178 : vector<4x256xf32>
    %186 = arith.addf %170, %185 : vector<4x256xf32>
    %187 = vector.extract_strided_slice %21 {offsets = [0, 9], sizes = [4, 1], strides = [1, 1]} : vector<4x50xf32> to vector<4x1xf32>
    %188 = vector.broadcast %187 : vector<4x1xf32> to vector<4x256xf32>
    %189 = arith.mulf %188, %178 : vector<4x256xf32>
    %190 = arith.addf %174, %189 : vector<4x256xf32>
    %c32_i32 = arith.constant 32 : i32
    %191 = tpu.dynamic_rotate %2 by %c32_i32 dim 1 : vector<4x256xf32>, i32 -> vector<4x256xf32>
    %c10 = arith.constant 10 : index
    %c0_21 = arith.constant 0 : index
    %192 = vector.load %arg5[%c10, %c0_21] : memref<49x256xf32, #tpu.memory_space<vmem>>, vector<1x256xf32>
    %193 = vector.broadcast %192 : vector<1x256xf32> to vector<4x256xf32>
    %194 = arith.mulf %191, %193 : vector<4x256xf32>
    %195 = vector.extract_strided_slice %10 {offsets = [0, 10], sizes = [4, 1], strides = [1, 1]} : vector<4x50xf32> to vector<4x1xf32>
    %196 = vector.broadcast %195 : vector<4x1xf32> to vector<4x256xf32>
    %197 = arith.mulf %196, %194 : vector<4x256xf32>
    %198 = arith.addf %182, %197 : vector<4x256xf32>
    %199 = vector.extract_strided_slice %18 {offsets = [0, 10], sizes = [4, 1], strides = [1, 1]} : vector<4x50xf32> to vector<4x1xf32>
    %200 = vector.broadcast %199 : vector<4x1xf32> to vector<4x256xf32>
    %201 = arith.mulf %200, %194 : vector<4x256xf32>
    %202 = arith.addf %186, %201 : vector<4x256xf32>
    %203 = vector.extract_strided_slice %21 {offsets = [0, 10], sizes = [4, 1], strides = [1, 1]} : vector<4x50xf32> to vector<4x1xf32>
    %204 = vector.broadcast %203 : vector<4x1xf32> to vector<4x256xf32>
    %205 = arith.mulf %204, %194 : vector<4x256xf32>
    %206 = arith.addf %190, %205 : vector<4x256xf32>
    %c31_i32 = arith.constant 31 : i32
    %207 = tpu.dynamic_rotate %2 by %c31_i32 dim 1 : vector<4x256xf32>, i32 -> vector<4x256xf32>
    %c11 = arith.constant 11 : index
    %c0_22 = arith.constant 0 : index
    %208 = vector.load %arg5[%c11, %c0_22] : memref<49x256xf32, #tpu.memory_space<vmem>>, vector<1x256xf32>
    %209 = vector.broadcast %208 : vector<1x256xf32> to vector<4x256xf32>
    %210 = arith.mulf %207, %209 : vector<4x256xf32>
    %211 = vector.extract_strided_slice %10 {offsets = [0, 11], sizes = [4, 1], strides = [1, 1]} : vector<4x50xf32> to vector<4x1xf32>
    %212 = vector.broadcast %211 : vector<4x1xf32> to vector<4x256xf32>
    %213 = arith.mulf %212, %210 : vector<4x256xf32>
    %214 = arith.addf %198, %213 : vector<4x256xf32>
    %215 = vector.extract_strided_slice %18 {offsets = [0, 11], sizes = [4, 1], strides = [1, 1]} : vector<4x50xf32> to vector<4x1xf32>
    %216 = vector.broadcast %215 : vector<4x1xf32> to vector<4x256xf32>
    %217 = arith.mulf %216, %210 : vector<4x256xf32>
    %218 = arith.addf %202, %217 : vector<4x256xf32>
    %219 = vector.extract_strided_slice %21 {offsets = [0, 11], sizes = [4, 1], strides = [1, 1]} : vector<4x50xf32> to vector<4x1xf32>
    %220 = vector.broadcast %219 : vector<4x1xf32> to vector<4x256xf32>
    %221 = arith.mulf %220, %210 : vector<4x256xf32>
    %222 = arith.addf %206, %221 : vector<4x256xf32>
    %c30_i32 = arith.constant 30 : i32
    %223 = tpu.dynamic_rotate %2 by %c30_i32 dim 1 : vector<4x256xf32>, i32 -> vector<4x256xf32>
    %c12 = arith.constant 12 : index
    %c0_23 = arith.constant 0 : index
    %224 = vector.load %arg5[%c12, %c0_23] : memref<49x256xf32, #tpu.memory_space<vmem>>, vector<1x256xf32>
    %225 = vector.broadcast %224 : vector<1x256xf32> to vector<4x256xf32>
    %226 = arith.mulf %223, %225 : vector<4x256xf32>
    %227 = vector.extract_strided_slice %10 {offsets = [0, 12], sizes = [4, 1], strides = [1, 1]} : vector<4x50xf32> to vector<4x1xf32>
    %228 = vector.broadcast %227 : vector<4x1xf32> to vector<4x256xf32>
    %229 = arith.mulf %228, %226 : vector<4x256xf32>
    %230 = arith.addf %214, %229 : vector<4x256xf32>
    %231 = vector.extract_strided_slice %18 {offsets = [0, 12], sizes = [4, 1], strides = [1, 1]} : vector<4x50xf32> to vector<4x1xf32>
    %232 = vector.broadcast %231 : vector<4x1xf32> to vector<4x256xf32>
    %233 = arith.mulf %232, %226 : vector<4x256xf32>
    %234 = arith.addf %218, %233 : vector<4x256xf32>
    %235 = vector.extract_strided_slice %21 {offsets = [0, 12], sizes = [4, 1], strides = [1, 1]} : vector<4x50xf32> to vector<4x1xf32>
    %236 = vector.broadcast %235 : vector<4x1xf32> to vector<4x256xf32>
    %237 = arith.mulf %236, %226 : vector<4x256xf32>
    %238 = arith.addf %222, %237 : vector<4x256xf32>
    %c29_i32 = arith.constant 29 : i32
    %239 = tpu.dynamic_rotate %2 by %c29_i32 dim 1 : vector<4x256xf32>, i32 -> vector<4x256xf32>
    %c13 = arith.constant 13 : index
    %c0_24 = arith.constant 0 : index
    %240 = vector.load %arg5[%c13, %c0_24] : memref<49x256xf32, #tpu.memory_space<vmem>>, vector<1x256xf32>
    %241 = vector.broadcast %240 : vector<1x256xf32> to vector<4x256xf32>
    %242 = arith.mulf %239, %241 : vector<4x256xf32>
    %243 = vector.extract_strided_slice %10 {offsets = [0, 13], sizes = [4, 1], strides = [1, 1]} : vector<4x50xf32> to vector<4x1xf32>
    %244 = vector.broadcast %243 : vector<4x1xf32> to vector<4x256xf32>
    %245 = arith.mulf %244, %242 : vector<4x256xf32>
    %246 = arith.addf %230, %245 : vector<4x256xf32>
    %247 = vector.extract_strided_slice %18 {offsets = [0, 13], sizes = [4, 1], strides = [1, 1]} : vector<4x50xf32> to vector<4x1xf32>
    %248 = vector.broadcast %247 : vector<4x1xf32> to vector<4x256xf32>
    %249 = arith.mulf %248, %242 : vector<4x256xf32>
    %250 = arith.addf %234, %249 : vector<4x256xf32>
    %251 = vector.extract_strided_slice %21 {offsets = [0, 13], sizes = [4, 1], strides = [1, 1]} : vector<4x50xf32> to vector<4x1xf32>
    %252 = vector.broadcast %251 : vector<4x1xf32> to vector<4x256xf32>
    %253 = arith.mulf %252, %242 : vector<4x256xf32>
    %254 = arith.addf %238, %253 : vector<4x256xf32>
    %c19_i32 = arith.constant 19 : i32
    %255 = tpu.dynamic_rotate %2 by %c19_i32 dim 1 : vector<4x256xf32>, i32 -> vector<4x256xf32>
    %c14 = arith.constant 14 : index
    %c0_25 = arith.constant 0 : index
    %256 = vector.load %arg5[%c14, %c0_25] : memref<49x256xf32, #tpu.memory_space<vmem>>, vector<1x256xf32>
    %257 = vector.broadcast %256 : vector<1x256xf32> to vector<4x256xf32>
    %258 = arith.mulf %255, %257 : vector<4x256xf32>
    %259 = vector.extract_strided_slice %10 {offsets = [0, 14], sizes = [4, 1], strides = [1, 1]} : vector<4x50xf32> to vector<4x1xf32>
    %260 = vector.broadcast %259 : vector<4x1xf32> to vector<4x256xf32>
    %261 = arith.mulf %260, %258 : vector<4x256xf32>
    %262 = arith.addf %246, %261 : vector<4x256xf32>
    %263 = vector.extract_strided_slice %18 {offsets = [0, 14], sizes = [4, 1], strides = [1, 1]} : vector<4x50xf32> to vector<4x1xf32>
    %264 = vector.broadcast %263 : vector<4x1xf32> to vector<4x256xf32>
    %265 = arith.mulf %264, %258 : vector<4x256xf32>
    %266 = arith.addf %250, %265 : vector<4x256xf32>
    %267 = vector.extract_strided_slice %21 {offsets = [0, 14], sizes = [4, 1], strides = [1, 1]} : vector<4x50xf32> to vector<4x1xf32>
    %268 = vector.broadcast %267 : vector<4x1xf32> to vector<4x256xf32>
    %269 = arith.mulf %268, %258 : vector<4x256xf32>
    %270 = arith.addf %254, %269 : vector<4x256xf32>
    %c18_i32 = arith.constant 18 : i32
    %271 = tpu.dynamic_rotate %2 by %c18_i32 dim 1 : vector<4x256xf32>, i32 -> vector<4x256xf32>
    %c15 = arith.constant 15 : index
    %c0_26 = arith.constant 0 : index
    %272 = vector.load %arg5[%c15, %c0_26] : memref<49x256xf32, #tpu.memory_space<vmem>>, vector<1x256xf32>
    %273 = vector.broadcast %272 : vector<1x256xf32> to vector<4x256xf32>
    %274 = arith.mulf %271, %273 : vector<4x256xf32>
    %275 = vector.extract_strided_slice %10 {offsets = [0, 15], sizes = [4, 1], strides = [1, 1]} : vector<4x50xf32> to vector<4x1xf32>
    %276 = vector.broadcast %275 : vector<4x1xf32> to vector<4x256xf32>
    %277 = arith.mulf %276, %274 : vector<4x256xf32>
    %278 = arith.addf %262, %277 : vector<4x256xf32>
    %279 = vector.extract_strided_slice %18 {offsets = [0, 15], sizes = [4, 1], strides = [1, 1]} : vector<4x50xf32> to vector<4x1xf32>
    %280 = vector.broadcast %279 : vector<4x1xf32> to vector<4x256xf32>
    %281 = arith.mulf %280, %274 : vector<4x256xf32>
    %282 = arith.addf %266, %281 : vector<4x256xf32>
    %283 = vector.extract_strided_slice %21 {offsets = [0, 15], sizes = [4, 1], strides = [1, 1]} : vector<4x50xf32> to vector<4x1xf32>
    %284 = vector.broadcast %283 : vector<4x1xf32> to vector<4x256xf32>
    %285 = arith.mulf %284, %274 : vector<4x256xf32>
    %286 = arith.addf %270, %285 : vector<4x256xf32>
    %c17_i32 = arith.constant 17 : i32
    %287 = tpu.dynamic_rotate %2 by %c17_i32 dim 1 : vector<4x256xf32>, i32 -> vector<4x256xf32>
    %c16 = arith.constant 16 : index
    %c0_27 = arith.constant 0 : index
    %288 = vector.load %arg5[%c16, %c0_27] : memref<49x256xf32, #tpu.memory_space<vmem>>, vector<1x256xf32>
    %289 = vector.broadcast %288 : vector<1x256xf32> to vector<4x256xf32>
    %290 = arith.mulf %287, %289 : vector<4x256xf32>
    %291 = vector.extract_strided_slice %10 {offsets = [0, 16], sizes = [4, 1], strides = [1, 1]} : vector<4x50xf32> to vector<4x1xf32>
    %292 = vector.broadcast %291 : vector<4x1xf32> to vector<4x256xf32>
    %293 = arith.mulf %292, %290 : vector<4x256xf32>
    %294 = arith.addf %278, %293 : vector<4x256xf32>
    %295 = vector.extract_strided_slice %18 {offsets = [0, 16], sizes = [4, 1], strides = [1, 1]} : vector<4x50xf32> to vector<4x1xf32>
    %296 = vector.broadcast %295 : vector<4x1xf32> to vector<4x256xf32>
    %297 = arith.mulf %296, %290 : vector<4x256xf32>
    %298 = arith.addf %282, %297 : vector<4x256xf32>
    %299 = vector.extract_strided_slice %21 {offsets = [0, 16], sizes = [4, 1], strides = [1, 1]} : vector<4x50xf32> to vector<4x1xf32>
    %300 = vector.broadcast %299 : vector<4x1xf32> to vector<4x256xf32>
    %301 = arith.mulf %300, %290 : vector<4x256xf32>
    %302 = arith.addf %286, %301 : vector<4x256xf32>
    %c16_i32 = arith.constant 16 : i32
    %303 = tpu.dynamic_rotate %2 by %c16_i32 dim 1 : vector<4x256xf32>, i32 -> vector<4x256xf32>
    %c17 = arith.constant 17 : index
    %c0_28 = arith.constant 0 : index
    %304 = vector.load %arg5[%c17, %c0_28] : memref<49x256xf32, #tpu.memory_space<vmem>>, vector<1x256xf32>
    %305 = vector.broadcast %304 : vector<1x256xf32> to vector<4x256xf32>
    %306 = arith.mulf %303, %305 : vector<4x256xf32>
    %307 = vector.extract_strided_slice %10 {offsets = [0, 17], sizes = [4, 1], strides = [1, 1]} : vector<4x50xf32> to vector<4x1xf32>
    %308 = vector.broadcast %307 : vector<4x1xf32> to vector<4x256xf32>
    %309 = arith.mulf %308, %306 : vector<4x256xf32>
    %310 = arith.addf %294, %309 : vector<4x256xf32>
    %311 = vector.extract_strided_slice %18 {offsets = [0, 17], sizes = [4, 1], strides = [1, 1]} : vector<4x50xf32> to vector<4x1xf32>
    %312 = vector.broadcast %311 : vector<4x1xf32> to vector<4x256xf32>
    %313 = arith.mulf %312, %306 : vector<4x256xf32>
    %314 = arith.addf %298, %313 : vector<4x256xf32>
    %315 = vector.extract_strided_slice %21 {offsets = [0, 17], sizes = [4, 1], strides = [1, 1]} : vector<4x50xf32> to vector<4x1xf32>
    %316 = vector.broadcast %315 : vector<4x1xf32> to vector<4x256xf32>
    %317 = arith.mulf %316, %306 : vector<4x256xf32>
    %318 = arith.addf %302, %317 : vector<4x256xf32>
    %c15_i32 = arith.constant 15 : i32
    %319 = tpu.dynamic_rotate %2 by %c15_i32 dim 1 : vector<4x256xf32>, i32 -> vector<4x256xf32>
    %c18 = arith.constant 18 : index
    %c0_29 = arith.constant 0 : index
    %320 = vector.load %arg5[%c18, %c0_29] : memref<49x256xf32, #tpu.memory_space<vmem>>, vector<1x256xf32>
    %321 = vector.broadcast %320 : vector<1x256xf32> to vector<4x256xf32>
    %322 = arith.mulf %319, %321 : vector<4x256xf32>
    %323 = vector.extract_strided_slice %10 {offsets = [0, 18], sizes = [4, 1], strides = [1, 1]} : vector<4x50xf32> to vector<4x1xf32>
    %324 = vector.broadcast %323 : vector<4x1xf32> to vector<4x256xf32>
    %325 = arith.mulf %324, %322 : vector<4x256xf32>
    %326 = arith.addf %310, %325 : vector<4x256xf32>
    %327 = vector.extract_strided_slice %18 {offsets = [0, 18], sizes = [4, 1], strides = [1, 1]} : vector<4x50xf32> to vector<4x1xf32>
    %328 = vector.broadcast %327 : vector<4x1xf32> to vector<4x256xf32>
    %329 = arith.mulf %328, %322 : vector<4x256xf32>
    %330 = arith.addf %314, %329 : vector<4x256xf32>
    %331 = vector.extract_strided_slice %21 {offsets = [0, 18], sizes = [4, 1], strides = [1, 1]} : vector<4x50xf32> to vector<4x1xf32>
    %332 = vector.broadcast %331 : vector<4x1xf32> to vector<4x256xf32>
    %333 = arith.mulf %332, %322 : vector<4x256xf32>
    %334 = arith.addf %318, %333 : vector<4x256xf32>
    %c14_i32 = arith.constant 14 : i32
    %335 = tpu.dynamic_rotate %2 by %c14_i32 dim 1 : vector<4x256xf32>, i32 -> vector<4x256xf32>
    %c19 = arith.constant 19 : index
    %c0_30 = arith.constant 0 : index
    %336 = vector.load %arg5[%c19, %c0_30] : memref<49x256xf32, #tpu.memory_space<vmem>>, vector<1x256xf32>
    %337 = vector.broadcast %336 : vector<1x256xf32> to vector<4x256xf32>
    %338 = arith.mulf %335, %337 : vector<4x256xf32>
    %339 = vector.extract_strided_slice %10 {offsets = [0, 19], sizes = [4, 1], strides = [1, 1]} : vector<4x50xf32> to vector<4x1xf32>
    %340 = vector.broadcast %339 : vector<4x1xf32> to vector<4x256xf32>
    %341 = arith.mulf %340, %338 : vector<4x256xf32>
    %342 = arith.addf %326, %341 : vector<4x256xf32>
    %343 = vector.extract_strided_slice %18 {offsets = [0, 19], sizes = [4, 1], strides = [1, 1]} : vector<4x50xf32> to vector<4x1xf32>
    %344 = vector.broadcast %343 : vector<4x1xf32> to vector<4x256xf32>
    %345 = arith.mulf %344, %338 : vector<4x256xf32>
    %346 = arith.addf %330, %345 : vector<4x256xf32>
    %347 = vector.extract_strided_slice %21 {offsets = [0, 19], sizes = [4, 1], strides = [1, 1]} : vector<4x50xf32> to vector<4x1xf32>
    %348 = vector.broadcast %347 : vector<4x1xf32> to vector<4x256xf32>
    %349 = arith.mulf %348, %338 : vector<4x256xf32>
    %350 = arith.addf %334, %349 : vector<4x256xf32>
    %c13_i32 = arith.constant 13 : i32
    %351 = tpu.dynamic_rotate %2 by %c13_i32 dim 1 : vector<4x256xf32>, i32 -> vector<4x256xf32>
    %c20 = arith.constant 20 : index
    %c0_31 = arith.constant 0 : index
    %352 = vector.load %arg5[%c20, %c0_31] : memref<49x256xf32, #tpu.memory_space<vmem>>, vector<1x256xf32>
    %353 = vector.broadcast %352 : vector<1x256xf32> to vector<4x256xf32>
    %354 = arith.mulf %351, %353 : vector<4x256xf32>
    %355 = vector.extract_strided_slice %10 {offsets = [0, 20], sizes = [4, 1], strides = [1, 1]} : vector<4x50xf32> to vector<4x1xf32>
    %356 = vector.broadcast %355 : vector<4x1xf32> to vector<4x256xf32>
    %357 = arith.mulf %356, %354 : vector<4x256xf32>
    %358 = arith.addf %342, %357 : vector<4x256xf32>
    %359 = vector.extract_strided_slice %18 {offsets = [0, 20], sizes = [4, 1], strides = [1, 1]} : vector<4x50xf32> to vector<4x1xf32>
    %360 = vector.broadcast %359 : vector<4x1xf32> to vector<4x256xf32>
    %361 = arith.mulf %360, %354 : vector<4x256xf32>
    %362 = arith.addf %346, %361 : vector<4x256xf32>
    %363 = vector.extract_strided_slice %21 {offsets = [0, 20], sizes = [4, 1], strides = [1, 1]} : vector<4x50xf32> to vector<4x1xf32>
    %364 = vector.broadcast %363 : vector<4x1xf32> to vector<4x256xf32>
    %365 = arith.mulf %364, %354 : vector<4x256xf32>
    %366 = arith.addf %350, %365 : vector<4x256xf32>
    %c3_i32 = arith.constant 3 : i32
    %367 = tpu.dynamic_rotate %2 by %c3_i32 dim 1 : vector<4x256xf32>, i32 -> vector<4x256xf32>
    %c21 = arith.constant 21 : index
    %c0_32 = arith.constant 0 : index
    %368 = vector.load %arg5[%c21, %c0_32] : memref<49x256xf32, #tpu.memory_space<vmem>>, vector<1x256xf32>
    %369 = vector.broadcast %368 : vector<1x256xf32> to vector<4x256xf32>
    %370 = arith.mulf %367, %369 : vector<4x256xf32>
    %371 = vector.extract_strided_slice %10 {offsets = [0, 21], sizes = [4, 1], strides = [1, 1]} : vector<4x50xf32> to vector<4x1xf32>
    %372 = vector.broadcast %371 : vector<4x1xf32> to vector<4x256xf32>
    %373 = arith.mulf %372, %370 : vector<4x256xf32>
    %374 = arith.addf %358, %373 : vector<4x256xf32>
    %375 = vector.extract_strided_slice %18 {offsets = [0, 21], sizes = [4, 1], strides = [1, 1]} : vector<4x50xf32> to vector<4x1xf32>
    %376 = vector.broadcast %375 : vector<4x1xf32> to vector<4x256xf32>
    %377 = arith.mulf %376, %370 : vector<4x256xf32>
    %378 = arith.addf %362, %377 : vector<4x256xf32>
    %379 = vector.extract_strided_slice %21 {offsets = [0, 21], sizes = [4, 1], strides = [1, 1]} : vector<4x50xf32> to vector<4x1xf32>
    %380 = vector.broadcast %379 : vector<4x1xf32> to vector<4x256xf32>
    %381 = arith.mulf %380, %370 : vector<4x256xf32>
    %382 = arith.addf %366, %381 : vector<4x256xf32>
    %c2_i32_33 = arith.constant 2 : i32
    %383 = tpu.dynamic_rotate %2 by %c2_i32_33 dim 1 : vector<4x256xf32>, i32 -> vector<4x256xf32>
    %c22 = arith.constant 22 : index
    %c0_34 = arith.constant 0 : index
    %384 = vector.load %arg5[%c22, %c0_34] : memref<49x256xf32, #tpu.memory_space<vmem>>, vector<1x256xf32>
    %385 = vector.broadcast %384 : vector<1x256xf32> to vector<4x256xf32>
    %386 = arith.mulf %383, %385 : vector<4x256xf32>
    %387 = vector.extract_strided_slice %10 {offsets = [0, 22], sizes = [4, 1], strides = [1, 1]} : vector<4x50xf32> to vector<4x1xf32>
    %388 = vector.broadcast %387 : vector<4x1xf32> to vector<4x256xf32>
    %389 = arith.mulf %388, %386 : vector<4x256xf32>
    %390 = arith.addf %374, %389 : vector<4x256xf32>
    %391 = vector.extract_strided_slice %18 {offsets = [0, 22], sizes = [4, 1], strides = [1, 1]} : vector<4x50xf32> to vector<4x1xf32>
    %392 = vector.broadcast %391 : vector<4x1xf32> to vector<4x256xf32>
    %393 = arith.mulf %392, %386 : vector<4x256xf32>
    %394 = arith.addf %378, %393 : vector<4x256xf32>
    %395 = vector.extract_strided_slice %21 {offsets = [0, 22], sizes = [4, 1], strides = [1, 1]} : vector<4x50xf32> to vector<4x1xf32>
    %396 = vector.broadcast %395 : vector<4x1xf32> to vector<4x256xf32>
    %397 = arith.mulf %396, %386 : vector<4x256xf32>
    %398 = arith.addf %382, %397 : vector<4x256xf32>
    %c1_i32_35 = arith.constant 1 : i32
    %399 = tpu.dynamic_rotate %2 by %c1_i32_35 dim 1 : vector<4x256xf32>, i32 -> vector<4x256xf32>
    %c23 = arith.constant 23 : index
    %c0_36 = arith.constant 0 : index
    %400 = vector.load %arg5[%c23, %c0_36] : memref<49x256xf32, #tpu.memory_space<vmem>>, vector<1x256xf32>
    %401 = vector.broadcast %400 : vector<1x256xf32> to vector<4x256xf32>
    %402 = arith.mulf %399, %401 : vector<4x256xf32>
    %403 = vector.extract_strided_slice %10 {offsets = [0, 23], sizes = [4, 1], strides = [1, 1]} : vector<4x50xf32> to vector<4x1xf32>
    %404 = vector.broadcast %403 : vector<4x1xf32> to vector<4x256xf32>
    %405 = arith.mulf %404, %402 : vector<4x256xf32>
    %406 = arith.addf %390, %405 : vector<4x256xf32>
    %407 = vector.extract_strided_slice %18 {offsets = [0, 23], sizes = [4, 1], strides = [1, 1]} : vector<4x50xf32> to vector<4x1xf32>
    %408 = vector.broadcast %407 : vector<4x1xf32> to vector<4x256xf32>
    %409 = arith.mulf %408, %402 : vector<4x256xf32>
    %410 = arith.addf %394, %409 : vector<4x256xf32>
    %411 = vector.extract_strided_slice %21 {offsets = [0, 23], sizes = [4, 1], strides = [1, 1]} : vector<4x50xf32> to vector<4x1xf32>
    %412 = vector.broadcast %411 : vector<4x1xf32> to vector<4x256xf32>
    %413 = arith.mulf %412, %402 : vector<4x256xf32>
    %414 = arith.addf %398, %413 : vector<4x256xf32>
    %415 = vector.extract_strided_slice %10 {offsets = [0, 24], sizes = [4, 1], strides = [1, 1]} : vector<4x50xf32> to vector<4x1xf32>
    %416 = vector.broadcast %415 : vector<4x1xf32> to vector<4x256xf32>
    %417 = arith.mulf %416, %2 : vector<4x256xf32>
    %418 = arith.addf %406, %417 : vector<4x256xf32>
    %419 = vector.extract_strided_slice %18 {offsets = [0, 24], sizes = [4, 1], strides = [1, 1]} : vector<4x50xf32> to vector<4x1xf32>
    %420 = vector.broadcast %419 : vector<4x1xf32> to vector<4x256xf32>
    %421 = arith.mulf %420, %2 : vector<4x256xf32>
    %422 = arith.addf %410, %421 : vector<4x256xf32>
    %423 = vector.extract_strided_slice %21 {offsets = [0, 24], sizes = [4, 1], strides = [1, 1]} : vector<4x50xf32> to vector<4x1xf32>
    %424 = vector.broadcast %423 : vector<4x1xf32> to vector<4x256xf32>
    %425 = arith.mulf %424, %2 : vector<4x256xf32>
    %426 = arith.addf %414, %425 : vector<4x256xf32>
    %c255_i32 = arith.constant 255 : i32
    %427 = tpu.dynamic_rotate %2 by %c255_i32 dim 1 : vector<4x256xf32>, i32 -> vector<4x256xf32>
    %c25 = arith.constant 25 : index
    %c0_37 = arith.constant 0 : index
    %428 = vector.load %arg5[%c25, %c0_37] : memref<49x256xf32, #tpu.memory_space<vmem>>, vector<1x256xf32>
    %429 = vector.broadcast %428 : vector<1x256xf32> to vector<4x256xf32>
    %430 = arith.mulf %427, %429 : vector<4x256xf32>
    %431 = vector.extract_strided_slice %10 {offsets = [0, 25], sizes = [4, 1], strides = [1, 1]} : vector<4x50xf32> to vector<4x1xf32>
    %432 = vector.broadcast %431 : vector<4x1xf32> to vector<4x256xf32>
    %433 = arith.mulf %432, %430 : vector<4x256xf32>
    %434 = arith.addf %418, %433 : vector<4x256xf32>
    %435 = vector.extract_strided_slice %18 {offsets = [0, 25], sizes = [4, 1], strides = [1, 1]} : vector<4x50xf32> to vector<4x1xf32>
    %436 = vector.broadcast %435 : vector<4x1xf32> to vector<4x256xf32>
    %437 = arith.mulf %436, %430 : vector<4x256xf32>
    %438 = arith.addf %422, %437 : vector<4x256xf32>
    %439 = vector.extract_strided_slice %21 {offsets = [0, 25], sizes = [4, 1], strides = [1, 1]} : vector<4x50xf32> to vector<4x1xf32>
    %440 = vector.broadcast %439 : vector<4x1xf32> to vector<4x256xf32>
    %441 = arith.mulf %440, %430 : vector<4x256xf32>
    %442 = arith.addf %426, %441 : vector<4x256xf32>
    %c254_i32 = arith.constant 254 : i32
    %443 = tpu.dynamic_rotate %2 by %c254_i32 dim 1 : vector<4x256xf32>, i32 -> vector<4x256xf32>
    %c26 = arith.constant 26 : index
    %c0_38 = arith.constant 0 : index
    %444 = vector.load %arg5[%c26, %c0_38] : memref<49x256xf32, #tpu.memory_space<vmem>>, vector<1x256xf32>
    %445 = vector.broadcast %444 : vector<1x256xf32> to vector<4x256xf32>
    %446 = arith.mulf %443, %445 : vector<4x256xf32>
    %447 = vector.extract_strided_slice %10 {offsets = [0, 26], sizes = [4, 1], strides = [1, 1]} : vector<4x50xf32> to vector<4x1xf32>
    %448 = vector.broadcast %447 : vector<4x1xf32> to vector<4x256xf32>
    %449 = arith.mulf %448, %446 : vector<4x256xf32>
    %450 = arith.addf %434, %449 : vector<4x256xf32>
    %451 = vector.extract_strided_slice %18 {offsets = [0, 26], sizes = [4, 1], strides = [1, 1]} : vector<4x50xf32> to vector<4x1xf32>
    %452 = vector.broadcast %451 : vector<4x1xf32> to vector<4x256xf32>
    %453 = arith.mulf %452, %446 : vector<4x256xf32>
    %454 = arith.addf %438, %453 : vector<4x256xf32>
    %455 = vector.extract_strided_slice %21 {offsets = [0, 26], sizes = [4, 1], strides = [1, 1]} : vector<4x50xf32> to vector<4x1xf32>
    %456 = vector.broadcast %455 : vector<4x1xf32> to vector<4x256xf32>
    %457 = arith.mulf %456, %446 : vector<4x256xf32>
    %458 = arith.addf %442, %457 : vector<4x256xf32>
    %c253_i32 = arith.constant 253 : i32
    %459 = tpu.dynamic_rotate %2 by %c253_i32 dim 1 : vector<4x256xf32>, i32 -> vector<4x256xf32>
    %c27 = arith.constant 27 : index
    %c0_39 = arith.constant 0 : index
    %460 = vector.load %arg5[%c27, %c0_39] : memref<49x256xf32, #tpu.memory_space<vmem>>, vector<1x256xf32>
    %461 = vector.broadcast %460 : vector<1x256xf32> to vector<4x256xf32>
    %462 = arith.mulf %459, %461 : vector<4x256xf32>
    %463 = vector.extract_strided_slice %10 {offsets = [0, 27], sizes = [4, 1], strides = [1, 1]} : vector<4x50xf32> to vector<4x1xf32>
    %464 = vector.broadcast %463 : vector<4x1xf32> to vector<4x256xf32>
    %465 = arith.mulf %464, %462 : vector<4x256xf32>
    %466 = arith.addf %450, %465 : vector<4x256xf32>
    %467 = vector.extract_strided_slice %18 {offsets = [0, 27], sizes = [4, 1], strides = [1, 1]} : vector<4x50xf32> to vector<4x1xf32>
    %468 = vector.broadcast %467 : vector<4x1xf32> to vector<4x256xf32>
    %469 = arith.mulf %468, %462 : vector<4x256xf32>
    %470 = arith.addf %454, %469 : vector<4x256xf32>
    %471 = vector.extract_strided_slice %21 {offsets = [0, 27], sizes = [4, 1], strides = [1, 1]} : vector<4x50xf32> to vector<4x1xf32>
    %472 = vector.broadcast %471 : vector<4x1xf32> to vector<4x256xf32>
    %473 = arith.mulf %472, %462 : vector<4x256xf32>
    %474 = arith.addf %458, %473 : vector<4x256xf32>
    %c243_i32 = arith.constant 243 : i32
    %475 = tpu.dynamic_rotate %2 by %c243_i32 dim 1 : vector<4x256xf32>, i32 -> vector<4x256xf32>
    %c28 = arith.constant 28 : index
    %c0_40 = arith.constant 0 : index
    %476 = vector.load %arg5[%c28, %c0_40] : memref<49x256xf32, #tpu.memory_space<vmem>>, vector<1x256xf32>
    %477 = vector.broadcast %476 : vector<1x256xf32> to vector<4x256xf32>
    %478 = arith.mulf %475, %477 : vector<4x256xf32>
    %479 = vector.extract_strided_slice %10 {offsets = [0, 28], sizes = [4, 1], strides = [1, 1]} : vector<4x50xf32> to vector<4x1xf32>
    %480 = vector.broadcast %479 : vector<4x1xf32> to vector<4x256xf32>
    %481 = arith.mulf %480, %478 : vector<4x256xf32>
    %482 = arith.addf %466, %481 : vector<4x256xf32>
    %483 = vector.extract_strided_slice %18 {offsets = [0, 28], sizes = [4, 1], strides = [1, 1]} : vector<4x50xf32> to vector<4x1xf32>
    %484 = vector.broadcast %483 : vector<4x1xf32> to vector<4x256xf32>
    %485 = arith.mulf %484, %478 : vector<4x256xf32>
    %486 = arith.addf %470, %485 : vector<4x256xf32>
    %487 = vector.extract_strided_slice %21 {offsets = [0, 28], sizes = [4, 1], strides = [1, 1]} : vector<4x50xf32> to vector<4x1xf32>
    %488 = vector.broadcast %487 : vector<4x1xf32> to vector<4x256xf32>
    %489 = arith.mulf %488, %478 : vector<4x256xf32>
    %490 = arith.addf %474, %489 : vector<4x256xf32>
    %c242_i32 = arith.constant 242 : i32
    %491 = tpu.dynamic_rotate %2 by %c242_i32 dim 1 : vector<4x256xf32>, i32 -> vector<4x256xf32>
    %c29 = arith.constant 29 : index
    %c0_41 = arith.constant 0 : index
    %492 = vector.load %arg5[%c29, %c0_41] : memref<49x256xf32, #tpu.memory_space<vmem>>, vector<1x256xf32>
    %493 = vector.broadcast %492 : vector<1x256xf32> to vector<4x256xf32>
    %494 = arith.mulf %491, %493 : vector<4x256xf32>
    %495 = vector.extract_strided_slice %10 {offsets = [0, 29], sizes = [4, 1], strides = [1, 1]} : vector<4x50xf32> to vector<4x1xf32>
    %496 = vector.broadcast %495 : vector<4x1xf32> to vector<4x256xf32>
    %497 = arith.mulf %496, %494 : vector<4x256xf32>
    %498 = arith.addf %482, %497 : vector<4x256xf32>
    %499 = vector.extract_strided_slice %18 {offsets = [0, 29], sizes = [4, 1], strides = [1, 1]} : vector<4x50xf32> to vector<4x1xf32>
    %500 = vector.broadcast %499 : vector<4x1xf32> to vector<4x256xf32>
    %501 = arith.mulf %500, %494 : vector<4x256xf32>
    %502 = arith.addf %486, %501 : vector<4x256xf32>
    %503 = vector.extract_strided_slice %21 {offsets = [0, 29], sizes = [4, 1], strides = [1, 1]} : vector<4x50xf32> to vector<4x1xf32>
    %504 = vector.broadcast %503 : vector<4x1xf32> to vector<4x256xf32>
    %505 = arith.mulf %504, %494 : vector<4x256xf32>
    %506 = arith.addf %490, %505 : vector<4x256xf32>
    %c241_i32 = arith.constant 241 : i32
    %507 = tpu.dynamic_rotate %2 by %c241_i32 dim 1 : vector<4x256xf32>, i32 -> vector<4x256xf32>
    %c30 = arith.constant 30 : index
    %c0_42 = arith.constant 0 : index
    %508 = vector.load %arg5[%c30, %c0_42] : memref<49x256xf32, #tpu.memory_space<vmem>>, vector<1x256xf32>
    %509 = vector.broadcast %508 : vector<1x256xf32> to vector<4x256xf32>
    %510 = arith.mulf %507, %509 : vector<4x256xf32>
    %511 = vector.extract_strided_slice %10 {offsets = [0, 30], sizes = [4, 1], strides = [1, 1]} : vector<4x50xf32> to vector<4x1xf32>
    %512 = vector.broadcast %511 : vector<4x1xf32> to vector<4x256xf32>
    %513 = arith.mulf %512, %510 : vector<4x256xf32>
    %514 = arith.addf %498, %513 : vector<4x256xf32>
    %515 = vector.extract_strided_slice %18 {offsets = [0, 30], sizes = [4, 1], strides = [1, 1]} : vector<4x50xf32> to vector<4x1xf32>
    %516 = vector.broadcast %515 : vector<4x1xf32> to vector<4x256xf32>
    %517 = arith.mulf %516, %510 : vector<4x256xf32>
    %518 = arith.addf %502, %517 : vector<4x256xf32>
    %519 = vector.extract_strided_slice %21 {offsets = [0, 30], sizes = [4, 1], strides = [1, 1]} : vector<4x50xf32> to vector<4x1xf32>
    %520 = vector.broadcast %519 : vector<4x1xf32> to vector<4x256xf32>
    %521 = arith.mulf %520, %510 : vector<4x256xf32>
    %522 = arith.addf %506, %521 : vector<4x256xf32>
    %c240_i32 = arith.constant 240 : i32
    %523 = tpu.dynamic_rotate %2 by %c240_i32 dim 1 : vector<4x256xf32>, i32 -> vector<4x256xf32>
    %c31 = arith.constant 31 : index
    %c0_43 = arith.constant 0 : index
    %524 = vector.load %arg5[%c31, %c0_43] : memref<49x256xf32, #tpu.memory_space<vmem>>, vector<1x256xf32>
    %525 = vector.broadcast %524 : vector<1x256xf32> to vector<4x256xf32>
    %526 = arith.mulf %523, %525 : vector<4x256xf32>
    %527 = vector.extract_strided_slice %10 {offsets = [0, 31], sizes = [4, 1], strides = [1, 1]} : vector<4x50xf32> to vector<4x1xf32>
    %528 = vector.broadcast %527 : vector<4x1xf32> to vector<4x256xf32>
    %529 = arith.mulf %528, %526 : vector<4x256xf32>
    %530 = arith.addf %514, %529 : vector<4x256xf32>
    %531 = vector.extract_strided_slice %18 {offsets = [0, 31], sizes = [4, 1], strides = [1, 1]} : vector<4x50xf32> to vector<4x1xf32>
    %532 = vector.broadcast %531 : vector<4x1xf32> to vector<4x256xf32>
    %533 = arith.mulf %532, %526 : vector<4x256xf32>
    %534 = arith.addf %518, %533 : vector<4x256xf32>
    %535 = vector.extract_strided_slice %21 {offsets = [0, 31], sizes = [4, 1], strides = [1, 1]} : vector<4x50xf32> to vector<4x1xf32>
    %536 = vector.broadcast %535 : vector<4x1xf32> to vector<4x256xf32>
    %537 = arith.mulf %536, %526 : vector<4x256xf32>
    %538 = arith.addf %522, %537 : vector<4x256xf32>
    %c239_i32 = arith.constant 239 : i32
    %539 = tpu.dynamic_rotate %2 by %c239_i32 dim 1 : vector<4x256xf32>, i32 -> vector<4x256xf32>
    %c32 = arith.constant 32 : index
    %c0_44 = arith.constant 0 : index
    %540 = vector.load %arg5[%c32, %c0_44] : memref<49x256xf32, #tpu.memory_space<vmem>>, vector<1x256xf32>
    %541 = vector.broadcast %540 : vector<1x256xf32> to vector<4x256xf32>
    %542 = arith.mulf %539, %541 : vector<4x256xf32>
    %543 = vector.extract_strided_slice %10 {offsets = [0, 32], sizes = [4, 1], strides = [1, 1]} : vector<4x50xf32> to vector<4x1xf32>
    %544 = vector.broadcast %543 : vector<4x1xf32> to vector<4x256xf32>
    %545 = arith.mulf %544, %542 : vector<4x256xf32>
    %546 = arith.addf %530, %545 : vector<4x256xf32>
    %547 = vector.extract_strided_slice %18 {offsets = [0, 32], sizes = [4, 1], strides = [1, 1]} : vector<4x50xf32> to vector<4x1xf32>
    %548 = vector.broadcast %547 : vector<4x1xf32> to vector<4x256xf32>
    %549 = arith.mulf %548, %542 : vector<4x256xf32>
    %550 = arith.addf %534, %549 : vector<4x256xf32>
    %551 = vector.extract_strided_slice %21 {offsets = [0, 32], sizes = [4, 1], strides = [1, 1]} : vector<4x50xf32> to vector<4x1xf32>
    %552 = vector.broadcast %551 : vector<4x1xf32> to vector<4x256xf32>
    %553 = arith.mulf %552, %542 : vector<4x256xf32>
    %554 = arith.addf %538, %553 : vector<4x256xf32>
    %c238_i32 = arith.constant 238 : i32
    %555 = tpu.dynamic_rotate %2 by %c238_i32 dim 1 : vector<4x256xf32>, i32 -> vector<4x256xf32>
    %c33 = arith.constant 33 : index
    %c0_45 = arith.constant 0 : index
    %556 = vector.load %arg5[%c33, %c0_45] : memref<49x256xf32, #tpu.memory_space<vmem>>, vector<1x256xf32>
    %557 = vector.broadcast %556 : vector<1x256xf32> to vector<4x256xf32>
    %558 = arith.mulf %555, %557 : vector<4x256xf32>
    %559 = vector.extract_strided_slice %10 {offsets = [0, 33], sizes = [4, 1], strides = [1, 1]} : vector<4x50xf32> to vector<4x1xf32>
    %560 = vector.broadcast %559 : vector<4x1xf32> to vector<4x256xf32>
    %561 = arith.mulf %560, %558 : vector<4x256xf32>
    %562 = arith.addf %546, %561 : vector<4x256xf32>
    %563 = vector.extract_strided_slice %18 {offsets = [0, 33], sizes = [4, 1], strides = [1, 1]} : vector<4x50xf32> to vector<4x1xf32>
    %564 = vector.broadcast %563 : vector<4x1xf32> to vector<4x256xf32>
    %565 = arith.mulf %564, %558 : vector<4x256xf32>
    %566 = arith.addf %550, %565 : vector<4x256xf32>
    %567 = vector.extract_strided_slice %21 {offsets = [0, 33], sizes = [4, 1], strides = [1, 1]} : vector<4x50xf32> to vector<4x1xf32>
    %568 = vector.broadcast %567 : vector<4x1xf32> to vector<4x256xf32>
    %569 = arith.mulf %568, %558 : vector<4x256xf32>
    %570 = arith.addf %554, %569 : vector<4x256xf32>
    %c237_i32 = arith.constant 237 : i32
    %571 = tpu.dynamic_rotate %2 by %c237_i32 dim 1 : vector<4x256xf32>, i32 -> vector<4x256xf32>
    %c34 = arith.constant 34 : index
    %c0_46 = arith.constant 0 : index
    %572 = vector.load %arg5[%c34, %c0_46] : memref<49x256xf32, #tpu.memory_space<vmem>>, vector<1x256xf32>
    %573 = vector.broadcast %572 : vector<1x256xf32> to vector<4x256xf32>
    %574 = arith.mulf %571, %573 : vector<4x256xf32>
    %575 = vector.extract_strided_slice %10 {offsets = [0, 34], sizes = [4, 1], strides = [1, 1]} : vector<4x50xf32> to vector<4x1xf32>
    %576 = vector.broadcast %575 : vector<4x1xf32> to vector<4x256xf32>
    %577 = arith.mulf %576, %574 : vector<4x256xf32>
    %578 = arith.addf %562, %577 : vector<4x256xf32>
    %579 = vector.extract_strided_slice %18 {offsets = [0, 34], sizes = [4, 1], strides = [1, 1]} : vector<4x50xf32> to vector<4x1xf32>
    %580 = vector.broadcast %579 : vector<4x1xf32> to vector<4x256xf32>
    %581 = arith.mulf %580, %574 : vector<4x256xf32>
    %582 = arith.addf %566, %581 : vector<4x256xf32>
    %583 = vector.extract_strided_slice %21 {offsets = [0, 34], sizes = [4, 1], strides = [1, 1]} : vector<4x50xf32> to vector<4x1xf32>
    %584 = vector.broadcast %583 : vector<4x1xf32> to vector<4x256xf32>
    %585 = arith.mulf %584, %574 : vector<4x256xf32>
    %586 = arith.addf %570, %585 : vector<4x256xf32>
    %c227_i32 = arith.constant 227 : i32
    %587 = tpu.dynamic_rotate %2 by %c227_i32 dim 1 : vector<4x256xf32>, i32 -> vector<4x256xf32>
    %c35 = arith.constant 35 : index
    %c0_47 = arith.constant 0 : index
    %588 = vector.load %arg5[%c35, %c0_47] : memref<49x256xf32, #tpu.memory_space<vmem>>, vector<1x256xf32>
    %589 = vector.broadcast %588 : vector<1x256xf32> to vector<4x256xf32>
    %590 = arith.mulf %587, %589 : vector<4x256xf32>
    %591 = vector.extract_strided_slice %10 {offsets = [0, 35], sizes = [4, 1], strides = [1, 1]} : vector<4x50xf32> to vector<4x1xf32>
    %592 = vector.broadcast %591 : vector<4x1xf32> to vector<4x256xf32>
    %593 = arith.mulf %592, %590 : vector<4x256xf32>
    %594 = arith.addf %578, %593 : vector<4x256xf32>
    %595 = vector.extract_strided_slice %18 {offsets = [0, 35], sizes = [4, 1], strides = [1, 1]} : vector<4x50xf32> to vector<4x1xf32>
    %596 = vector.broadcast %595 : vector<4x1xf32> to vector<4x256xf32>
    %597 = arith.mulf %596, %590 : vector<4x256xf32>
    %598 = arith.addf %582, %597 : vector<4x256xf32>
    %599 = vector.extract_strided_slice %21 {offsets = [0, 35], sizes = [4, 1], strides = [1, 1]} : vector<4x50xf32> to vector<4x1xf32>
    %600 = vector.broadcast %599 : vector<4x1xf32> to vector<4x256xf32>
    %601 = arith.mulf %600, %590 : vector<4x256xf32>
    %602 = arith.addf %586, %601 : vector<4x256xf32>
    %c226_i32 = arith.constant 226 : i32
    %603 = tpu.dynamic_rotate %2 by %c226_i32 dim 1 : vector<4x256xf32>, i32 -> vector<4x256xf32>
    %c36 = arith.constant 36 : index
    %c0_48 = arith.constant 0 : index
    %604 = vector.load %arg5[%c36, %c0_48] : memref<49x256xf32, #tpu.memory_space<vmem>>, vector<1x256xf32>
    %605 = vector.broadcast %604 : vector<1x256xf32> to vector<4x256xf32>
    %606 = arith.mulf %603, %605 : vector<4x256xf32>
    %607 = vector.extract_strided_slice %10 {offsets = [0, 36], sizes = [4, 1], strides = [1, 1]} : vector<4x50xf32> to vector<4x1xf32>
    %608 = vector.broadcast %607 : vector<4x1xf32> to vector<4x256xf32>
    %609 = arith.mulf %608, %606 : vector<4x256xf32>
    %610 = arith.addf %594, %609 : vector<4x256xf32>
    %611 = vector.extract_strided_slice %18 {offsets = [0, 36], sizes = [4, 1], strides = [1, 1]} : vector<4x50xf32> to vector<4x1xf32>
    %612 = vector.broadcast %611 : vector<4x1xf32> to vector<4x256xf32>
    %613 = arith.mulf %612, %606 : vector<4x256xf32>
    %614 = arith.addf %598, %613 : vector<4x256xf32>
    %615 = vector.extract_strided_slice %21 {offsets = [0, 36], sizes = [4, 1], strides = [1, 1]} : vector<4x50xf32> to vector<4x1xf32>
    %616 = vector.broadcast %615 : vector<4x1xf32> to vector<4x256xf32>
    %617 = arith.mulf %616, %606 : vector<4x256xf32>
    %618 = arith.addf %602, %617 : vector<4x256xf32>
    %c225_i32 = arith.constant 225 : i32
    %619 = tpu.dynamic_rotate %2 by %c225_i32 dim 1 : vector<4x256xf32>, i32 -> vector<4x256xf32>
    %c37 = arith.constant 37 : index
    %c0_49 = arith.constant 0 : index
    %620 = vector.load %arg5[%c37, %c0_49] : memref<49x256xf32, #tpu.memory_space<vmem>>, vector<1x256xf32>
    %621 = vector.broadcast %620 : vector<1x256xf32> to vector<4x256xf32>
    %622 = arith.mulf %619, %621 : vector<4x256xf32>
    %623 = vector.extract_strided_slice %10 {offsets = [0, 37], sizes = [4, 1], strides = [1, 1]} : vector<4x50xf32> to vector<4x1xf32>
    %624 = vector.broadcast %623 : vector<4x1xf32> to vector<4x256xf32>
    %625 = arith.mulf %624, %622 : vector<4x256xf32>
    %626 = arith.addf %610, %625 : vector<4x256xf32>
    %627 = vector.extract_strided_slice %18 {offsets = [0, 37], sizes = [4, 1], strides = [1, 1]} : vector<4x50xf32> to vector<4x1xf32>
    %628 = vector.broadcast %627 : vector<4x1xf32> to vector<4x256xf32>
    %629 = arith.mulf %628, %622 : vector<4x256xf32>
    %630 = arith.addf %614, %629 : vector<4x256xf32>
    %631 = vector.extract_strided_slice %21 {offsets = [0, 37], sizes = [4, 1], strides = [1, 1]} : vector<4x50xf32> to vector<4x1xf32>
    %632 = vector.broadcast %631 : vector<4x1xf32> to vector<4x256xf32>
    %633 = arith.mulf %632, %622 : vector<4x256xf32>
    %634 = arith.addf %618, %633 : vector<4x256xf32>
    %c224_i32 = arith.constant 224 : i32
    %635 = tpu.dynamic_rotate %2 by %c224_i32 dim 1 : vector<4x256xf32>, i32 -> vector<4x256xf32>
    %c38 = arith.constant 38 : index
    %c0_50 = arith.constant 0 : index
    %636 = vector.load %arg5[%c38, %c0_50] : memref<49x256xf32, #tpu.memory_space<vmem>>, vector<1x256xf32>
    %637 = vector.broadcast %636 : vector<1x256xf32> to vector<4x256xf32>
    %638 = arith.mulf %635, %637 : vector<4x256xf32>
    %639 = vector.extract_strided_slice %10 {offsets = [0, 38], sizes = [4, 1], strides = [1, 1]} : vector<4x50xf32> to vector<4x1xf32>
    %640 = vector.broadcast %639 : vector<4x1xf32> to vector<4x256xf32>
    %641 = arith.mulf %640, %638 : vector<4x256xf32>
    %642 = arith.addf %626, %641 : vector<4x256xf32>
    %643 = vector.extract_strided_slice %18 {offsets = [0, 38], sizes = [4, 1], strides = [1, 1]} : vector<4x50xf32> to vector<4x1xf32>
    %644 = vector.broadcast %643 : vector<4x1xf32> to vector<4x256xf32>
    %645 = arith.mulf %644, %638 : vector<4x256xf32>
    %646 = arith.addf %630, %645 : vector<4x256xf32>
    %647 = vector.extract_strided_slice %21 {offsets = [0, 38], sizes = [4, 1], strides = [1, 1]} : vector<4x50xf32> to vector<4x1xf32>
    %648 = vector.broadcast %647 : vector<4x1xf32> to vector<4x256xf32>
    %649 = arith.mulf %648, %638 : vector<4x256xf32>
    %650 = arith.addf %634, %649 : vector<4x256xf32>
    %c223_i32 = arith.constant 223 : i32
    %651 = tpu.dynamic_rotate %2 by %c223_i32 dim 1 : vector<4x256xf32>, i32 -> vector<4x256xf32>
    %c39 = arith.constant 39 : index
    %c0_51 = arith.constant 0 : index
    %652 = vector.load %arg5[%c39, %c0_51] : memref<49x256xf32, #tpu.memory_space<vmem>>, vector<1x256xf32>
    %653 = vector.broadcast %652 : vector<1x256xf32> to vector<4x256xf32>
    %654 = arith.mulf %651, %653 : vector<4x256xf32>
    %655 = vector.extract_strided_slice %10 {offsets = [0, 39], sizes = [4, 1], strides = [1, 1]} : vector<4x50xf32> to vector<4x1xf32>
    %656 = vector.broadcast %655 : vector<4x1xf32> to vector<4x256xf32>
    %657 = arith.mulf %656, %654 : vector<4x256xf32>
    %658 = arith.addf %642, %657 : vector<4x256xf32>
    %659 = vector.extract_strided_slice %18 {offsets = [0, 39], sizes = [4, 1], strides = [1, 1]} : vector<4x50xf32> to vector<4x1xf32>
    %660 = vector.broadcast %659 : vector<4x1xf32> to vector<4x256xf32>
    %661 = arith.mulf %660, %654 : vector<4x256xf32>
    %662 = arith.addf %646, %661 : vector<4x256xf32>
    %663 = vector.extract_strided_slice %21 {offsets = [0, 39], sizes = [4, 1], strides = [1, 1]} : vector<4x50xf32> to vector<4x1xf32>
    %664 = vector.broadcast %663 : vector<4x1xf32> to vector<4x256xf32>
    %665 = arith.mulf %664, %654 : vector<4x256xf32>
    %666 = arith.addf %650, %665 : vector<4x256xf32>
    %c222_i32 = arith.constant 222 : i32
    %667 = tpu.dynamic_rotate %2 by %c222_i32 dim 1 : vector<4x256xf32>, i32 -> vector<4x256xf32>
    %c40 = arith.constant 40 : index
    %c0_52 = arith.constant 0 : index
    %668 = vector.load %arg5[%c40, %c0_52] : memref<49x256xf32, #tpu.memory_space<vmem>>, vector<1x256xf32>
    %669 = vector.broadcast %668 : vector<1x256xf32> to vector<4x256xf32>
    %670 = arith.mulf %667, %669 : vector<4x256xf32>
    %671 = vector.extract_strided_slice %10 {offsets = [0, 40], sizes = [4, 1], strides = [1, 1]} : vector<4x50xf32> to vector<4x1xf32>
    %672 = vector.broadcast %671 : vector<4x1xf32> to vector<4x256xf32>
    %673 = arith.mulf %672, %670 : vector<4x256xf32>
    %674 = arith.addf %658, %673 : vector<4x256xf32>
    %675 = vector.extract_strided_slice %18 {offsets = [0, 40], sizes = [4, 1], strides = [1, 1]} : vector<4x50xf32> to vector<4x1xf32>
    %676 = vector.broadcast %675 : vector<4x1xf32> to vector<4x256xf32>
    %677 = arith.mulf %676, %670 : vector<4x256xf32>
    %678 = arith.addf %662, %677 : vector<4x256xf32>
    %679 = vector.extract_strided_slice %21 {offsets = [0, 40], sizes = [4, 1], strides = [1, 1]} : vector<4x50xf32> to vector<4x1xf32>
    %680 = vector.broadcast %679 : vector<4x1xf32> to vector<4x256xf32>
    %681 = arith.mulf %680, %670 : vector<4x256xf32>
    %682 = arith.addf %666, %681 : vector<4x256xf32>
    %c221_i32 = arith.constant 221 : i32
    %683 = tpu.dynamic_rotate %2 by %c221_i32 dim 1 : vector<4x256xf32>, i32 -> vector<4x256xf32>
    %c41 = arith.constant 41 : index
    %c0_53 = arith.constant 0 : index
    %684 = vector.load %arg5[%c41, %c0_53] : memref<49x256xf32, #tpu.memory_space<vmem>>, vector<1x256xf32>
    %685 = vector.broadcast %684 : vector<1x256xf32> to vector<4x256xf32>
    %686 = arith.mulf %683, %685 : vector<4x256xf32>
    %687 = vector.extract_strided_slice %10 {offsets = [0, 41], sizes = [4, 1], strides = [1, 1]} : vector<4x50xf32> to vector<4x1xf32>
    %688 = vector.broadcast %687 : vector<4x1xf32> to vector<4x256xf32>
    %689 = arith.mulf %688, %686 : vector<4x256xf32>
    %690 = arith.addf %674, %689 : vector<4x256xf32>
    %691 = vector.extract_strided_slice %18 {offsets = [0, 41], sizes = [4, 1], strides = [1, 1]} : vector<4x50xf32> to vector<4x1xf32>
    %692 = vector.broadcast %691 : vector<4x1xf32> to vector<4x256xf32>
    %693 = arith.mulf %692, %686 : vector<4x256xf32>
    %694 = arith.addf %678, %693 : vector<4x256xf32>
    %695 = vector.extract_strided_slice %21 {offsets = [0, 41], sizes = [4, 1], strides = [1, 1]} : vector<4x50xf32> to vector<4x1xf32>
    %696 = vector.broadcast %695 : vector<4x1xf32> to vector<4x256xf32>
    %697 = arith.mulf %696, %686 : vector<4x256xf32>
    %698 = arith.addf %682, %697 : vector<4x256xf32>
    %c211_i32 = arith.constant 211 : i32
    %699 = tpu.dynamic_rotate %2 by %c211_i32 dim 1 : vector<4x256xf32>, i32 -> vector<4x256xf32>
    %c42 = arith.constant 42 : index
    %c0_54 = arith.constant 0 : index
    %700 = vector.load %arg5[%c42, %c0_54] : memref<49x256xf32, #tpu.memory_space<vmem>>, vector<1x256xf32>
    %701 = vector.broadcast %700 : vector<1x256xf32> to vector<4x256xf32>
    %702 = arith.mulf %699, %701 : vector<4x256xf32>
    %703 = vector.extract_strided_slice %10 {offsets = [0, 42], sizes = [4, 1], strides = [1, 1]} : vector<4x50xf32> to vector<4x1xf32>
    %704 = vector.broadcast %703 : vector<4x1xf32> to vector<4x256xf32>
    %705 = arith.mulf %704, %702 : vector<4x256xf32>
    %706 = arith.addf %690, %705 : vector<4x256xf32>
    %707 = vector.extract_strided_slice %18 {offsets = [0, 42], sizes = [4, 1], strides = [1, 1]} : vector<4x50xf32> to vector<4x1xf32>
    %708 = vector.broadcast %707 : vector<4x1xf32> to vector<4x256xf32>
    %709 = arith.mulf %708, %702 : vector<4x256xf32>
    %710 = arith.addf %694, %709 : vector<4x256xf32>
    %711 = vector.extract_strided_slice %21 {offsets = [0, 42], sizes = [4, 1], strides = [1, 1]} : vector<4x50xf32> to vector<4x1xf32>
    %712 = vector.broadcast %711 : vector<4x1xf32> to vector<4x256xf32>
    %713 = arith.mulf %712, %702 : vector<4x256xf32>
    %714 = arith.addf %698, %713 : vector<4x256xf32>
    %c210_i32 = arith.constant 210 : i32
    %715 = tpu.dynamic_rotate %2 by %c210_i32 dim 1 : vector<4x256xf32>, i32 -> vector<4x256xf32>
    %c43 = arith.constant 43 : index
    %c0_55 = arith.constant 0 : index
    %716 = vector.load %arg5[%c43, %c0_55] : memref<49x256xf32, #tpu.memory_space<vmem>>, vector<1x256xf32>
    %717 = vector.broadcast %716 : vector<1x256xf32> to vector<4x256xf32>
    %718 = arith.mulf %715, %717 : vector<4x256xf32>
    %719 = vector.extract_strided_slice %10 {offsets = [0, 43], sizes = [4, 1], strides = [1, 1]} : vector<4x50xf32> to vector<4x1xf32>
    %720 = vector.broadcast %719 : vector<4x1xf32> to vector<4x256xf32>
    %721 = arith.mulf %720, %718 : vector<4x256xf32>
    %722 = arith.addf %706, %721 : vector<4x256xf32>
    %723 = vector.extract_strided_slice %18 {offsets = [0, 43], sizes = [4, 1], strides = [1, 1]} : vector<4x50xf32> to vector<4x1xf32>
    %724 = vector.broadcast %723 : vector<4x1xf32> to vector<4x256xf32>
    %725 = arith.mulf %724, %718 : vector<4x256xf32>
    %726 = arith.addf %710, %725 : vector<4x256xf32>
    %727 = vector.extract_strided_slice %21 {offsets = [0, 43], sizes = [4, 1], strides = [1, 1]} : vector<4x50xf32> to vector<4x1xf32>
    %728 = vector.broadcast %727 : vector<4x1xf32> to vector<4x256xf32>
    %729 = arith.mulf %728, %718 : vector<4x256xf32>
    %730 = arith.addf %714, %729 : vector<4x256xf32>
    %c209_i32 = arith.constant 209 : i32
    %731 = tpu.dynamic_rotate %2 by %c209_i32 dim 1 : vector<4x256xf32>, i32 -> vector<4x256xf32>
    %c44 = arith.constant 44 : index
    %c0_56 = arith.constant 0 : index
    %732 = vector.load %arg5[%c44, %c0_56] : memref<49x256xf32, #tpu.memory_space<vmem>>, vector<1x256xf32>
    %733 = vector.broadcast %732 : vector<1x256xf32> to vector<4x256xf32>
    %734 = arith.mulf %731, %733 : vector<4x256xf32>
    %735 = vector.extract_strided_slice %10 {offsets = [0, 44], sizes = [4, 1], strides = [1, 1]} : vector<4x50xf32> to vector<4x1xf32>
    %736 = vector.broadcast %735 : vector<4x1xf32> to vector<4x256xf32>
    %737 = arith.mulf %736, %734 : vector<4x256xf32>
    %738 = arith.addf %722, %737 : vector<4x256xf32>
    %739 = vector.extract_strided_slice %18 {offsets = [0, 44], sizes = [4, 1], strides = [1, 1]} : vector<4x50xf32> to vector<4x1xf32>
    %740 = vector.broadcast %739 : vector<4x1xf32> to vector<4x256xf32>
    %741 = arith.mulf %740, %734 : vector<4x256xf32>
    %742 = arith.addf %726, %741 : vector<4x256xf32>
    %743 = vector.extract_strided_slice %21 {offsets = [0, 44], sizes = [4, 1], strides = [1, 1]} : vector<4x50xf32> to vector<4x1xf32>
    %744 = vector.broadcast %743 : vector<4x1xf32> to vector<4x256xf32>
    %745 = arith.mulf %744, %734 : vector<4x256xf32>
    %746 = arith.addf %730, %745 : vector<4x256xf32>
    %c208_i32 = arith.constant 208 : i32
    %747 = tpu.dynamic_rotate %2 by %c208_i32 dim 1 : vector<4x256xf32>, i32 -> vector<4x256xf32>
    %c45 = arith.constant 45 : index
    %c0_57 = arith.constant 0 : index
    %748 = vector.load %arg5[%c45, %c0_57] : memref<49x256xf32, #tpu.memory_space<vmem>>, vector<1x256xf32>
    %749 = vector.broadcast %748 : vector<1x256xf32> to vector<4x256xf32>
    %750 = arith.mulf %747, %749 : vector<4x256xf32>
    %751 = vector.extract_strided_slice %10 {offsets = [0, 45], sizes = [4, 1], strides = [1, 1]} : vector<4x50xf32> to vector<4x1xf32>
    %752 = vector.broadcast %751 : vector<4x1xf32> to vector<4x256xf32>
    %753 = arith.mulf %752, %750 : vector<4x256xf32>
    %754 = arith.addf %738, %753 : vector<4x256xf32>
    %755 = vector.extract_strided_slice %18 {offsets = [0, 45], sizes = [4, 1], strides = [1, 1]} : vector<4x50xf32> to vector<4x1xf32>
    %756 = vector.broadcast %755 : vector<4x1xf32> to vector<4x256xf32>
    %757 = arith.mulf %756, %750 : vector<4x256xf32>
    %758 = arith.addf %742, %757 : vector<4x256xf32>
    %759 = vector.extract_strided_slice %21 {offsets = [0, 45], sizes = [4, 1], strides = [1, 1]} : vector<4x50xf32> to vector<4x1xf32>
    %760 = vector.broadcast %759 : vector<4x1xf32> to vector<4x256xf32>
    %761 = arith.mulf %760, %750 : vector<4x256xf32>
    %762 = arith.addf %746, %761 : vector<4x256xf32>
    %c207_i32 = arith.constant 207 : i32
    %763 = tpu.dynamic_rotate %2 by %c207_i32 dim 1 : vector<4x256xf32>, i32 -> vector<4x256xf32>
    %c46 = arith.constant 46 : index
    %c0_58 = arith.constant 0 : index
    %764 = vector.load %arg5[%c46, %c0_58] : memref<49x256xf32, #tpu.memory_space<vmem>>, vector<1x256xf32>
    %765 = vector.broadcast %764 : vector<1x256xf32> to vector<4x256xf32>
    %766 = arith.mulf %763, %765 : vector<4x256xf32>
    %767 = vector.extract_strided_slice %10 {offsets = [0, 46], sizes = [4, 1], strides = [1, 1]} : vector<4x50xf32> to vector<4x1xf32>
    %768 = vector.broadcast %767 : vector<4x1xf32> to vector<4x256xf32>
    %769 = arith.mulf %768, %766 : vector<4x256xf32>
    %770 = arith.addf %754, %769 : vector<4x256xf32>
    %771 = vector.extract_strided_slice %18 {offsets = [0, 46], sizes = [4, 1], strides = [1, 1]} : vector<4x50xf32> to vector<4x1xf32>
    %772 = vector.broadcast %771 : vector<4x1xf32> to vector<4x256xf32>
    %773 = arith.mulf %772, %766 : vector<4x256xf32>
    %774 = arith.addf %758, %773 : vector<4x256xf32>
    %775 = vector.extract_strided_slice %21 {offsets = [0, 46], sizes = [4, 1], strides = [1, 1]} : vector<4x50xf32> to vector<4x1xf32>
    %776 = vector.broadcast %775 : vector<4x1xf32> to vector<4x256xf32>
    %777 = arith.mulf %776, %766 : vector<4x256xf32>
    %778 = arith.addf %762, %777 : vector<4x256xf32>
    %c206_i32 = arith.constant 206 : i32
    %779 = tpu.dynamic_rotate %2 by %c206_i32 dim 1 : vector<4x256xf32>, i32 -> vector<4x256xf32>
    %c47 = arith.constant 47 : index
    %c0_59 = arith.constant 0 : index
    %780 = vector.load %arg5[%c47, %c0_59] : memref<49x256xf32, #tpu.memory_space<vmem>>, vector<1x256xf32>
    %781 = vector.broadcast %780 : vector<1x256xf32> to vector<4x256xf32>
    %782 = arith.mulf %779, %781 : vector<4x256xf32>
    %783 = vector.extract_strided_slice %10 {offsets = [0, 47], sizes = [4, 1], strides = [1, 1]} : vector<4x50xf32> to vector<4x1xf32>
    %784 = vector.broadcast %783 : vector<4x1xf32> to vector<4x256xf32>
    %785 = arith.mulf %784, %782 : vector<4x256xf32>
    %786 = arith.addf %770, %785 : vector<4x256xf32>
    %787 = vector.extract_strided_slice %18 {offsets = [0, 47], sizes = [4, 1], strides = [1, 1]} : vector<4x50xf32> to vector<4x1xf32>
    %788 = vector.broadcast %787 : vector<4x1xf32> to vector<4x256xf32>
    %789 = arith.mulf %788, %782 : vector<4x256xf32>
    %790 = arith.addf %774, %789 : vector<4x256xf32>
    %791 = vector.extract_strided_slice %21 {offsets = [0, 47], sizes = [4, 1], strides = [1, 1]} : vector<4x50xf32> to vector<4x1xf32>
    %792 = vector.broadcast %791 : vector<4x1xf32> to vector<4x256xf32>
    %793 = arith.mulf %792, %782 : vector<4x256xf32>
    %794 = arith.addf %778, %793 : vector<4x256xf32>
    %c205_i32 = arith.constant 205 : i32
    %795 = tpu.dynamic_rotate %2 by %c205_i32 dim 1 : vector<4x256xf32>, i32 -> vector<4x256xf32>
    %c48 = arith.constant 48 : index
    %c0_60 = arith.constant 0 : index
    %796 = vector.load %arg5[%c48, %c0_60] : memref<49x256xf32, #tpu.memory_space<vmem>>, vector<1x256xf32>
    %797 = vector.broadcast %796 : vector<1x256xf32> to vector<4x256xf32>
    %798 = arith.mulf %795, %797 : vector<4x256xf32>
    %799 = vector.extract_strided_slice %10 {offsets = [0, 48], sizes = [4, 1], strides = [1, 1]} : vector<4x50xf32> to vector<4x1xf32>
    %800 = vector.broadcast %799 : vector<4x1xf32> to vector<4x256xf32>
    %801 = arith.mulf %800, %798 : vector<4x256xf32>
    %802 = arith.addf %786, %801 : vector<4x256xf32>
    %803 = vector.extract_strided_slice %18 {offsets = [0, 48], sizes = [4, 1], strides = [1, 1]} : vector<4x50xf32> to vector<4x1xf32>
    %804 = vector.broadcast %803 : vector<4x1xf32> to vector<4x256xf32>
    %805 = arith.mulf %804, %798 : vector<4x256xf32>
    %806 = arith.addf %790, %805 : vector<4x256xf32>
    %807 = vector.extract_strided_slice %21 {offsets = [0, 48], sizes = [4, 1], strides = [1, 1]} : vector<4x50xf32> to vector<4x1xf32>
    %808 = vector.broadcast %807 : vector<4x1xf32> to vector<4x256xf32>
    %809 = arith.mulf %808, %798 : vector<4x256xf32>
    %810 = arith.addf %794, %809 : vector<4x256xf32>
    %811 = arith.maximumf %802, %806 : vector<4x256xf32>
    %cst = arith.constant 0.000000e+00 : f32
    %812 = vector.broadcast %cst : f32 to vector<4x256xf32>
    %813 = arith.subf %802, %811 : vector<4x256xf32>
    %814 = math.exp %813 : vector<4x256xf32>
    %815 = arith.addf %812, %814 : vector<4x256xf32>
    %816 = arith.subf %806, %811 : vector<4x256xf32>
    %817 = math.exp %816 : vector<4x256xf32>
    %818 = arith.addf %815, %817 : vector<4x256xf32>
    %819 = math.log %818 : vector<4x256xf32>
    %820 = arith.addf %811, %819 : vector<4x256xf32>
    %821 = arith.addf %820, %810 : vector<4x256xf32>
    %c0_61 = arith.constant 0 : index
    %c0_62 = arith.constant 0 : index
    %c0_63 = arith.constant 0 : index
    %822 = vector.load %arg6[%c0_61, %c0_62, %c0_63] : memref<1x4x256xf32, #tpu.memory_space<vmem>>, vector<1x4x256xf32>
    %823 = vector.shape_cast %822 : vector<1x4x256xf32> to vector<4x256xf32>
    %824 = vector.shape_cast %821 : vector<4x256xf32> to vector<1x4x256xf32>
    tpu.vector_store %arg6[%c0_61, %c0_62, %c0_63], %824 {strides = array<i32>} : memref<1x4x256xf32, #tpu.memory_space<vmem>>, vector<1x4x256xf32>,
    return
  }
  func.func @transform_0(%arg0: i32, %arg1: i32, %arg2: memref<4xi32, #tpu.memory_space<smem>>) -> (i32, i32, i32) {
    %c0_i32 = arith.constant 0 : i32
    %c0_i32_0 = arith.constant 0 : i32
    return %arg0, %arg1, %c0_i32 : i32, i32, i32
  }
  func.func @transform_1(%arg0: i32, %arg1: i32, %arg2: memref<4xi32, #tpu.memory_space<smem>>) -> (i32, i32, i32) {
    %c0_i32 = arith.constant 0 : i32
    %c0_i32_0 = arith.constant 0 : i32
    %c0_i32_1 = arith.constant 0 : i32
    return %c0_i32, %arg1, %c0_i32_0 : i32, i32, i32
  }
  func.func @transform_2(%arg0: i32, %arg1: i32, %arg2: memref<4xi32, #tpu.memory_space<smem>>) -> (i32, i32) {
    %c0_i32 = arith.constant 0 : i32
    %c0_i32_0 = arith.constant 0 : i32
    %c0_i32_1 = arith.constant 0 : i32
    return %c0_i32, %c0_i32_0 : i32, i32
  }
  func.func @transform_3(%arg0: i32, %arg1: i32, %arg2: memref<4xi32, #tpu.memory_space<smem>>) -> (i32, i32, i32) {
    %c0_i32 = arith.constant 0 : i32
    %c0_i32_0 = arith.constant 0 : i32
    return %arg0, %arg1, %c0_i32 : i32, i32, i32
  }
}

</mosaic_0001>

<bundles_post_ra>
// kernel: tpu_custom_call.1
= control target key start
LH: loop header
LB: loop body
LE: loop exit
PB: predicated region body
PF: predicated region fallthrough
CT: control target
= control target key end

     0   :  { %s4583_s15 = smov [#allocation3]   ;;  %s6147_s0 = inlined_call_operand.hbm [shape: s32[4], index: 0, kind: input, shape index: {}]   ;;  %s6148_s1 = inlined_call_operand.hbm [shape: bf16[2,4,256], index: 1, kind: input, shape index: {}]   ;;  %s6149_s2 = inlined_call_operand.hbm [shape: bf16[5,4,50], index: 2, kind: input, shape index: {}]   ;;  %s6150_s3 = inlined_call_operand.hbm [shape: f32[49,256], index: 3, kind: input, shape index: {}]   ;;  %s6151_s4 = inlined_call_operand.hbm [shape: f32[2,4,256], index: 4, kind: output, shape index: {}]  }
   0x1   :  { %10 = dma.hbm_to_smem %s6147_s0, 16, %s4583_s15, [#allocation2] }
   0x2   :  { %4545 = dma.done.wait [#allocation2], 16 }
   0x3   :  { %4546 = vsyncadd [#allocation2], 4294967280 }
   0x4   :  { %12 = sfence }
   0x5   :  { %13 = vsyncpa [#allocation5], 0 }
   0x6   :  { %15 = vsyncpa [#allocation5 + $0x1], 0 }
   0x7   :  { %16 = vsyncpa [#allocation8], 0 }
   0x8   :  { %17 = vsyncpa [#allocation6], 0 }
   0x9   :  { %19 = vsyncpa [#allocation6 + $0x1], 0  ;;  %s4719_s18 = smov 0   ;;  %s4721_s19 = smov 0  }
   0xa   :  { %s4723_s20 = smov 0   ;;  %s4725_s21 = smov 0  }
   0xb   :  { %s4727_s22 = smov 0   ;;  %s4729_s23 = smov 0  }
   0xc LB: > { %s3602_s0 = sadd.s32 4294967295, %s4581_s23   ;;  %s3603_s24 = sadd.s32 4294967294, %s4581_s23   ;;  %s4581_s23 = sphi %s4729_s23, %s25_s23   ;;  %s4577_s22 = sphi %s4727_s22, %s6215_s22   ;;  %s4573_s21 = sphi %s4725_s21, %s6214_s21   ;;  %s4569_s20 = sphi %s4723_s20, %s6213_s20   ;;  %s4565_s19 = sphi %s4721_s19, %s6212_s19   ;;  %s4561_s18 = sphi %s4719_s18, %s6211_s18  }
   0xd   : > { %p59_p0 = scmp.ne.s32.totalorder %s4565_s19, %s4561_s18  ;;  %p4753_p1 = scmp.eq.s32.totalorder %s3602_s0, 0 }
   0xe   : > { %p4757_p2 = scmp.eq.s32.totalorder %s3602_s0, 1  ;;  %p138_p3 = scmp.eq.s32.totalorder %s3603_s24, 1 }
   0xf   : > { %s6168_s25 = scalar_select %p4753_p1, 1, 0 }
  0x10   : > { %p4763_p4 = por %p4753_p1, %p59_p0  ;;  %p3604_p5 = scmp.ge.s32.totalorder %s4581_s23, 1 }
  0x11   : > { %p4768_p6 = por %p138_p3, %p59_p0  ;;  %p145_p7 = scmp.lt.s32.totalorder %s4581_s23, 3 }
  0x12   : > { %s6170_s27 = scalar_select %p4763_p4, 1, 0 }
  0x13   : > { %s6171_s28 = scalar_select %p4768_p6, 1, 0 }
  0x14   : > { %p4773_p8 = pnand %p3604_p5, %p145_p7  ;;  %s4584_s30 = smov [#allocation7]  }
  0x15   : > { %s159_s5 = sshll.u32 %s4584_s30, 4  ;;  %s4585_s7 = smov [#allocation9]   ;;  %s160_s5 = int_to_ptr.vmem [resolvable:$true] %s159_s5 }
  0x16   : > { %p3638_p9 = pneg %p4773_p8  ;;  %s172_s8 = sshll.u32 %s4585_s7, 4  ;;  %s173_s8 = int_to_ptr.vmem [resolvable:$true] %s172_s8 }
  0x17   : > { %s4426_s9 = scalar_lea.vmem %s160_s5, 160  ;;  %p4434_p5 = scmp.lt.s32.totalorder %s160_s5, %s160_s5 }
  0x18   : > { %p4782_p11 = pnand %p3638_p9, %p4753_p1  ;;  %p4427_p13 = scmp.ne.s32.totalorder %s160_s5, %s4426_s9 }
  0x19   : > { %p4435_p7 = scmp.lt.s32.totalorder %s4426_s9, %s4426_s9 }
  0x1a   : > { %p4417_p12 = pneg %p4782_p11 }
  0x1b   : > { %p4436_p10 = por %p4435_p7, %p4434_p5 }
  0x1c   : > { %p4429_p0 = pnand %p4427_p13, %p4417_p12 }
  0x1e   : > { %p4430_p3 = pneg %p4429_p0 }
  0x20   : > { %p4437_p9 = pnand %p4436_p10, %p4430_p3 }
  0x22   : > { %4440 = shalt.err (!%p4437_p9)
}
  0x23   : > { %s4586_s10 = smov 32   ;;  %s4587_s11 = smov 2  }
  0x24   : > { %3641 = dma.hbm_to_vmem [thread:$0]  (!%p4782_p11), %s6149_s2, 160, %s160_s5, [#allocation8], %s4586_s10, %s4586_s10, %s4587_s11  }
  0x25   : > { %s4452_s14 = scalar_lea.vmem %s173_s8, 1792  ;;  %p4460_p1 = scmp.lt.s32.totalorder %s173_s8, %s173_s8 }
  0x26   : > { %p4453_p6 = scmp.ne.s32.totalorder %s173_s8, %s4452_s14  ;;  %p4461_p4 = scmp.lt.s32.totalorder %s4452_s14, %s4452_s14 }
  0x28   : > { %p4455_p13 = pnand %p4453_p6, %p4417_p12  ;;  %p4462_p5 = por %p4461_p4, %p4460_p1 }
  0x2a   : > { %p4456_p0 = pneg %p4455_p13 }
  0x2c   : > { %p4463_p10 = pnand %p4462_p5, %p4456_p0 }
  0x2e   : > { %4466 = shalt.err (!%p4463_p10)
}
  0x2f   : > { %s4588_s15 = smov 256   ;;  %s4589_s16 = smov 16  }
  0x30   : > { %3644 = dma.hbm_to_vmem [thread:$0]  (!%p4782_p11), %s6150_s3, 1792, %s173_s8, [#allocation8], %s4588_s15, %s4588_s15, %s4589_s16  }
  0x31   : > { %s37_s24 = sadd.s32 1, %s4577_s22  ;;  %s46_s30 = sadd.s32 1, %s4569_s20 }
  0x32   : > { %p39_p1 = scmp.ge.s32.totalorder %s37_s24, 2  ;;  %p53_p4 = scmp.ne.s32.totalorder %s4569_s20, %s4565_s19 }
  0x33   : > { %p54_p6 = scmp.eq.s32.totalorder %s4581_s23, 0  ;;  %p3655_p12 = scmp.lt.s32.totalorder %s4581_s23, 2 }
  0x34   : > { %s6217_s24 = smov (%p39_p1, %s37_s24), 0  ;;  %p4814_p7 = por %p4757_p2, %p53_p4 }
  0x35   : > { %p55_p3 = por %p54_p6, %p53_p4  ;;  %s41_s6 = ssub.s32 %s4577_s22, %s6217_s24 }
  0x36   : > { %s186_s7 = sand.u32 1, %s4569_s20   ;;  %p44_p9 = scmp.eq.s32.totalorder %s41_s6, 0 }
  0x37   : > { %s3608_s8 = sshll.u32 %s186_s7, 2  ;;  %s3624_s9 = sshll.u32 %s4577_s22, 6 }
  0x38   : > { %s4823_s10 = scalar_select %p44_p9, %s4569_s20, %s46_s30  }
  0x39   : > { %s198_s13 = scalar_lea.hbm %s6148_s1, %s3624_s9  ;;  %s190_s14 = scalar_lea.vmem [#allocation4], %s3608_s8 }
  0x3a   : > { %s200_s15 = sshll.u32 %s190_s14, 4  ;;  %p4830_p11 = pnand %p3655_p12, %p55_p3  ;;  %s201_s15 = int_to_ptr.vmem [resolvable:$true] %s200_s15 }
  0x3b   : > { %s187_s16 = scalar_lea.sflag [#allocation5], %s186_s7  ;;  %s4480_s17 = scalar_lea.vmem %s201_s15, 64 }
  0x3c   : > { %p4469_p2 = pneg %p4830_p11  ;;  %p4481_p13 = scmp.ne.s32.totalorder %s201_s15, %s4480_s17 }
  0x3d   : > { %s4590_s0 = smov [#allocation4]  }
  0x3e   : > { %p4483_p0 = pnand %p4481_p13, %p4469_p2  ;;  %s4485_s30 = sshll.u32 %s4590_s0, 4  ;;  %s4486_s30 = int_to_ptr.vmem [resolvable:$false] %s4485_s30 }
  0x3f   : > { %s4487_s6 = scalar_lea.vmem %s4486_s30, 128  ;;  %p4488_p10 = scmp.lt.s32.totalorder %s201_s15, %s4486_s30 }
  0x40   : > { %p4484_p5 = pneg %p4483_p0  ;;  %p4489_p1 = scmp.lt.s32.totalorder %s4487_s6, %s4480_s17 }
  0x42   : > { %p4490_p4 = por %p4489_p1, %p4488_p10 }
  0x44   : > { %p4491_p6 = pnand %p4490_p4, %p4484_p5 }
  0x46   : > { %4494 = shalt.err (!%p4491_p6)
}
  0x47   : > { %3648 = dma.hbm_to_vmem [thread:$0]  (!%p4830_p11), %s198_s13, 64, %s201_s15, %s187_s16  }
  0x48   : > { %209 = sbr.rel (%p4773_p8) target bundleno = 641 (0x281), region = 32  ;;  %s4841_s7 = sand.u32 (!%p4773_p8), 1, %s4565_s19  }
  0x49   : > { %s3612_s8 = sshll.u32 (!%p4773_p8), %s4841_s7, 2  ;;  %s212_s9 = scalar_lea.sflag (!%p4773_p8), [#allocation5], %s4841_s7 }
  0x4a   : > { %s215_s11 = scalar_lea.vmem (!%p4773_p8), [#allocation4], %s3612_s8  ;;  %p6176_p12 = scmp.ne.s32.totalorder (!%p4773_p8), %s6170_s27, 0 }
  0x4d   : > { %4548 = dma.done.wait (%p6176_p12), %s212_s9, 64  }
  0x4e   : > { %4550 = vsyncadd (%p6176_p12), %s212_s9, 4294967232  ;;  %p6177_p3 = scmp.ne.s32.totalorder %s6168_s25, 0 }
  0x50   : > { %4552 = dma.done.wait (%p6177_p3), [#allocation8], 1952  }
  0x51   : > { %4554 = vsyncadd (%p6177_p3), [#allocation8], 4294965344  ;;  %s3616_s29 = sshll.u32 %s4573_s21, 1  ;;  %v4591_v0 = vmov 0   ;;  %v261_v1 = vld [vmem:[#allocation7 + $0x8] sm:$0x3]  ;;  %v271_v38 = vlaneseq }
  0x52   : > { %s249_s12 = sld [smem:[#allocation3 + %s3616_s29]]  ;;  %s254_s13 = sadd.s32 1, %s3616_s29  ;;  %3813 = vset.pattern.permute.xlu0 %v4591_v0  ;;  %3831 = vset.pattern.permute.xlu1 %v4591_v0  ;;  %v246_v2 = vld [vmem:[%s215_s11] sm:$0xf]  ;;  %v4854_v3 = vunpack.c.l.bf16 %v261_v1  ;;  %v4592_v11 = vmov 49   ;;  %v4595_v13 = vmov 1  }
  0x53   : > { %s255_s14 = sld [smem:[#allocation3 + %s254_s13]]  ;;  %v4856_v4 = vunpack.c.l.bf16 %v246_v2  ;;  %s4593_s16 = smov 51   ;;  %v4596_v14 = vmov 2   ;;  %v4598_v15 = vmov 3   ;;  %v4599_v16 = vmov 4  }
  0x54   : > { %356 = vperm.xlu0 %3813, %v4854_v3   ;;  %s4594_s17 = smov 50   ;;  %s4597_s0 = smov 49   ;;  %v4601_v17 = vmov 5   ;;  %v4603_v18 = vmov 6   ;;  %v4604_v19 = vmov 7   ;;  %v4606_v20 = vmov 8  }
  0x55   : > { %v300_v7 = vcombine.high %v4856_v4, %v4856_v4  ;;  %s4600_s30 = smov 48   ;;  %s4602_s6 = smov 47   ;;  %v4608_v21 = vmov 9   ;;  %v4609_v22 = vmov 10   ;;  %v4611_v23 = vmov 11  }
  0x56   : > { %s4605_s8 = smov 46   ;;  %s4607_s9 = smov 45   ;;  %v4612_v24 = vmov 12   ;;  %v4614_v25 = vmov 13   ;;  %v4616_v26 = vmov 14   ;;  %v4617_v27 = vmov 15  }
  0x57   : > { %v4862_v10 = vpack.i.bf16 %v300_v7, %v4856_v4  ;;  %s4610_s11 = smov 35   ;;  %s4613_s29 = smov 34   ;;  %v4619_v28 = vmov 16   ;;  %v4621_v29 = vmov 17   ;;  %v4622_v30 = vmov 18  }
  0x58   : > { %s3617_s15 = sshll.u32 %s249_s12, 1  ;;  %3814 = vset.pattern.permute.xlu0 %v4592_v11  ;;  %s4615_s12 = smov 33   ;;  %v4624_v31 = vmov 19   ;;  %v4625_v32 = vmov 20   ;;  %v4627_v33 = vmov 21   ;;  %v4629_v34 = vmov 22  }
  0x59   : > { %s3618_s26 = sshll.u32 %s255_s14, 1  ;;  %s251_s27 = scalar_lea.vmem [#allocation7], %s3617_s15  ;;  %3816 = vrot.lane.b32.xlu1 %v4862_v10, %s4593_s16  ;;  %289 = vperm.xlu0 %3814, %v4854_v3   ;;  %v4630_v35 = vmov 23   ;;  %v4633_v39 = vmov 25   ;;  %v272_v41 = vshrl.u32 %v271_v38, 7  ;;  %v4938_v43 = vand.u32 127, %v271_v38 }
  0x5a   : > { %v252_v5 = vld [vmem:[%s251_s27] sm:$0x3]  ;;  %s257_s25 = scalar_lea.vmem [#allocation7], %s3618_s26  ;;  %s4618_s13 = smov 32   ;;  %v4635_v44 = vmov 839922192  }
  0x5b   : > { %v258_v6 = vld [vmem:[%s257_s25] sm:$0x3]  ;;  %v253_v8 = vunpack.c.l.bf16 %v252_v5  ;;  %s4620_s14 = smov 31   ;;  %s4623_s15 = smov 30   ;;  %v269_v45 = vunpack.c.l.s4 %v4635_v44  ;;  %v4942_v47 = vsub.s32 0, %v272_v41  ;;  %v4944_v48 = vsub.s32 1, %v272_v41 }
  0x5c   : > { %v259_v9 = vunpack.c.l.bf16 %v258_v6  ;;  %s4626_s26 = smov 29   ;;  %s4628_s27 = smov 19   ;;  %v4636_v49 = vmov 26   ;;  %v311_v50 = vld [vmem:[#allocation9] ss:$8 sm:$0x3] }
  0x5d   : > { %3821 = vrot.lane.b32.xlu1 %v4862_v10, %s4594_s17  ;;  %s4631_s25 = smov 18   ;;  %s4632_s16 = smov 127   ;;  %vm308_vm0 = vcmp.lt.s32.totalorder %v4938_v43, 51  ;;  %v270_v53 = vunpack.c.0.s8 %v269_v45  ;;  %v376_v54 = vld [vmem:[#allocation9 + $0x1] ss:$8 sm:$0x3]  ;;  %v316_v56 = vrot.slane %v311_v50, %v4942_v47  ;;  %v320_v57 = vrot.slane %v311_v50, %v4944_v48 }
  0x5e   : > { %v4866_v12 = vpack.i.bf16 %v259_v9, %v253_v8  ;;  %s4634_s17 = smov 17   ;;  %v441_v59 = vld [vmem:[#allocation9 + $0x2] ss:$8 sm:$0x3]  ;;  %v4638_v0 = vmov 27   ;;  %vm372_vm1 = vcmp.lt.s32.totalorder %v4938_v43, 50  ;;  %v381_v1 = vrot.slane %v376_v54, %v4942_v47 }
  0x5f   : > { %v4960_v2 = vsub.s32 %v270_v53, %v272_v41  ;;  %v385_v5 = vrot.slane %v376_v54, %v4944_v48  ;;  %vm437_vm2 = vcmp.lt.s32.totalorder %v4938_v43, 49  ;;  %v446_v6 = vrot.slane %v441_v59, %v4942_v47 }
  0x60   : > { %3826 = vperm.xlu0 %3814, %v4866_v12   ;;  %v450_v11 = vrot.slane %v441_v59, %v4944_v48  ;;  %vm502_vm3 = vcmp.lt.s32.totalorder %v4938_v43, 48  ;;  %v4641_v44 = vmov 29   ;;  %vm567_vm4 = vcmp.lt.s32.totalorder %v4938_v43, 47 }
  0x61   : > { %3833 = vperm.xlu1 %3831, %v4866_v12   ;;  %vm632_vm5 = vcmp.lt.s32.totalorder %v4938_v43, 46  ;;  %vm697_vm6 = vcmp.lt.s32.totalorder %v4938_v43, 45  ;;  %vm762_vm7 = vcmp.lt.s32.totalorder %v4938_v43, 35  ;;  %vm827_vm8 = vcmp.lt.s32.totalorder %v4938_v43, 34 }
  0x62   : > { %vm892_vm9 = vcmp.lt.s32.totalorder %v4938_v43, 33  ;;  %vm957_vm10 = vcmp.lt.s32.totalorder %v4938_v43, 32  ;;  %vm1022_vm11 = vcmp.lt.s32.totalorder %v4938_v43, 31  ;;  %vm1087_vm12 = vcmp.lt.s32.totalorder %v4938_v43, 30 }
  0x63   : > { %vm1152_vm13 = vcmp.lt.s32.totalorder %v4938_v43, 29  ;;  %vm1217_vm14 = vcmp.lt.s32.totalorder %v4938_v43, 19  ;;  %vm1282_vm15 = vcmp.lt.s32.totalorder %v4938_v43, 18 }
  0x64   : > { %3830 = vset.pattern.permute.xlu0 %v4595_v13 }
  0x65   : > { %421 = vperm.xlu0 %3830, %v4854_v3   ;;  %3837 = vset.pattern.permute.xlu1 %v4595_v13 }
  0x66   : > { %3839 = vperm.xlu1 %3837, %v4866_v12  }
  0x69   : > { %3854 = vset.pattern.permute.xlu0 %v4596_v14 }
  0x6a   : > { %486 = vperm.xlu0 %3854, %v4854_v3   ;;  %3844 = vrot.lane.b32.xlu1 %v4862_v10, %s4597_s0  ;;  %s4637_s0 = smov 16  }
  0x6b   : > { %3848 = vset.pattern.permute.xlu1 %v4596_v14 }
  0x6e   : > { %3866 = vset.pattern.permute.xlu0 %v4598_v15  ;;  %3850 = vperm.xlu1 %3848, %v4866_v12  }
  0x6f   : > { %551 = vperm.xlu0 %3866, %v4854_v3  }
  0x72   : > { %3856 = vrot.lane.b32.xlu1 %v4862_v10, %s4600_s30  ;;  %s4640_s30 = smov 15  }
  0x73   : > { %3878 = vset.pattern.permute.xlu0 %v4599_v16  ;;  %3860 = vset.pattern.permute.xlu1 %v4598_v15 }
  0x74   : > { %616 = vperm.xlu0 %3878, %v4854_v3  }
  0x76   : > { %3862 = vperm.xlu1 %3860, %v4866_v12  }
  0x78   : > { %3890 = vset.pattern.permute.xlu0 %v4601_v17 }
  0x79   : > { %681 = vperm.xlu0 %3890, %v4854_v3  }
  0x7a   : > { %3868 = vrot.lane.b32.xlu1 %v4862_v10, %s4602_s6  ;;  %s4643_s6 = smov 14  }
  0x7b   : > { %3872 = vset.pattern.permute.xlu1 %v4599_v16 }
  0x7d   : > { %3902 = vset.pattern.permute.xlu0 %v4603_v18 }
  0x7e   : > { %746 = vperm.xlu0 %3902, %v4854_v3   ;;  %3874 = vperm.xlu1 %3872, %v4866_v12  }
  0x82   : > { %3914 = vset.pattern.permute.xlu0 %v4604_v19  ;;  %3880 = vrot.lane.b32.xlu1 %v4862_v10, %s4605_s8  ;;  %s4645_s8 = smov 13  }
  0x83   : > { %811 = vperm.xlu0 %3914, %v4854_v3   ;;  %3884 = vset.pattern.permute.xlu1 %v4601_v17 }
  0x86   : > { %3886 = vperm.xlu1 %3884, %v4866_v12  }
  0x87   : > { %3926 = vset.pattern.permute.xlu0 %v4606_v20 }
  0x88   : > { %876 = vperm.xlu0 %3926, %v4854_v3  }
  0x8a   : > { %3892 = vrot.lane.b32.xlu1 %v4862_v10, %s4607_s9  ;;  %s4648_s9 = smov 3  }
  0x8b   : > { %3896 = vset.pattern.permute.xlu1 %v4603_v18  ;;  %v4639_v18 = vmov 28  }
  0x8c   : > { %3938 = vset.pattern.permute.xlu0 %v4608_v21 }
  0x8d   : > { %941 = vperm.xlu0 %3938, %v4854_v3  }
  0x8e   : > { %3898 = vperm.xlu1 %3896, %v4866_v12  }
  0x91   : > { %3950 = vset.pattern.permute.xlu0 %v4609_v22 }
  0x92   : > { %1006 = vperm.xlu0 %3950, %v4854_v3   ;;  %3904 = vrot.lane.b32.xlu1 %v4862_v10, %s4610_s11  ;;  %s4650_s11 = smov 2  }
  0x93   : > { %3908 = vset.pattern.permute.xlu1 %v4604_v19 }
  0x96   : > { %3962 = vset.pattern.permute.xlu0 %v4611_v23  ;;  %3910 = vperm.xlu1 %3908, %v4866_v12  }
  0x97   : > { %1071 = vperm.xlu0 %3962, %v4854_v3  }
  0x9a   : > { %3916 = vrot.lane.b32.xlu1 %v4862_v10, %s4613_s29  ;;  %s4653_s29 = smov 1  }
  0x9b   : > { %3974 = vset.pattern.permute.xlu0 %v4612_v24  ;;  %3920 = vset.pattern.permute.xlu1 %v4606_v20 }
  0x9c   : > { %1136 = vperm.xlu0 %3974, %v4854_v3  }
  0x9e   : > { %3922 = vperm.xlu1 %3920, %v4866_v12  }
  0xa0   : > { %3986 = vset.pattern.permute.xlu0 %v4614_v25 }
  0xa1   : > { %1201 = vperm.xlu0 %3986, %v4854_v3  }
  0xa2   : > { %3928 = vrot.lane.b32.xlu1 %v4862_v10, %s4615_s12  ;;  %s4659_s12 = smov 126  }
  0xa3   : > { %3932 = vset.pattern.permute.xlu1 %v4608_v21 }
  0xa5   : > { %3998 = vset.pattern.permute.xlu0 %v4616_v26 }
  0xa6   : > { %1266 = vperm.xlu0 %3998, %v4854_v3   ;;  %3934 = vperm.xlu1 %3932, %v4866_v12  }
  0xaa   : > { %4010 = vset.pattern.permute.xlu0 %v4617_v27  ;;  %3940 = vrot.lane.b32.xlu1 %v4862_v10, %s4618_s13  ;;  %s4661_s13 = smov 82  }
  0xab   : > { %1331 = vperm.xlu0 %4010, %v4854_v3   ;;  %3944 = vset.pattern.permute.xlu1 %v4609_v22 }
  0xae   : > { %3946 = vperm.xlu1 %3944, %v4866_v12  }
  0xaf   : > { %4022 = vset.pattern.permute.xlu0 %v4619_v28 }
  0xb0   : > { %1396 = vperm.xlu0 %4022, %v4854_v3  }
  0xb2   : > { %3952 = vrot.lane.b32.xlu1 %v4862_v10, %s4620_s14  ;;  %s4662_s14 = smov 125  }
  0xb3   : > { %3956 = vset.pattern.permute.xlu1 %v4611_v23 }
  0xb4   : > { %4034 = vset.pattern.permute.xlu0 %v4621_v29 }
  0xb5   : > { %1461 = vperm.xlu0 %4034, %v4854_v3  }
  0xb6   : > { %3958 = vperm.xlu1 %3956, %v4866_v12  }
  0xb9   : > { %4046 = vset.pattern.permute.xlu0 %v4622_v30 }
  0xba   : > { %1526 = vperm.xlu0 %4046, %v4854_v3   ;;  %3964 = vrot.lane.b32.xlu1 %v4862_v10, %s4623_s15  ;;  %s4663_s15 = smov 81  }
  0xbb   : > { %3968 = vset.pattern.permute.xlu1 %v4612_v24 }
  0xbe   : > { %4058 = vset.pattern.permute.xlu0 %v4624_v31  ;;  %3970 = vperm.xlu1 %3968, %v4866_v12  }
  0xbf   : > { %1591 = vperm.xlu0 %4058, %v4854_v3  }
  0xc2   : > { %3976 = vrot.lane.b32.xlu1 %v4862_v10, %s4626_s26  ;;  %s4664_s26 = smov 80  }
  0xc3   : > { %4070 = vset.pattern.permute.xlu0 %v4625_v32  ;;  %3980 = vset.pattern.permute.xlu1 %v4614_v25 }
  0xc4   : > { %1656 = vperm.xlu0 %4070, %v4854_v3  }
  0xc6   : > { %3982 = vperm.xlu1 %3980, %v4866_v12  }
  0xc8   : > { %4082 = vset.pattern.permute.xlu0 %v4627_v33 }
  0xc9   : > { %1721 = vperm.xlu0 %4082, %v4854_v3  }
  0xca   : > { %3988 = vrot.lane.b32.xlu1 %v4862_v10, %s4628_s27  ;;  %s4665_s27 = smov 115  }
  0xcb   : > { %3992 = vset.pattern.permute.xlu1 %v4616_v26  ;;  %v3817_v36 = vpop.permute.xlu1 %3816  ;;  %v506_v26 = vld [vmem:[#allocation9 + $0x3] ss:$8 sm:$0x3] }
  0xcc   : > { %v3819_v51 = vunpack.i.h.bf16 %v3817_v36  ;;  %v3818_v52 = vunpack.i.l.bf16 %v3817_v36  ;;  %v515_v41 = vrot.slane %v506_v26, %v4944_v48 }
  0xcd   : > { %4094 = vset.pattern.permute.xlu0 %v4629_v34 }
  0xce   : > { %1786 = vperm.xlu0 %4094, %v4854_v3   ;;  %3994 = vperm.xlu1 %3992, %v4866_v12   ;;  %v309_v60 = vsel %vm308_vm0, %v3818_v52, %v3819_v51  ;;  %v310_v61 = vsel %vm308_vm0, %v3819_v51, %v3818_v52  ;;  %vm1347_vm0 = vcmp.lt.s32.totalorder %v4938_v43, 17 }
  0xcf   : > { %v4929_v37 = vpop.permute.xlu0 %356  ;;  %v3822_v40 = vpop.permute.xlu1 %3821  ;;  %v323_v7 = vmul.f32 %v316_v56, %v310_v61  ;;  %v324_v8 = vmul.f32 %v320_v57, %v309_v60 }
  0xd0   : > { %v3824_v62 = vunpack.i.h.bf16 %v3822_v40  ;;  %v3823_v63 = vunpack.i.l.bf16 %v3822_v40  ;;  %v511_v40 = vrot.slane %v506_v26, %v4942_v47 }
  0xd2   : > { %4106 = vset.pattern.permute.xlu0 %v4630_v35  ;;  %4000 = vrot.lane.b32.xlu1 %v4862_v10, %s4631_s25  ;;  %v373_v13 = vsel %vm372_vm1, %v3823_v63, %v3824_v62  ;;  %v374_v14 = vsel %vm372_vm1, %v3824_v62, %v3823_v63  ;;  %s4666_s25 = smov 79   ;;  %vm1412_vm1 = vcmp.lt.s32.totalorder %v4938_v43, 16 }
  0xd3   : > { %1851 = vperm.xlu0 %4106, %v4854_v3   ;;  %4004 = vset.pattern.permute.xlu1 %v4617_v27  ;;  %v388_v21 = vmul.f32 %v381_v1, %v374_v14  ;;  %v389_v22 = vmul.f32 %v385_v5, %v373_v13  ;;  %v4973_v27 = vcombine.low %v323_v7, %v324_v8  ;;  %v4642_v5 = vmov 30  }
  0xd4   : > { %v4935_v42 = vpop.permute.xlu0 %289 }
  0xd5   : > { %v298_v38 = vrot.slane %v4935_v42, %v4960_v2 }
  0xd6   : > { %4006 = vperm.xlu1 %4004, %v4866_v12  }
  0xd7   : > { %4114 = vrot.lane.b32.xlu0 %v4862_v10, %s4632_s16  ;;  %s4667_s16 = smov 78  }
  0xd8   : > { %4124 = vset.pattern.permute.xlu0 %v4633_v39 }
  0xda   : > { %4012 = vrot.lane.b32.xlu1 %v4862_v10, %s4634_s17  ;;  %s4668_s17 = smov 114  }
  0xdb   : > { %1955 = vperm.xlu0 %4124, %v4854_v3   ;;  %4016 = vset.pattern.permute.xlu1 %v4619_v28  ;;  %v4950_v55 = vpop.permute.xlu0 %3826  ;;  %v365_v28 = vrot.slane %v4929_v37, %v4960_v2  ;;  %v4986_v37 = vcombine.low %v388_v21, %v389_v22 }
  0xdc   : > { %v4940_v46 = vpop.permute.xlu1 %3833 }
  0xde   : > { %4018 = vperm.xlu1 %4016, %v4866_v12  }
  0xdf   : > { %4136 = vset.pattern.permute.xlu0 %v4636_v49 }
  0xe0   : > { %2020 = vperm.xlu0 %4136, %v4854_v3   ;;  %v422_v15 = vpop.permute.xlu0 %421 }
  0xe1   : > { %v4954_v58 = vpop.permute.xlu1 %3839  ;;  %v430_v36 = vrot.slane %v422_v15, %v4960_v2 }
  0xe2   : > { %4024 = vrot.lane.b32.xlu1 %v4862_v10, %s4637_s0  ;;  %s4669_s0 = smov 77  }
  0xe3   : > { %4028 = vset.pattern.permute.xlu1 %v4621_v29  ;;  %v431_v54 = vmul.f32 %v430_v36, %v4986_v37 }
  0xe4   : > { %4148 = vset.pattern.permute.xlu0 %v4638_v0 }
  0xe5   : > { %2085 = vperm.xlu0 %4148, %v4854_v3   ;;  %v3845_v9 = vpop.permute.xlu1 %3844  ;;  %v487_v29 = vpop.permute.xlu0 %486 }
  0xe6   : > { %v3847_v16 = vunpack.i.h.bf16 %v3845_v9  ;;  %v3846_v17 = vunpack.i.l.bf16 %v3845_v9  ;;  %4030 = vperm.xlu1 %4028, %v4866_v12   ;;  %v495_v50 = vrot.slane %v487_v29, %v4960_v2  ;;  %v636_v29 = vld [vmem:[#allocation9 + $0x5] ss:$8 sm:$0x3] }
  0xe8   : > { %v438_v19 = vsel %vm437_vm2, %v3846_v17, %v3847_v16  ;;  %v439_v20 = vsel %vm437_vm2, %v3847_v16, %v3846_v17  ;;  %vm1477_vm2 = vcmp.lt.s32.totalorder %v4938_v43, 15 }
  0xe9   : > { %4160 = vset.pattern.permute.xlu0 %v4639_v18  ;;  %v4971_v23 = vpop.permute.xlu1 %3850  ;;  %v453_v24 = vmul.f32 %v446_v6, %v439_v20  ;;  %v454_v25 = vmul.f32 %v450_v11, %v438_v19  ;;  %v571_v6 = vld [vmem:[#allocation9 + $0x4] ss:$8 sm:$0x3]  ;;  %v4644_v20 = vmov 31  }
  0xea   : > { %2150 = vperm.xlu0 %4160, %v4854_v3   ;;  %4036 = vrot.lane.b32.xlu1 %v4862_v10, %s4640_s30  ;;  %v552_v53 = vpop.permute.xlu0 %551  ;;  %v576_v14 = vrot.slane %v571_v6, %v4942_v47  ;;  %v580_v15 = vrot.slane %v571_v6, %v4944_v48  ;;  %s4670_s30 = smov 113  }
  0xeb   : > { %4040 = vset.pattern.permute.xlu1 %v4622_v30  ;;  %v4988_v45 = vcombine.low %v453_v24, %v454_v25  ;;  %v366_v30 = vmul.f32 %v365_v28, %v4973_v27  ;;  %v560_v1 = vrot.slane %v552_v53, %v4960_v2 }
  0xed   : > { %v3857_v51 = vpop.permute.xlu1 %3856  ;;  %v367_v56 = vadd.f32 %v366_v30, %v298_v38  ;;  %v496_v60 = vmul.f32 %v495_v50, %v4988_v45  ;;  %v6163_v38 = vmov 32   ;;  %v641_v50 = vrot.slane %v636_v29, %v4942_v47 }
  0xee   : > { %4172 = vset.pattern.permute.xlu0 %v4641_v44  ;;  %v3859_v42 = vunpack.i.h.bf16 %v3857_v51  ;;  %v3858_v52 = vunpack.i.l.bf16 %v3857_v51  ;;  %4042 = vperm.xlu1 %4040, %v4866_v12   ;;  %v645_v51 = vrot.slane %v636_v29, %v4944_v48 }
  0xef   : > { %2215 = vperm.xlu0 %4172, %v4854_v3   ;;  %v432_v7 = vadd.f32 %v431_v54, %v367_v56  ;;  %v617_v19 = vpop.permute.xlu0 %616  ;;  %v6162_v56 = vmov 33  }
  0xf0   : > { %v503_v57 = vsel %vm502_vm3, %v3858_v52, %v3859_v42  ;;  %v504_v59 = vsel %vm502_vm3, %v3859_v42, %v3858_v52  ;;  %v625_v28 = vrot.slane %v617_v19, %v4960_v2  ;;  %vm1542_vm3 = vcmp.lt.s32.totalorder %v4938_v43, 14 }
  0xf1   : > { %v5000_v61 = vpop.permute.xlu1 %3862  ;;  %v518_v62 = vmul.f32 %v511_v40, %v504_v59  ;;  %v519_v63 = vmul.f32 %v515_v41, %v503_v57  ;;  %v497_v9 = vadd.f32 %v496_v60, %v432_v7 }
  0xf2   : > { %4048 = vrot.lane.b32.xlu1 %v4862_v10, %s4643_s6  ;;  %s4673_s6 = smov 112  }
  0xf3   : > { %4184 = vset.pattern.permute.xlu0 %v4642_v5  ;;  %v5006_v8 = vcombine.low %v518_v62, %v519_v63  ;;  %4052 = vset.pattern.permute.xlu1 %v4624_v31  ;;  %v701_v63 = vld [vmem:[#allocation9 + $0x6] ss:$8 sm:$0x3] }
  0xf4   : > { %2280 = vperm.xlu0 %4184, %v4854_v3   ;;  %v682_v52 = vpop.permute.xlu0 %681 }
  0xf5   : > { %v561_v11 = vmul.f32 %v560_v1, %v5006_v8  ;;  %v3869_v13 = vpop.permute.xlu1 %3868  ;;  %v690_v62 = vrot.slane %v682_v52, %v4960_v2 }
  0xf6   : > { %v3871_v16 = vunpack.i.h.bf16 %v3869_v13  ;;  %v3870_v17 = vunpack.i.l.bf16 %v3869_v13  ;;  %4054 = vperm.xlu1 %4052, %v4866_v12   ;;  %v6161_v13 = vmov 34  }
  0xf7   : > { %v562_v21 = vadd.f32 %v561_v11, %v497_v9  ;;  %v706_v9 = vrot.slane %v701_v63, %v4942_v47  ;;  %v710_v11 = vrot.slane %v701_v63, %v4944_v48 }
  0xf8   : > { %4196 = vset.pattern.permute.xlu0 %v4644_v20  ;;  %v568_v31 = vsel %vm567_vm4, %v3870_v17, %v3871_v16  ;;  %v569_v22 = vsel %vm567_vm4, %v3871_v16, %v3870_v17  ;;  %vm1607_vm4 = vcmp.lt.s32.totalorder %v4938_v43, 13 }
  0xf9   : > { %2345 = vperm.xlu0 %4196, %v4854_v3   ;;  %v5016_v24 = vpop.permute.xlu1 %3874  ;;  %v583_v25 = vmul.f32 %v576_v14, %v569_v22  ;;  %v584_v26 = vmul.f32 %v580_v15, %v568_v31  ;;  %v747_v16 = vpop.permute.xlu0 %746 }
  0xfa   : > { %4060 = vrot.lane.b32.xlu1 %v4862_v10, %s4645_s8  ;;  %s4675_s8 = smov 111  }
  0xfb   : > { %v5020_v36 = vcombine.low %v583_v25, %v584_v26  ;;  %4064 = vset.pattern.permute.xlu1 %v4625_v32  ;;  %v755_v25 = vrot.slane %v747_v16, %v4960_v2  ;;  %v766_v26 = vld [vmem:[#allocation9 + $0x7] ss:$8 sm:$0x3] }
  0xfd   : > { %4208 = vset.pattern.permute.xlu0 %v6163_v38  ;;  %v626_v40 = vmul.f32 %v625_v28, %v5020_v36  ;;  %v3881_v41 = vpop.permute.xlu1 %3880  ;;  %v6160_v28 = vmov 35   ;;  %v3853_v38 = vunpack.i.h.bf16 %v4971_v23 }
  0xfe   : > { %2410 = vperm.xlu0 %4208, %v4854_v3   ;;  %v3883_v30 = vunpack.i.h.bf16 %v3881_v41  ;;  %v3882_v42 = vunpack.i.l.bf16 %v3881_v41  ;;  %4066 = vperm.xlu1 %4064, %v4866_v12   ;;  %v812_v52 = vpop.permute.xlu0 %811 }
  0xff   : > { %v627_v32 = vadd.f32 %v626_v40, %v562_v21  ;;  %v820_v63 = vrot.slane %v812_v52, %v4960_v2 }
 0x100   : > { %v633_v53 = vsel %vm632_vm5, %v3882_v42, %v3883_v30  ;;  %v634_v54 = vsel %vm632_vm5, %v3883_v30, %v3882_v42  ;;  %vm1672_vm5 = vcmp.lt.s32.totalorder %v4938_v43, 3 }
 0x101   : > { %v5031_v57 = vpop.permute.xlu1 %3886  ;;  %v648_v59 = vmul.f32 %v641_v50, %v634_v54  ;;  %v649_v60 = vmul.f32 %v645_v51, %v633_v53  ;;  %v771_v50 = vrot.slane %v766_v26, %v4942_v47  ;;  %v775_v51 = vrot.slane %v766_v26, %v4944_v48 }
 0x102   : > { %4220 = vset.pattern.permute.xlu0 %v6162_v56  ;;  %4072 = vrot.lane.b32.xlu1 %v4862_v10, %s4648_s9  ;;  %v6159_v53 = vmov 36   ;;  %s4676_s9 = smov 110  }
 0x103   : > { %2475 = vperm.xlu0 %4220, %v4854_v3   ;;  %v5036_v1 = vcombine.low %v648_v59, %v649_v60  ;;  %4076 = vset.pattern.permute.xlu1 %v4627_v33 }
 0x105   : > { %v691_v6 = vmul.f32 %v690_v62, %v5036_v1  ;;  %v3893_v7 = vpop.permute.xlu1 %3892 }
 0x106   : > { %v3895_v14 = vunpack.i.h.bf16 %v3893_v7  ;;  %v3894_v15 = vunpack.i.l.bf16 %v3893_v7  ;;  %4078 = vperm.xlu1 %4076, %v4866_v12  }
 0x107   : > { %4232 = vset.pattern.permute.xlu0 %v6161_v13  ;;  %v692_v33 = vadd.f32 %v691_v6, %v627_v32  ;;  %v831_v6 = vld [vmem:[#allocation9 + $0x10] ss:$8 sm:$0x3] }
 0x108   : > { %2540 = vperm.xlu0 %4232, %v4854_v3   ;;  %v698_v17 = vsel %vm697_vm6, %v3894_v15, %v3895_v14  ;;  %v699_v19 = vsel %vm697_vm6, %v3895_v14, %v3894_v15  ;;  %v836_v15 = vrot.slane %v831_v6, %v4942_v47  ;;  %v840_v16 = vrot.slane %v831_v6, %v4944_v48 }
 0x109   : > { %v5046_v21 = vpop.permute.xlu1 %3898  ;;  %v713_v31 = vmul.f32 %v706_v9, %v699_v19  ;;  %v714_v22 = vmul.f32 %v710_v11, %v698_v17  ;;  %v6158_v9 = vmov 37   ;;  %v877_v19 = vpop.permute.xlu0 %876  ;;  %v6156_v6 = vmov 39  }
 0x10a   : > { %4084 = vrot.lane.b32.xlu1 %v4862_v10, %s4650_s11  ;;  %s4677_s11 = smov 109   ;;  %vm1906_vm6 = vcmp.lt.s32.totalorder %v4938_v43, 127 }
 0x10b   : > { %v5051_v29 = vcombine.low %v713_v31, %v714_v22  ;;  %4088 = vset.pattern.permute.xlu1 %v4629_v34 }
 0x10c   : > { %4244 = vset.pattern.permute.xlu0 %v6160_v28 }
 0x10d   : > { %2605 = vperm.xlu0 %4244, %v4854_v3   ;;  %v756_v40 = vmul.f32 %v755_v25, %v5051_v29  ;;  %v3905_v41 = vpop.permute.xlu1 %3904 }
 0x10e   : > { %v3907_v30 = vunpack.i.h.bf16 %v3905_v41  ;;  %v3906_v42 = vunpack.i.l.bf16 %v3905_v41  ;;  %4090 = vperm.xlu1 %4088, %v4866_v12   ;;  %v885_v41 = vrot.slane %v877_v19, %v4960_v2 }
 0x10f   : > { %v757_v32 = vadd.f32 %v756_v40, %v692_v33 }
 0x110   : > { %v763_v34 = vsel %vm762_vm7, %v3906_v42, %v3907_v30  ;;  %v764_v54 = vsel %vm762_vm7, %v3907_v30, %v3906_v42  ;;  %v896_v30 = vld [vmem:[#allocation9 + $0x11] ss:$8 sm:$0x3]  ;;  %vm1737_vm7 = vcmp.lt.s32.totalorder %v4938_v43, 2 }
 0x111   : > { %4256 = vset.pattern.permute.xlu0 %v6159_v53  ;;  %v5062_v59 = vpop.permute.xlu1 %3910  ;;  %v778_v60 = vmul.f32 %v771_v50, %v764_v54  ;;  %v779_v62 = vmul.f32 %v775_v51, %v763_v34  ;;  %v6157_v50 = vmov 38   ;;  %v4656_v51 = vmov 24  }
 0x112   : > { %2670 = vperm.xlu0 %4256, %v4854_v3   ;;  %4096 = vrot.lane.b32.xlu1 %v4862_v10, %s4653_s29  ;;  %v901_v34 = vrot.slane %v896_v30, %v4942_v47  ;;  %v905_v54 = vrot.slane %v896_v30, %v4944_v48  ;;  %s4678_s29 = smov 99  }
 0x113   : > { %v5066_v7 = vcombine.low %v778_v60, %v779_v62  ;;  %4100 = vset.pattern.permute.xlu1 %v4630_v35 }
 0x115   : > { %v821_v11 = vmul.f32 %v820_v63, %v5066_v7  ;;  %v3917_v14 = vpop.permute.xlu1 %3916  ;;  %v942_v63 = vpop.permute.xlu0 %941 }
 0x116   : > { %4268 = vset.pattern.permute.xlu0 %v6158_v9  ;;  %v3919_v33 = vunpack.i.h.bf16 %v3917_v14  ;;  %v3918_v17 = vunpack.i.l.bf16 %v3917_v14  ;;  %4102 = vperm.xlu1 %4100, %v4866_v12   ;;  %v950_v19 = vrot.slane %v942_v63, %v4960_v2 }
 0x117   : > { %2735 = vperm.xlu0 %4268, %v4854_v3   ;;  %v822_v35 = vadd.f32 %v821_v11, %v757_v32 }
 0x118   : > { %v828_v31 = vsel %vm827_vm8, %v3918_v17, %v3919_v33  ;;  %v829_v22 = vsel %vm827_vm8, %v3919_v33, %v3918_v17  ;;  %vm1802_vm8 = vcmp.lt.s32.totalorder %v4938_v43, 1 }
 0x119   : > { %v5076_v25 = vpop.permute.xlu1 %3922  ;;  %v843_v26 = vmul.f32 %v836_v15, %v829_v22  ;;  %v844_v40 = vmul.f32 %v840_v16, %v828_v31  ;;  %v961_v31 = vld [vmem:[#allocation9 + $0x12] ss:$8 sm:$0x3] }
 0x11a   : > { %4107 = vset.pattern.permute.xlu1 %v4656_v51  ;;  %v970_v51 = vrot.slane %v961_v31, %v4944_v48 }
 0x11b   : > { %4280 = vset.pattern.permute.xlu0 %v6157_v50  ;;  %v5081_v42 = vcombine.low %v843_v26, %v844_v40  ;;  %4109 = vperm.xlu1 %4107, %v4866_v12   ;;  %v6155_v26 = vmov 40  }
 0x11c   : > { %2800 = vperm.xlu0 %4280, %v4854_v3  }
 0x11d   : > { %v886_v52 = vmul.f32 %v885_v41, %v5081_v42  ;;  %v3929_v32 = vpop.permute.xlu1 %3928  ;;  %v966_v41 = vrot.slane %v961_v31, %v4942_v47 }
 0x11e   : > { %v3931_v60 = vunpack.i.h.bf16 %v3929_v32  ;;  %v3930_v62 = vunpack.i.l.bf16 %v3929_v32  ;;  %v1007_v32 = vpop.permute.xlu0 %1006 }
 0x11f   : > { %v887_v11 = vadd.f32 %v886_v52, %v822_v35  ;;  %1890 = vperm.xlu1 %4107, %v4854_v3  }
 0x120   : > { %4292 = vset.pattern.permute.xlu0 %v6156_v6  ;;  %v893_v14 = vsel %vm892_vm9, %v3930_v62, %v3931_v60  ;;  %v894_v15 = vsel %vm892_vm9, %v3931_v60, %v3930_v62  ;;  %v5168_v6 = vld [vmem:[#allocation9 + $0x20] ss:$8 sm:$0x3]  ;;  %vm1971_vm9 = vcmp.lt.s32.totalorder %v4938_v43, 126 }
 0x121   : > { %2865 = vperm.xlu0 %4292, %v4854_v3   ;;  %v5091_v16 = vpop.permute.xlu1 %3934  ;;  %v908_v33 = vmul.f32 %v901_v34, %v894_v15  ;;  %v909_v17 = vmul.f32 %v905_v54, %v893_v14  ;;  %v1015_v14 = vrot.slane %v1007_v32, %v4960_v2  ;;  %v4660_v15 = vmov 42  }
 0x123   : > { %v5094_v22 = vcombine.low %v908_v33, %v909_v17  ;;  %4118 = vset.pattern.permute.xlu1 %v4633_v39  ;;  %v1026_v33 = vld [vmem:[#allocation9 + $0x13] ss:$8 sm:$0x3] }
 0x124   : > { %4120 = vperm.xlu1 %4118, %v4866_v12   ;;  %v1031_v31 = vrot.slane %v1026_v33, %v4942_v47 }
 0x125   : > { %4304 = vset.pattern.permute.xlu0 %v6155_v26  ;;  %v951_v35 = vmul.f32 %v950_v19, %v5094_v22  ;;  %v3941_v40 = vpop.permute.xlu1 %3940 }
 0x126   : > { %2930 = vperm.xlu0 %4304, %v4854_v3   ;;  %v3943_v30 = vunpack.i.h.bf16 %v3941_v40  ;;  %v3942_v52 = vunpack.i.l.bf16 %v3941_v40 }
 0x127   : > { %v952_v39 = vadd.f32 %v951_v35, %v887_v11  ;;  %v1035_v35 = vrot.slane %v1026_v33, %v4944_v48 }
 0x128   : > { %v958_v34 = vsel %vm957_vm10, %v3942_v52, %v3943_v30  ;;  %v959_v54 = vsel %vm957_vm10, %v3943_v30, %v3942_v52  ;;  %4126 = vrot.lane.b32.xlu1 %v4862_v10, %s4659_s12  ;;  %s4679_s12 = smov 98   ;;  %vm2036_vm10 = vcmp.lt.s32.totalorder %v4938_v43, 125 }
 0x129   : > { %v5105_v60 = vpop.permute.xlu1 %3946  ;;  %v973_v62 = vmul.f32 %v966_v41, %v959_v54  ;;  %v974_v63 = vmul.f32 %v970_v51, %v958_v34  ;;  %4130 = vset.pattern.permute.xlu1 %v4636_v49  ;;  %v1072_v41 = vpop.permute.xlu0 %1071 }
 0x12a   : > { %4316 = vset.pattern.permute.xlu0 %v4660_v15 }
 0x12b   : > { %4318 = vperm.xlu0 %4316, %v4866_v12   ;;  %v5110_v17 = vcombine.low %v973_v62, %v974_v63  ;;  %v1080_v62 = vrot.slane %v1072_v41, %v4960_v2  ;;  %v1091_v63 = vld [vmem:[#allocation9 + $0x14] ss:$8 sm:$0x3] }
 0x12c   : > { %4132 = vperm.xlu1 %4130, %v4866_v12   ;;  %v1096_v33 = vrot.slane %v1091_v63, %v4942_v47 }
 0x12d   : > { %v1016_v11 = vmul.f32 %v1015_v14, %v5110_v17  ;;  %v3953_v19 = vpop.permute.xlu1 %3952 }
 0x12e   : > { %v3955_v40 = vunpack.i.h.bf16 %v3953_v19  ;;  %v3954_v49 = vunpack.i.l.bf16 %v3953_v19 }
 0x12f   : > { %4334 = vrot.lane.b32.xlu0 %v4862_v10, %s4661_s13  ;;  %v1017_v51 = vadd.f32 %v1016_v11, %v952_v39  ;;  %v1100_v11 = vrot.slane %v1091_v63, %v4944_v48  ;;  %s4680_s13 = smov 97  }
 0x130   : > { %v1023_v30 = vsel %vm1022_vm11, %v3954_v49, %v3955_v40  ;;  %v1024_v52 = vsel %vm1022_vm11, %v3955_v40, %v3954_v49  ;;  %4138 = vrot.lane.b32.xlu1 %v4862_v10, %s4662_s14  ;;  %s4681_s14 = smov 96   ;;  %vm2101_vm11 = vcmp.lt.s32.totalorder %v4938_v43, 115 }
 0x131   : > { %v5119_v32 = vpop.permute.xlu1 %3958  ;;  %v1038_v34 = vmul.f32 %v1031_v31, %v1024_v52  ;;  %v1039_v54 = vmul.f32 %v1035_v35, %v1023_v30  ;;  %4142 = vset.pattern.permute.xlu1 %v4638_v0  ;;  %v1137_v0 = vpop.permute.xlu0 %1136 }
 0x133   : > { %4345 = vrot.lane.b32.xlu0 %v4862_v10, %s4663_s15  ;;  %v5124_v14 = vcombine.low %v1038_v34, %v1039_v54  ;;  %v1145_v34 = vrot.slane %v1137_v0, %v4960_v2  ;;  %v1156_v54 = vld [vmem:[#allocation9 + $0x15] ss:$8 sm:$0x3]  ;;  %v3836_v0 = vunpack.i.h.bf16 %v4940_v46  ;;  %s4682_s15 = smov 95  }
 0x134   : > { %4144 = vperm.xlu1 %4142, %v4866_v12   ;;  %v1165_v63 = vrot.slane %v1156_v54, %v4944_v48 }
 0x135   : > { %v1081_v39 = vmul.f32 %v1080_v62, %v5124_v14  ;;  %v3965_v15 = vpop.permute.xlu1 %3964 }
 0x136   : > { %v3967_v19 = vunpack.i.h.bf16 %v3965_v15  ;;  %v3966_v31 = vunpack.i.l.bf16 %v3965_v15 }
 0x137   : > { %4356 = vrot.lane.b32.xlu0 %v4862_v10, %s4664_s26  ;;  %v1082_v35 = vadd.f32 %v1081_v39, %v1017_v51  ;;  %v1161_v51 = vrot.slane %v1156_v54, %v4942_v47  ;;  %v5144_v39 = vld [vmem:[#allocation9 + $0x16] ss:$8 sm:$0x3]  ;;  %s4683_s26 = smov 94  }
 0x138   : > { %v1088_v40 = vsel %vm1087_vm12, %v3966_v31, %v3967_v19  ;;  %v1089_v49 = vsel %vm1087_vm12, %v3967_v19, %v3966_v31  ;;  %4150 = vrot.lane.b32.xlu1 %v4862_v10, %s4665_s27  ;;  %v1202_v31 = vpop.permute.xlu0 %1201  ;;  %s4684_s27 = smov 93   ;;  %vm2166_vm12 = vcmp.lt.s32.totalorder %v4938_v43, 114 }
 0x139   : > { %v5133_v41 = vpop.permute.xlu1 %3970  ;;  %v1103_v30 = vmul.f32 %v1096_v33, %v1089_v49  ;;  %v1104_v52 = vmul.f32 %v1100_v11, %v1088_v40  ;;  %4154 = vset.pattern.permute.xlu1 %v4639_v18  ;;  %v3835_v18 = vunpack.i.l.bf16 %v4940_v46  ;;  %v1226_v49 = vrot.slane %v5144_v39, %v4942_v47 }
 0x13a   : > { %v3828_v46 = vunpack.i.l.bf16 %v4950_v55 }
 0x13b   : > { %4367 = vrot.lane.b32.xlu0 %v4862_v10, %s4666_s25  ;;  %v5138_v62 = vcombine.low %v1103_v30, %v1104_v52  ;;  %v1230_v30 = vrot.slane %v5144_v39, %v4944_v48  ;;  %v5155_v52 = vld [vmem:[#allocation9 + $0x17] ss:$8 sm:$0x3]  ;;  %v1210_v39 = vrot.slane %v1202_v31, %v4960_v2  ;;  %v335_v50 = vrot.slane %v3835_v18, %v4960_v2  ;;  %v5212_v31 = vld [vmem:[#allocation9 + $0x22] ss:$8 sm:$0x3] }
 0x13c   : > { %4156 = vperm.xlu1 %4154, %v4866_v12   ;;  %v1356_v18 = vrot.slane %v5168_v6, %v4942_v47  ;;  %v1267_v53 = vpop.permute.xlu0 %1266  ;;  %s4686_s25 = smov 83  }
 0x13d   : > { %v1146_v15 = vmul.f32 %v1145_v34, %v5138_v62  ;;  %v3977_v33 = vpop.permute.xlu1 %3976  ;;  %v3829_v34 = vunpack.i.h.bf16 %v4950_v55  ;;  %v352_v55 = vrot.slane %v3836_v0, %v4960_v2 }
 0x13e   : > { %v3979_v11 = vunpack.i.h.bf16 %v3977_v33  ;;  %v3978_v19 = vunpack.i.l.bf16 %v3977_v33 }
 0x13f   : > { %4378 = vrot.lane.b32.xlu0 %v4862_v10, %s4667_s16  ;;  %v1147_v40 = vadd.f32 %v1146_v15, %v1082_v35  ;;  %v353_v28 = vmul.f32 %v352_v55, %v4973_v27  ;;  %s3615_s16 = sshll.u32 %s4841_s7, 3 }
 0x140   : > { %v1153_v54 = vsel %vm1152_vm13, %v3978_v19, %v3979_v11  ;;  %v1154_v33 = vsel %vm1152_vm13, %v3979_v11, %v3978_v19  ;;  %4162 = vrot.lane.b32.xlu1 %v4862_v10, %s4668_s17  ;;  %v1291_v11 = vrot.slane %v5155_v52, %v4942_v47  ;;  %v1295_v19 = vrot.slane %v5155_v52, %v4944_v48  ;;  %s3625_s17 = sshll.u32 %s4573_s21, 7 }
 0x141   : > { %v5164_v35 = vpop.permute.xlu1 %3982  ;;  %v1168_v15 = vmul.f32 %v1161_v51, %v1154_v33  ;;  %v1169_v26 = vmul.f32 %v1165_v63, %v1153_v54  ;;  %4166 = vset.pattern.permute.xlu1 %v4641_v44  ;;  %v3841_v51 = vunpack.i.l.bf16 %v4954_v58  ;;  %v3842_v44 = vunpack.i.h.bf16 %v4954_v58 }
 0x142   : > { %v286_v54 = vrot.slane %v3829_v34, %v4960_v2  ;;  %v274_v33 = vrot.slane %v3828_v46, %v4960_v2  ;;  %v3852_v34 = vunpack.i.l.bf16 %v4971_v23  ;;  %v5195_v46 = vld [vmem:[#allocation9 + $0x21] ss:$8 sm:$0x3]  ;;  %v3888_v52 = vunpack.i.l.bf16 %v5031_v57 }
 0x143   : > { %4389 = vrot.lane.b32.xlu0 %v4862_v10, %s4669_s0  ;;  %v5178_v63 = vcombine.low %v1168_v15, %v1169_v26  ;;  %v340_v26 = vmul.f32 %v4973_v27, %v335_v50  ;;  %v400_v13 = vrot.slane %v3841_v51, %v4960_v2  ;;  %v1421_v23 = vrot.slane %v5195_v46, %v4942_v47  ;;  %s245_s0 = scalar_lea.vmem [#allocation10], %s3615_s16 }
 0x144   : > { %4168 = vperm.xlu1 %4166, %v4866_v12   ;;  %vm2231_vm13 = vcmp.lt.s32.totalorder %v4938_v43, 113 }
 0x145   : > { %v1211_v0 = vmul.f32 %v1210_v39, %v5178_v63  ;;  %v3989_v9 = vpop.permute.xlu1 %3988  ;;  %v417_v39 = vrot.slane %v3842_v44, %v4960_v2  ;;  %v341_v44 = vadd.f32 %v340_v26, %v274_v33  ;;  %v482_v33 = vrot.slane %v3853_v38, %v4960_v2  ;;  %v1332_v38 = vpop.permute.xlu0 %1331 }
 0x146   : > { %v3991_v58 = vunpack.i.h.bf16 %v3989_v9  ;;  %v3990_v15 = vunpack.i.l.bf16 %v3989_v9  ;;  %v3864_v26 = vunpack.i.l.bf16 %v5000_v61 }
 0x147   : > { %3060 = vperm.xlu0 %4316, %v4854_v3   ;;  %v1212_v56 = vadd.f32 %v1211_v0, %v1147_v40  ;;  %v1275_v40 = vrot.slane %v1267_v53, %v4960_v2  ;;  %v6167_v0 = vmov 47  }
 0x148   : > { %v1218_v50 = vsel %vm1217_vm14, %v3990_v15, %v3991_v58  ;;  %v1219_v9 = vsel %vm1217_vm14, %v3991_v58, %v3990_v15  ;;  %4174 = vrot.lane.b32.xlu1 %v4862_v10, %s4670_s30  ;;  %v6164_v58 = vmov 44   ;;  %v354_v15 = vadd.f32 %v353_v28, %v286_v54  ;;  %s3493_s30 = sshll.u32 %s245_s0, 4  ;;  %s3494_s30 = int_to_ptr.vmem [resolvable:$true] %s3493_s30 }
 0x149   : > { %v5204_v27 = vpop.permute.xlu1 %3994  ;;  %v1233_v55 = vmul.f32 %v1226_v49, %v1219_v9  ;;  %v1234_v51 = vmul.f32 %v1230_v30, %v1218_v50  ;;  %4178 = vset.pattern.permute.xlu1 %v4642_v5  ;;  %v405_v49 = vmul.f32 %v4986_v37, %v400_v13  ;;  %v465_v30 = vrot.slane %v3852_v34, %v4960_v2 }
 0x14a   : > { %v418_v5 = vmul.f32 %v417_v39, %v4986_v37  ;;  %v3865_v50 = vunpack.i.h.bf16 %v5000_v61  ;;  %v3876_v9 = vunpack.i.l.bf16 %v5016_v24  ;;  %v530_v13 = vrot.slane %v3864_v26, %v4960_v2  ;;  %v5255_v26 = vld [vmem:[#allocation9 + $0x23] ss:$8 sm:$0x3] }
 0x14b   : > { %4395 = vset.pattern.permute.xlu0 %v6164_v58  ;;  %v5217_v53 = vcombine.low %v1233_v55, %v1234_v51  ;;  %v406_v55 = vadd.f32 %v405_v49, %v341_v44  ;;  %v470_v51 = vmul.f32 %v4988_v45, %v465_v30  ;;  %v3877_v58 = vunpack.i.h.bf16 %v5016_v24 }
 0x14c   : > { %3190 = vperm.xlu0 %4395, %v4854_v3   ;;  %4180 = vperm.xlu1 %4178, %v4866_v12   ;;  %v419_v49 = vadd.f32 %v418_v5, %v354_v15  ;;  %v547_v30 = vrot.slane %v3865_v50, %v4960_v2  ;;  %v535_v15 = vmul.f32 %v5006_v8, %v530_v13  ;;  %vm2296_vm14 = vcmp.lt.s32.totalorder %v4938_v43, 112 }
 0x14d   : > { %v1276_v28 = vmul.f32 %v1275_v40, %v5217_v53  ;;  %v4001_v54 = vpop.permute.xlu1 %4000  ;;  %v483_v40 = vmul.f32 %v482_v33, %v4988_v45  ;;  %v595_v33 = vrot.slane %v3876_v9, %v4960_v2  ;;  %v1551_v9 = vrot.slane %v5255_v26, %v4942_v47 }
 0x14e   : > { %v4003_v37 = vunpack.i.h.bf16 %v4001_v54  ;;  %v4002_v39 = vunpack.i.l.bf16 %v4001_v54 }
 0x14f   : > { %v1277_v61 = vadd.f32 %v1276_v28, %v1212_v56  ;;  %v1340_v56 = vrot.slane %v1332_v38, %v4960_v2  ;;  %v612_v28 = vrot.slane %v3877_v58, %v4960_v2  ;;  %v1555_v58 = vrot.slane %v5255_v26, %v4944_v48 }
 0x150   : > { %4398 = vset.pattern.permute.xlu0 %v6167_v0  ;;  %v1283_v34 = vsel %vm1282_vm15, %v4002_v39, %v4003_v37  ;;  %v1284_v54 = vsel %vm1282_vm15, %v4003_v37, %v4002_v39  ;;  %4186 = vrot.lane.b32.xlu1 %v4862_v10, %s4673_s6  ;;  %v6165_v37 = vmov 48   ;;  %v600_v39 = vmul.f32 %v5020_v36, %v595_v33 }
 0x151   : > { %v5241_v44 = vpop.permute.xlu1 %4006  ;;  %v1298_v24 = vmul.f32 %v1291_v11, %v1284_v54  ;;  %v1299_v45 = vmul.f32 %v1295_v19, %v1283_v34  ;;  %4190 = vset.pattern.permute.xlu1 %v4644_v20  ;;  %3385 = vperm.xlu0 %4398, %v4854_v3   ;;  %v471_v11 = vadd.f32 %v470_v51, %v406_v55  ;;  %v3889_v20 = vunpack.i.h.bf16 %v5031_v57  ;;  %v1397_v55 = vpop.permute.xlu0 %1396 }
 0x152   : > { %v484_v34 = vadd.f32 %v483_v40, %v419_v49  ;;  %v548_v57 = vmul.f32 %v547_v30, %v5006_v8  ;;  %v613_v51 = vmul.f32 %v612_v28, %v5020_v36  ;;  %v660_v40 = vrot.slane %v3888_v52, %v4960_v2 }
 0x153   : > { %v5259_v19 = vcombine.low %v1298_v24, %v1299_v45  ;;  %v3900_v54 = vunpack.i.l.bf16 %v5046_v21  ;;  %v5276_v45 = vld [vmem:[#allocation9 + $0x24] ss:$8 sm:$0x3]  ;;  %v3901_v49 = vunpack.i.h.bf16 %v5046_v21  ;;  %v3912_v36 = vunpack.i.l.bf16 %v5062_v59 }
 0x154   : > { %4192 = vperm.xlu1 %4190, %v4866_v12   ;;  %v6178_v21 = vrot.slane %v5168_v6, %v4944_v48  ;;  %v1405_v52 = vrot.slane %v1397_v55, %v4960_v2  ;;  %v3913_v6 = vunpack.i.h.bf16 %v5062_v59  ;;  %v3924_v59 = vunpack.i.l.bf16 %v5076_v25 }
 0x155   : > { %v1341_v5 = vmul.f32 %v1340_v56, %v5259_v19  ;;  %v4013_v50 = vpop.permute.xlu1 %4012  ;;  %4400 = vset.pattern.permute.xlu0 %v6165_v37  ;;  %v677_v56 = vrot.slane %v3889_v20, %v4960_v2  ;;  %v6179_v20 = vmov 32   ;;  %v725_v37 = vrot.slane %v3900_v54, %v4960_v2  ;;  %v1462_v54 = vpop.permute.xlu0 %1461 }
 0x156   : > { %v4015_v38 = vunpack.i.h.bf16 %v4013_v50  ;;  %v4014_v13 = vunpack.i.l.bf16 %v4013_v50  ;;  %v1616_v50 = vrot.slane %v5276_v45, %v4942_v47  ;;  %vm2361_vm15 = vcmp.lt.s32.totalorder %v4938_v43, 111 }
 0x157   : > { %v1342_v24 = vadd.f32 %v1341_v5, %v1277_v61  ;;  %v536_v5 = vadd.f32 %v535_v15, %v471_v11  ;;  %v1620_v11 = vrot.slane %v5276_v45, %v4944_v48  ;;  %v678_v55 = vmul.f32 %v677_v56, %v5036_v1 }
 0x158   : > { %v1348_v8 = vsel %vm1347_vm0, %v4014_v13, %v4015_v38  ;;  %v1349_v30 = vsel %vm1347_vm0, %v4015_v38, %v4014_v13  ;;  %4198 = vrot.lane.b32.xlu1 %v4862_v10, %s4675_s8  ;;  %v549_v38 = vadd.f32 %v548_v57, %v484_v34  ;;  %v665_v13 = vmul.f32 %v5036_v1, %v660_v40 }
 0x159   : > { %v5286_v33 = vpop.permute.xlu1 %4018  ;;  %v1363_v61 = vmul.f32 %v1356_v18, %v1349_v30  ;;  %v1364_v28 = vmul.f32 %v6178_v21, %v1348_v8  ;;  %4202 = vset.pattern.permute.xlu1 %v6179_v20  ;;  %v601_v18 = vadd.f32 %v600_v39, %v536_v5  ;;  %v742_v30 = vrot.slane %v3901_v49, %v4960_v2 }
 0x15a   : > { %v614_v15 = vadd.f32 %v613_v51, %v549_v38  ;;  %v790_v34 = vrot.slane %v3912_v36, %v4960_v2  ;;  %v3925_v39 = vunpack.i.h.bf16 %v5076_v25  ;;  %v730_v21 = vmul.f32 %v5051_v29, %v725_v37 }
 0x15b   : > { %v5300_v0 = vcombine.low %v1363_v61, %v1364_v28  ;;  %v666_v61 = vadd.f32 %v665_v13, %v601_v18  ;;  %v3936_v51 = vunpack.i.l.bf16 %v5091_v16  ;;  %v743_v56 = vmul.f32 %v742_v30, %v5051_v29  ;;  %v1527_v13 = vpop.permute.xlu0 %1526  ;;  %v5333_v18 = vld [vmem:[#allocation9 + $0x25] ss:$8 sm:$0x3] }
 0x15c   : > { %4204 = vperm.xlu1 %4202, %v4866_v12   ;;  %v807_v36 = vrot.slane %v3913_v6, %v4960_v2  ;;  %v795_v25 = vmul.f32 %v5066_v7, %v790_v34  ;;  %v6180_v29 = vrot.slane %v5195_v46, %v4944_v48  ;;  %v1470_v5 = vrot.slane %v1462_v54, %v4960_v2 }
 0x15d   : > { %v1406_v57 = vmul.f32 %v1405_v52, %v5300_v0  ;;  %v4025_v40 = vpop.permute.xlu1 %4024  ;;  %v6181_v38 = vmov 33   ;;  %v679_v30 = vadd.f32 %v678_v55, %v614_v15  ;;  %v872_v6 = vrot.slane %v3925_v39, %v4960_v2 }
 0x15e   : > { %v4027_v49 = vunpack.i.h.bf16 %v4025_v40  ;;  %v4026_v8 = vunpack.i.l.bf16 %v4025_v40  ;;  %v855_v34 = vrot.slane %v3924_v59, %v4960_v2  ;;  %v3937_v40 = vunpack.i.h.bf16 %v5091_v16 }
 0x15f   : > { %v1407_v1 = vadd.f32 %v1406_v57, %v1342_v24  ;;  %v731_v57 = vadd.f32 %v730_v21, %v666_v61  ;;  %v3948_v46 = vunpack.i.l.bf16 %v5105_v60  ;;  %v1681_v54 = vrot.slane %v5333_v18, %v4942_v47  ;;  %v5350_v61 = vpop.permute.xlu0 %1591 }
 0x160   : > { %v1413_v28 = vsel %vm1412_vm1, %v4026_v8, %v4027_v49  ;;  %v1414_v52 = vsel %vm1412_vm1, %v4027_v49, %v4026_v8  ;;  %4210 = vrot.lane.b32.xlu1 %v4862_v10, %s4676_s9  ;;  %v1685_v15 = vrot.slane %v5333_v18, %v4944_v48  ;;  %v744_v55 = vadd.f32 %v743_v56, %v679_v30  ;;  %s3491_s9 = scalar_lea.hbm %s6151_s4, %s3625_s17 }
 0x161   : > { %v5323_v20 = vpop.permute.xlu1 %4030  ;;  %v1428_v37 = vmul.f32 %v1421_v23, %v1414_v52  ;;  %v1429_v24 = vmul.f32 %v6180_v29, %v1413_v28  ;;  %4214 = vset.pattern.permute.xlu1 %v6181_v38  ;;  %v920_v23 = vrot.slane %v3936_v51, %v4960_v2  ;;  %v796_v39 = vadd.f32 %v795_v25, %v731_v57 }
 0x162   : > { %v808_v59 = vmul.f32 %v807_v36, %v5066_v7  ;;  %v860_v21 = vmul.f32 %v5081_v42, %v855_v34  ;;  %v873_v51 = vmul.f32 %v872_v6, %v5081_v42  ;;  %v3949_v25 = vunpack.i.h.bf16 %v5105_v60  ;;  %v5357_v36 = vld [vmem:[#allocation9 + $0x26] ss:$8 sm:$0x3] }
 0x163   : > { %v5339_v49 = vcombine.low %v1428_v37, %v1429_v24  ;;  %v937_v37 = vrot.slane %v3937_v40, %v4960_v2  ;;  %v925_v56 = vmul.f32 %v5094_v22, %v920_v23  ;;  %v985_v29 = vrot.slane %v3948_v46, %v4960_v2  ;;  %v5377_v23 = vpop.permute.xlu0 %1656 }
 0x164   : > { %4216 = vperm.xlu1 %4214, %v4866_v12   ;;  %v3960_v24 = vunpack.i.l.bf16 %v5119_v32  ;;  %v3961_v38 = vunpack.i.h.bf16 %v5119_v32  ;;  %v6182_v60 = vrot.slane %v5212_v31, %v4942_v47  ;;  %v6183_v6 = vrot.slane %v5212_v31, %v4944_v48 }
 0x165   : > { %v1471_v16 = vmul.f32 %v1470_v5, %v5339_v49  ;;  %v4037_v8 = vpop.permute.xlu1 %4036  ;;  %v1535_v57 = vrot.slane %v1527_v13, %v4960_v2  ;;  %v6184_v40 = vmov 34   ;;  %v809_v46 = vadd.f32 %v808_v59, %v744_v55 }
 0x166   : > { %v4039_v28 = vunpack.i.h.bf16 %v4037_v8  ;;  %v4038_v52 = vunpack.i.l.bf16 %v4037_v8  ;;  %v1746_v32 = vrot.slane %v5357_v36, %v4942_v47  ;;  %v938_v8 = vmul.f32 %v937_v37, %v5094_v22 }
 0x167   : > { %v1472_v7 = vadd.f32 %v1471_v16, %v1407_v1  ;;  %v861_v16 = vadd.f32 %v860_v21, %v796_v39  ;;  %v1050_v31 = vrot.slane %v3960_v24, %v4960_v2  ;;  %v1750_v13 = vrot.slane %v5357_v36, %v4944_v48  ;;  %v5393_v21 = vpop.permute.xlu0 %1721 }
 0x168   : > { %v1478_v5 = vsel %vm1477_vm2, %v4038_v52, %v4039_v28  ;;  %v1479_v42 = vsel %vm1477_vm2, %v4039_v28, %v4038_v52  ;;  %4222 = vrot.lane.b32.xlu1 %v4862_v10, %s4677_s11  ;;  %v1002_v28 = vrot.slane %v3949_v25, %v4960_v2  ;;  %v990_v55 = vmul.f32 %v5110_v17, %v985_v29  ;;  %s3477_s11 = scalar_lea.sflag [#allocation6], %s4841_s7 }
 0x169   : > { %v5367_v30 = vpop.permute.xlu1 %4042  ;;  %v1493_v1 = vmul.f32 %v6182_v60, %v1479_v42  ;;  %v1494_v34 = vmul.f32 %v6183_v6, %v1478_v5  ;;  %4226 = vset.pattern.permute.xlu1 %v6184_v40  ;;  %v874_v42 = vadd.f32 %v873_v51, %v809_v46  ;;  %v926_v5 = vadd.f32 %v925_v56, %v861_v16 }
 0x16a   : > { %v1067_v59 = vrot.slane %v3961_v38, %v4960_v2  ;;  %v3973_v51 = vunpack.i.h.bf16 %v5133_v41  ;;  %v3972_v37 = vunpack.i.l.bf16 %v5133_v41  ;;  %v1003_v56 = vmul.f32 %v1002_v28, %v5110_v17  ;;  %v5399_v38 = vld [vmem:[#allocation9 + $0x27] ss:$8 sm:$0x3] }
 0x16b   : > { %v5383_v52 = vcombine.low %v1493_v1, %v1494_v34  ;;  %v939_v60 = vadd.f32 %v938_v8, %v874_v42  ;;  %v3984_v29 = vunpack.i.l.bf16 %v5164_v35  ;;  %v1055_v6 = vmul.f32 %v5124_v14, %v1050_v31  ;;  %v5420_v8 = vpop.permute.xlu0 %1786 }
 0x16c   : > { %4228 = vperm.xlu1 %4226, %v4866_v12   ;;  %v3985_v34 = vunpack.i.h.bf16 %v5164_v35  ;;  %v1068_v17 = vmul.f32 %v1067_v59, %v5124_v14  ;;  %v1600_v46 = vrot.slane %v5350_v61, %v4960_v2  ;;  %v6185_v16 = vmov 35  }
 0x16d   : > { %v1536_v39 = vmul.f32 %v1535_v57, %v5383_v52  ;;  %v4049_v22 = vpop.permute.xlu1 %4048  ;;  %v991_v28 = vadd.f32 %v990_v55, %v926_v5  ;;  %v1132_v14 = vrot.slane %v3973_v51, %v4960_v2  ;;  %v1115_v42 = vrot.slane %v3972_v37, %v4960_v2 }
 0x16e   : > { %v4051_v25 = vunpack.i.h.bf16 %v4049_v22  ;;  %v4050_v24 = vunpack.i.l.bf16 %v4049_v22  ;;  %v1811_v31 = vrot.slane %v5399_v38, %v4942_v47  ;;  %v1180_v59 = vrot.slane %v3984_v29, %v4960_v2 }
 0x16f   : > { %v1537_v1 = vadd.f32 %v1536_v39, %v1472_v7  ;;  %v1056_v61 = vadd.f32 %v1055_v6, %v991_v28  ;;  %v1197_v39 = vrot.slane %v3985_v34, %v4960_v2  ;;  %v3997_v55 = vunpack.i.h.bf16 %v5204_v27 }
 0x170   : > { %v1543_v57 = vsel %vm1542_vm3, %v4050_v24, %v4051_v25  ;;  %v1544_v41 = vsel %vm1542_vm3, %v4051_v25, %v4050_v24  ;;  %4234 = vrot.lane.b32.xlu1 %v4862_v10, %s4678_s29  ;;  %v3996_v22 = vunpack.i.l.bf16 %v5204_v27  ;;  %v5437_v25 = vpop.permute.xlu0 %1851  ;;  %v1120_v24 = vmul.f32 %v5138_v62, %v1115_v42  ;;  %s4495_s29 = scalar_lea.vmem %s3494_s30, 128 }
 0x171   : > { %v5409_v40 = vpop.permute.xlu1 %4054  ;;  %v1558_v7 = vmul.f32 %v1551_v9, %v1544_v41  ;;  %v1559_v35 = vmul.f32 %v1555_v58, %v1543_v57  ;;  %4238 = vset.pattern.permute.xlu1 %v6185_v16  ;;  %v1004_v9 = vadd.f32 %v1003_v56, %v939_v60  ;;  %v1815_v58 = vrot.slane %v5399_v38, %v4944_v48  ;;  %p4496_p8 = scmp.ne.s32.totalorder %s3494_s30, %s4495_s29 }
 0x172   : > { %v1133_v60 = vmul.f32 %v1132_v14, %v5138_v62  ;;  %v1185_v6 = vmul.f32 %v5178_v63, %v1180_v59  ;;  %v4008_v34 = vunpack.i.l.bf16 %v5241_v44  ;;  %v1665_v27 = vrot.slane %v5377_v23, %v4960_v2 }
 0x173   : > { %v5427_v26 = vcombine.low %v1558_v7, %v1559_v35  ;;  %v1069_v5 = vadd.f32 %v1068_v17, %v1004_v9  ;;  %v1198_v41 = vmul.f32 %v1197_v39, %v5178_v63  ;;  %v4009_v17 = vunpack.i.h.bf16 %v5241_v44  ;;  %v5452_v35 = vld [vmem:[#allocation9 + $0x31] ss:$8 sm:$0x3]  ;;  %p4497_p9 = pnand %p4496_p8, %p4814_p7 }
 0x174   : > { %4240 = vperm.xlu1 %4238, %v4866_v12   ;;  %v6186_v16 = vmov 36   ;;  %v1121_v28 = vadd.f32 %v1120_v24, %v1056_v61  ;;  %v1310_v42 = vrot.slane %v4008_v34, %v4960_v2  ;;  %v4020_v9 = vunpack.i.l.bf16 %v5286_v33 }
 0x175   : > { %v1601_v51 = vmul.f32 %v1600_v46, %v5427_v26  ;;  %v4061_v37 = vpop.permute.xlu1 %4060  ;;  %v1245_v46 = vrot.slane %v3996_v22, %v4960_v2  ;;  %v1134_v14 = vadd.f32 %v1133_v60, %v1069_v5  ;;  %v1915_v39 = vrot.slane %v5452_v35, %v4942_v47  ;;  %p4498_p11 = pneg %p4497_p9 }
 0x176   : > { %v4063_v56 = vunpack.i.h.bf16 %v4061_v37  ;;  %v4062_v29 = vunpack.i.l.bf16 %v4061_v37  ;;  %v1730_v61 = vrot.slane %v5393_v21, %v4960_v2  ;;  %v4032_v60 = vunpack.i.l.bf16 %v5323_v20 }
 0x177   : > { %v1602_v57 = vadd.f32 %v1601_v51, %v1537_v1  ;;  %v1262_v1 = vrot.slane %v3997_v55, %v4960_v2  ;;  %v1186_v55 = vadd.f32 %v1185_v6, %v1121_v28  ;;  %v1199_v45 = vadd.f32 %v1198_v41, %v1134_v14 }
 0x178   : > { %v1608_v7 = vsel %vm1607_vm4, %v4062_v29, %v4063_v56  ;;  %v1609_v62 = vsel %vm1607_vm4, %v4063_v56, %v4062_v29  ;;  %4246 = vrot.lane.b32.xlu1 %v4862_v10, %s4679_s12  ;;  %v1250_v5 = vmul.f32 %v5217_v53, %v1245_v46  ;;  %v4021_v51 = vunpack.i.h.bf16 %v5286_v33  ;;  %s4690_s12 = smov [#allocation10]  }
 0x179   : > { %v5456_v23 = vpop.permute.xlu1 %4066  ;;  %v1623_v63 = vmul.f32 %v1616_v50, %v1609_v62  ;;  %v1624_v44 = vmul.f32 %v1620_v11, %v1608_v7  ;;  %4250 = vset.pattern.permute.xlu1 %v6186_v16  ;;  %v5472_v50 = vpop.permute.xlu0 %4114  ;;  %v1327_v11 = vrot.slane %v4009_v17, %v4960_v2  ;;  %v1263_v22 = vmul.f32 %v1262_v1, %v5217_v53 }
 0x17a   : > { %v4117_v6 = vunpack.i.h.bf16 %v5472_v50  ;;  %v1315_v34 = vmul.f32 %v5259_v19, %v1310_v42  ;;  %v1375_v21 = vrot.slane %v4020_v9, %v4960_v2  ;;  %v4116_v53 = vunpack.i.l.bf16 %v5472_v50 }
 0x17b   : > { %v5468_v59 = vcombine.low %v1623_v63, %v1624_v44  ;;  %v1328_v33 = vmul.f32 %v1327_v11, %v5259_v19  ;;  %v1392_v62 = vrot.slane %v4021_v51, %v4960_v2  ;;  %v4044_v1 = vunpack.i.l.bf16 %v5367_v30 }
 0x17c   : > { %4252 = vperm.xlu1 %4250, %v4866_v12   ;;  %v6187_v46 = vmov 37   ;;  %v1251_v63 = vadd.f32 %v1250_v5, %v1186_v55  ;;  %v1440_v44 = vrot.slane %v4032_v60, %v4960_v2  ;;  %v1795_v16 = vrot.slane %v5420_v8, %v4960_v2 }
 0x17d   : > { %v1666_v37 = vmul.f32 %v1665_v27, %v5468_v59  ;;  %v4073_v24 = vpop.permute.xlu1 %4072  ;;  %v4033_v27 = vunpack.i.h.bf16 %v5323_v20  ;;  %v1919_v28 = vrot.slane %v5452_v35, %v4944_v48  ;;  %v1264_v14 = vadd.f32 %v1263_v22, %v1199_v45 }
 0x17e   : > { %v4075_v56 = vunpack.i.h.bf16 %v4073_v24  ;;  %v4074_v29 = vunpack.i.l.bf16 %v4073_v24  ;;  %v1380_v42 = vmul.f32 %v5300_v0, %v1375_v21  ;;  %v1316_v18 = vadd.f32 %v1315_v34, %v1251_v63 }
 0x17f   : > { %v1667_v41 = vadd.f32 %v1666_v37, %v1602_v57  ;;  %v1860_v55 = vrot.slane %v5437_v25, %v4960_v2  ;;  %v5525_v8 = vsel %vm1906_vm6, %v4116_v53, %v4117_v6  ;;  %v1329_v45 = vadd.f32 %v1328_v33, %v1264_v14 }
 0x180   : > { %v1673_v17 = vsel %vm1672_vm5, %v4074_v29, %v4075_v56  ;;  %v1674_v7 = vsel %vm1672_vm5, %v4075_v56, %v4074_v29  ;;  %4258 = vrot.lane.b32.xlu1 %v4862_v10, %s4680_s13  ;;  %v1505_v11 = vrot.slane %v4044_v1, %v4960_v2  ;;  %v1445_v51 = vmul.f32 %v5339_v49, %v1440_v44  ;;  %s4499_s13 = sshll.u32 %s4690_s12, 4  ;;  %s4500_s13 = int_to_ptr.vmem [resolvable:$false] %s4499_s13 }
 0x181   : > { %v5497_v57 = vpop.permute.xlu1 %4078  ;;  %v1688_v19 = vmul.f32 %v1681_v54, %v1674_v7  ;;  %v1689_v20 = vmul.f32 %v1685_v15, %v1673_v17  ;;  %4262 = vset.pattern.permute.xlu1 %v6187_v46  ;;  %v4045_v54 = vunpack.i.h.bf16 %v5367_v30  ;;  %v1457_v15 = vrot.slane %v4033_v27, %v4960_v2  ;;  %s4501_s21 = scalar_lea.vmem %s4500_s13, 256  ;;  %p4502_p2 = scmp.lt.s32.totalorder %s3494_s30, %s4500_s13 }
 0x182   : > { %v1393_v30 = vmul.f32 %v1392_v62, %v5300_v0  ;;  %v4056_v37 = vunpack.i.l.bf16 %v5409_v40  ;;  %v1381_v56 = vadd.f32 %v1380_v42, %v1316_v18  ;;  %v4057_v34 = vunpack.i.h.bf16 %v5409_v40  ;;  %p4503_p13 = scmp.lt.s32.totalorder %s4501_s21, %s4495_s29 }
 0x183   : > { %v5513_v9 = vcombine.low %v1688_v19, %v1689_v20  ;;  %v1522_v29 = vrot.slane %v4045_v54, %v4960_v2  ;;  %v1458_v0 = vmul.f32 %v1457_v15, %v5339_v49  ;;  %v4068_v33 = vunpack.i.l.bf16 %v5456_v23 }
 0x184   : > { %4264 = vperm.xlu1 %4262, %v4866_v12   ;;  %v1510_v17 = vmul.f32 %v5383_v52, %v1505_v11  ;;  %v4069_v7 = vunpack.i.h.bf16 %v5456_v23  ;;  %v1394_v1 = vadd.f32 %v1393_v30, %v1329_v45  ;;  %v1446_v19 = vadd.f32 %v1445_v51, %v1381_v56  ;;  %p4504_p0 = por %p4503_p13, %p4502_p2 }
 0x185   : > { %v1731_v5 = vmul.f32 %v1730_v61, %v5513_v9  ;;  %v4085_v22 = vpop.permute.xlu1 %4084  ;;  %v1570_v20 = vrot.slane %v4056_v37, %v4960_v2  ;;  %v4080_v46 = vunpack.i.l.bf16 %v5497_v57  ;;  %v1523_v63 = vmul.f32 %v1522_v29, %v5383_v52 }
 0x186   : > { %v4087_v24 = vunpack.i.h.bf16 %v4085_v22  ;;  %v4086_v60 = vunpack.i.l.bf16 %v4085_v22  ;;  %v1587_v23 = vrot.slane %v4057_v34, %v4960_v2  ;;  %v4081_v44 = vunpack.i.h.bf16 %v5497_v57  ;;  %p4505_p5 = pnand %p4504_p0, %p4498_p11 }
 0x187   : > { %v1732_v21 = vadd.f32 %v1731_v5, %v1667_v41  ;;  %v6188_v41 = vmov 38   ;;  %v1635_v42 = vrot.slane %v4068_v33, %v4960_v2  ;;  %v1511_v54 = vadd.f32 %v1510_v17, %v1446_v19  ;;  %v1956_v19 = vpop.permute.xlu0 %1955 }
 0x188   : > { %v1738_v61 = vsel %vm1737_vm7, %v4086_v60, %v4087_v24  ;;  %v1739_v27 = vsel %vm1737_vm7, %v4087_v24, %v4086_v60  ;;  %4270 = vrot.lane.b32.xlu1 %v4862_v10, %s4681_s14  ;;  %v1652_v52 = vrot.slane %v4069_v7, %v4960_v2  ;;  %v1575_v45 = vmul.f32 %v5427_v26, %v1570_v20 }
 0x189   : > { %v4091_v62 = vpop.permute.xlu1 %4090  ;;  %v1753_v49 = vmul.f32 %v1746_v32, %v1739_v27  ;;  %v1754_v40 = vmul.f32 %v1750_v13, %v1738_v61  ;;  %4274 = vset.pattern.permute.xlu1 %v6188_v41  ;;  %v1459_v32 = vadd.f32 %v1458_v0, %v1394_v1  ;;  %v1908_v13 = vsel %vm1906_vm6, %v4117_v6, %v4116_v53 }
 0x18a   : > { %v4092_v36 = vunpack.i.l.bf16 %v4091_v62  ;;  %v4093_v18 = vunpack.i.h.bf16 %v4091_v62  ;;  %v1700_v30 = vrot.slane %v4080_v46, %v4960_v2  ;;  %v1588_v51 = vmul.f32 %v1587_v23, %v5427_v26 }
 0x18b   : > { %v1768_v14 = vcombine.low %v1753_v49, %v1754_v40  ;;  %v1524_v22 = vadd.f32 %v1523_v63, %v1459_v32  ;;  %v1717_v50 = vrot.slane %v4081_v44, %v4960_v2  ;;  %v1640_v6 = vmul.f32 %v5468_v59, %v1635_v42 }
 0x18c   : > { %4276 = vperm.xlu1 %4274, %v4866_v12   ;;  %v1765_v53 = vrot.slane %v4092_v36, %v4960_v2  ;;  %v1653_v60 = vmul.f32 %v1652_v52, %v5468_v59  ;;  %v1782_v26 = vrot.slane %v4093_v18, %v4960_v2  ;;  %v1576_v0 = vadd.f32 %v1575_v45, %v1511_v54 }
 0x18d   : > { %v1796_v15 = vmul.f32 %v1795_v16, %v1768_v14  ;;  %v4097_v57 = vpop.permute.xlu1 %4096  ;;  %v1705_v33 = vmul.f32 %v5513_v9, %v1700_v30  ;;  %v1589_v17 = vadd.f32 %v1588_v51, %v1524_v22  ;;  %v1718_v59 = vmul.f32 %v1717_v50, %v5513_v9 }
 0x18e   : > { %v4099_v11 = vunpack.i.h.bf16 %v4097_v57  ;;  %v4098_v5 = vunpack.i.l.bf16 %v4097_v57  ;;  %v1641_v62 = vadd.f32 %v1640_v6, %v1576_v0  ;;  %v1770_v38 = vmul.f32 %v1768_v14, %v1765_v53  ;;  %v1975_v6 = vld [vmem:[#allocation9 + $0x32] ss:$8 sm:$0x3] }
 0x18f   : > { %v1797_v37 = vadd.f32 %v1796_v15, %v1732_v21  ;;  %v6189_v21 = vmov 39   ;;  %v1654_v40 = vadd.f32 %v1653_v60, %v1589_v17  ;;  %v1783_v41 = vmul.f32 %v1782_v26, %v1768_v14 }
 0x190   : > { %v1803_v16 = vsel %vm1802_vm8, %v4098_v5, %v4099_v11  ;;  %v1804_v24 = vsel %vm1802_vm8, %v4099_v11, %v4098_v5  ;;  %4282 = vrot.lane.b32.xlu1 %v4862_v10, %s4682_s15  ;;  %v1923_v1 = vmul.f32 %v1919_v28, %v1908_v13  ;;  %v1964_v25 = vrot.slane %v1956_v19, %v4960_v2 }
 0x191   : > { %v1818_v56 = vmul.f32 %v1811_v31, %v1804_v24  ;;  %v1819_v29 = vmul.f32 %v1815_v58, %v1803_v16  ;;  %v4103_v34 = vpop.permute.xlu1 %4102  ;;  %4286 = vset.pattern.permute.xlu1 %v6189_v21  ;;  %v1922_v31 = vmul.f32 %v1915_v39, %v5525_v8  ;;  %v1706_v39 = vadd.f32 %v1705_v33, %v1641_v62  ;;  %v2021_v33 = vpop.permute.xlu0 %2020 }
 0x192   : > { %v4105_v61 = vunpack.i.h.bf16 %v4103_v34  ;;  %v4104_v27 = vunpack.i.l.bf16 %v4103_v34  ;;  %v1719_v63 = vadd.f32 %v1718_v59, %v1654_v40  ;;  %v6190_v28 = vmov 40   ;;  %v2040_v40 = vld [vmem:[#allocation9 + $0x33] ss:$8 sm:$0x3] }
 0x193   : > { %v1833_v7 = vcombine.low %v1818_v56, %v1819_v29  ;;  %v1771_v42 = vadd.f32 %v1770_v38, %v1706_v39  ;;  %v1937_v36 = vcombine.low %v1922_v31, %v1923_v1  ;;  %v4685_v16 = vmov 41  }
 0x194   : > { %v1847_v58 = vrot.slane %v4105_v61, %v4960_v2  ;;  %v1830_v49 = vrot.slane %v4104_v27, %v4960_v2  ;;  %4288 = vperm.xlu1 %4286, %v4866_v12   ;;  %v1984_v26 = vrot.slane %v1975_v6, %v4944_v48  ;;  %v2029_v38 = vrot.slane %v2021_v33, %v4960_v2 }
 0x195   : > { %v1861_v9 = vmul.f32 %v1860_v55, %v1833_v7  ;;  %v1784_v55 = vadd.f32 %v1783_v41, %v1719_v63  ;;  %v1965_v5 = vmul.f32 %v1964_v25, %v1937_v36  ;;  %vm2426_vm0 = vcmp.lt.s32.totalorder %v4938_v43, 110 }
 0x196   : > { %v1835_v8 = vmul.f32 %v1833_v7, %v1830_v49  ;;  %v1848_v20 = vmul.f32 %v1847_v58, %v1833_v7  ;;  %v4110_v46 = vpop.permute.xlu1 %4109  ;;  %vm2491_vm1 = vcmp.lt.s32.totalorder %v4938_v43, 109  ;;  %vm2556_vm2 = vcmp.lt.s32.totalorder %v4938_v43, 99 }
 0x197   : > { %v1862_v23 = vadd.f32 %v1861_v9, %v1797_v37  ;;  %v4112_v44 = vunpack.i.h.bf16 %v4110_v46  ;;  %v4111_v32 = vunpack.i.l.bf16 %v4110_v46  ;;  %v4687_v9 = vmov 43  }
 0x198   : > { %4294 = vrot.lane.b32.xlu1 %v4862_v10, %s4683_s26  ;;  %v1836_v13 = vadd.f32 %v1835_v8, %v1771_v42  ;;  %v1849_v52 = vadd.f32 %v1848_v20, %v1784_v55  ;;  %v2045_v8 = vrot.slane %v2040_v40, %v4942_v47  ;;  %v2049_v20 = vrot.slane %v2040_v40, %v4944_v48 }
 0x199   : > { %v1886_v14 = vrot.slane %v4112_v44, %v4960_v2  ;;  %v1873_v35 = vrot.slane %v4111_v32, %v4960_v2  ;;  %4298 = vset.pattern.permute.xlu1 %v6190_v28  ;;  %v2086_v32 = vpop.permute.xlu0 %2085  ;;  %vm2621_vm3 = vcmp.lt.s32.totalorder %v4938_v43, 98  ;;  %vm3076_vm4 = vcmp.lt.s32.totalorder %v4938_v43, 82 }
 0x19a   : > { %v1891_v54 = vpop.permute.xlu1 %1890  ;;  %vm3141_vm5 = vcmp.lt.s32.totalorder %v4938_v43, 81  ;;  %vm3206_vm6 = vcmp.lt.s32.totalorder %v4938_v43, 80  ;;  %vm2686_vm7 = vcmp.lt.s32.totalorder %v4938_v43, 97  ;;  %vm3271_vm8 = vcmp.lt.s32.totalorder %v4938_v43, 79 }
 0x19b   : > { %v1887_v18 = vmul.f32 %v1886_v14, %v4856_v4  ;;  %v1874_v15 = vmul.f32 %v1873_v35, %v4856_v4  ;;  %v1899_v57 = vrot.slane %v1891_v54, %v4960_v2  ;;  %v2094_v54 = vrot.slane %v2086_v32, %v4960_v2 }
 0x19c   : > { %4300 = vperm.xlu1 %4298, %v4866_v12  }
 0x19d   : > { %v1875_v45 = vadd.f32 %v1874_v15, %v1836_v13  ;;  %v1888_v30 = vadd.f32 %v1887_v18, %v1849_v52  ;;  %v1900_v11 = vmul.f32 %v1899_v57, %v4856_v4  ;;  %v1980_v4 = vrot.slane %v1975_v6, %v4942_v47  ;;  %v2105_v57 = vld [vmem:[#allocation9 + $0x34] ss:$8 sm:$0x3] }
 0x19e   : > { %v6191_v15 = vmov 44  }
 0x19f   : > { %v1901_v22 = vadd.f32 %v1900_v11, %v1862_v23  ;;  %v4121_v51 = vpop.permute.xlu1 %4120 }
 0x1a0   : > { %v4123_v50 = vunpack.i.h.bf16 %v4121_v51  ;;  %v4122_v37 = vunpack.i.l.bf16 %v4121_v51  ;;  %4306 = vrot.lane.b32.xlu1 %v4862_v10, %s4684_s27  ;;  %v2114_v51 = vrot.slane %v2105_v57, %v4944_v48 }
 0x1a1   : > { %v1966_v53 = vadd.f32 %v1965_v5, %v1901_v22  ;;  %4310 = vset.pattern.permute.xlu1 %v4685_v16  ;;  %v2110_v22 = vrot.slane %v2105_v57, %v4942_v47 }
 0x1a2   : > { %v1951_v24 = vrot.slane %v4123_v50, %v4960_v2  ;;  %v1934_v60 = vrot.slane %v4122_v37, %v4960_v2 }
 0x1a3   : > { %v4127_v56 = vpop.permute.xlu1 %4126 }
 0x1a4   : > { %v1952_v29 = vmul.f32 %v1951_v24, %v1937_v36  ;;  %v1939_v34 = vmul.f32 %v1937_v36, %v1934_v60  ;;  %v4129_v21 = vunpack.i.h.bf16 %v4127_v56  ;;  %v4128_v0 = vunpack.i.l.bf16 %v4127_v56  ;;  %4312 = vperm.xlu1 %4310, %v4866_v12   ;;  %v2151_v60 = vpop.permute.xlu0 %2150 }
 0x1a6   : > { %v1940_v61 = vadd.f32 %v1939_v34, %v1875_v45  ;;  %v1953_v27 = vadd.f32 %v1952_v29, %v1888_v30  ;;  %v1972_v17 = vsel %vm1971_vm9, %v4128_v0, %v4129_v21  ;;  %v1973_v59 = vsel %vm1971_vm9, %v4129_v21, %v4128_v0 }
 0x1a7   : > { %v1987_v7 = vmul.f32 %v1980_v4, %v1972_v17  ;;  %v1988_v31 = vmul.f32 %v1984_v26, %v1973_v59  ;;  %v4133_v62 = vpop.permute.xlu1 %4132  ;;  %v4688_v26 = vmov 45   ;;  %vm2751_vm9 = vcmp.lt.s32.totalorder %v4938_v43, 96 }
 0x1a8   : > { %v4135_v58 = vunpack.i.h.bf16 %v4133_v62  ;;  %v4134_v49 = vunpack.i.l.bf16 %v4133_v62  ;;  %4323 = vrot.lane.b32.xlu1 %v4862_v10, %s4686_s25 }
 0x1a9   : > { %v2002_v41 = vcombine.low %v1987_v7, %v1988_v31  ;;  %4327 = vset.pattern.permute.xlu1 %v4687_v9  ;;  %v2170_v7 = vld [vmem:[#allocation9 + $0x35] ss:$8 sm:$0x3] }
 0x1aa   : > { %v2016_v1 = vrot.slane %v4135_v58, %v4960_v2  ;;  %v1999_v19 = vrot.slane %v4134_v49, %v4960_v2  ;;  %v4689_v58 = vmov 46   ;;  %v2175_v40 = vrot.slane %v2170_v7, %v4942_v47 }
 0x1ab   : > { %v2030_v39 = vmul.f32 %v2029_v38, %v2002_v41  ;;  %v4139_v46 = vpop.permute.xlu1 %4138 }
 0x1ac   : > { %v2004_v63 = vmul.f32 %v2002_v41, %v1999_v19  ;;  %v2017_v23 = vmul.f32 %v2016_v1, %v2002_v41  ;;  %v4141_v10 = vunpack.i.h.bf16 %v4139_v46  ;;  %v4140_v44 = vunpack.i.l.bf16 %v4139_v46  ;;  %4329 = vperm.xlu1 %4327, %v4866_v12   ;;  %v2216_v46 = vpop.permute.xlu0 %2215 }
 0x1ad   : > { %v2031_v42 = vadd.f32 %v2030_v39, %v1966_v53  ;;  %v2179_v41 = vrot.slane %v2170_v7, %v4944_v48 }
 0x1ae   : > { %v2005_v25 = vadd.f32 %v2004_v63, %v1940_v61  ;;  %v2018_v55 = vadd.f32 %v2017_v23, %v1953_v27  ;;  %v2037_v14 = vsel %vm2036_vm10, %v4140_v44, %v4141_v10  ;;  %v2038_v35 = vsel %vm2036_vm10, %v4141_v10, %v4140_v44 }
 0x1af   : > { %v2052_v28 = vmul.f32 %v2045_v8, %v2037_v14  ;;  %v2053_v36 = vmul.f32 %v2049_v20, %v2038_v35  ;;  %v4145_v13 = vpop.permute.xlu1 %4144  ;;  %v2159_v27 = vrot.slane %v2151_v60, %v4960_v2  ;;  %v2224_v35 = vrot.slane %v2216_v46, %v4960_v2 }
 0x1b0   : > { %v4147_v52 = vunpack.i.h.bf16 %v4145_v13  ;;  %v4146_v18 = vunpack.i.l.bf16 %v4145_v13  ;;  %4338 = vset.pattern.permute.xlu1 %v6191_v15  ;;  %v2235_v13 = vld [vmem:[#allocation9 + $0x36] ss:$8 sm:$0x3]  ;;  %vm2816_vm10 = vcmp.lt.s32.totalorder %v4938_v43, 95 }
 0x1b1   : > { %v2067_v45 = vcombine.low %v2052_v28, %v2053_v36  ;;  %4340 = vperm.xlu1 %4338, %v4866_v12   ;;  %v2240_v57 = vrot.slane %v2235_v13, %v4942_v47 }
 0x1b2   : > { %v2081_v30 = vrot.slane %v4147_v52, %v4960_v2  ;;  %v2064_v11 = vrot.slane %v4146_v18, %v4960_v2 }
 0x1b3   : > { %v2095_v5 = vmul.f32 %v2094_v54, %v2067_v45  ;;  %v4151_v50 = vpop.permute.xlu1 %4150 }
 0x1b4   : > { %v2069_v37 = vmul.f32 %v2067_v45, %v2064_v11  ;;  %v2082_v6 = vmul.f32 %v2081_v30, %v2067_v45  ;;  %v4153_v53 = vunpack.i.h.bf16 %v4151_v50  ;;  %v4152_v24 = vunpack.i.l.bf16 %v4151_v50 }
 0x1b5   : > { %v2096_v4 = vadd.f32 %v2095_v5, %v2031_v42  ;;  %4349 = vset.pattern.permute.xlu1 %v4688_v26  ;;  %v2244_v45 = vrot.slane %v2235_v13, %v4944_v48  ;;  %v6193_v50 = vmov 48  }
 0x1b6   : > { %v2070_v56 = vadd.f32 %v2069_v37, %v2005_v25  ;;  %v2083_v29 = vadd.f32 %v2082_v6, %v2018_v55  ;;  %v2102_v34 = vsel %vm2101_vm11, %v4152_v24, %v4153_v53  ;;  %v2103_v21 = vsel %vm2101_vm11, %v4153_v53, %v4152_v24  ;;  %4351 = vperm.xlu1 %4349, %v4866_v12   ;;  %v2281_v37 = vpop.permute.xlu0 %2280 }
 0x1b7   : > { %v2117_v0 = vmul.f32 %v2110_v22, %v2102_v34  ;;  %v2118_v33 = vmul.f32 %v2114_v51, %v2103_v21  ;;  %v4157_v61 = vpop.permute.xlu1 %4156  ;;  %v6192_v55 = vmov 47   ;;  %v2289_v21 = vrot.slane %v2281_v37, %v4960_v2 }
 0x1b8   : > { %v4159_v17 = vunpack.i.h.bf16 %v4157_v61  ;;  %v4158_v59 = vunpack.i.l.bf16 %v4157_v61  ;;  %v2300_v61 = vld [vmem:[#allocation9 + $0x37] ss:$8 sm:$0x3]  ;;  %vm2881_vm11 = vcmp.lt.s32.totalorder %v4938_v43, 94 }
 0x1b9   : > { %v2132_v31 = vcombine.low %v2117_v0, %v2118_v33 }
 0x1ba   : > { %v2146_v62 = vrot.slane %v4159_v17, %v4960_v2  ;;  %v2129_v38 = vrot.slane %v4158_v59, %v4960_v2  ;;  %4360 = vset.pattern.permute.xlu1 %v4689_v58  ;;  %v2346_v17 = vpop.permute.xlu0 %2345 }
 0x1bb   : > { %v2160_v49 = vmul.f32 %v2159_v27, %v2132_v31  ;;  %4362 = vperm.xlu1 %4360, %v4866_v12   ;;  %v4163_v1 = vpop.permute.xlu1 %4162 }
 0x1bc   : > { %v2134_v19 = vmul.f32 %v2132_v31, %v2129_v38  ;;  %v2147_v39 = vmul.f32 %v2146_v62, %v2132_v31  ;;  %v4165_v8 = vunpack.i.h.bf16 %v4163_v1  ;;  %v4164_v20 = vunpack.i.l.bf16 %v4163_v1 }
 0x1bd   : > { %v2161_v63 = vadd.f32 %v2160_v49, %v2096_v4  ;;  %v2305_v31 = vrot.slane %v2300_v61, %v4942_v47  ;;  %v2309_v62 = vrot.slane %v2300_v61, %v4944_v48 }
 0x1be   : > { %v2135_v23 = vadd.f32 %v2134_v19, %v2070_v56  ;;  %v2148_v10 = vadd.f32 %v2147_v39, %v2083_v29  ;;  %v2167_v44 = vsel %vm2166_vm12, %v4164_v20, %v4165_v8  ;;  %v2168_v32 = vsel %vm2166_vm12, %v4165_v8, %v4164_v20  ;;  %v2411_v19 = vpop.permute.xlu0 %2410 }
 0x1bf   : > { %v2182_v42 = vmul.f32 %v2175_v40, %v2167_v44  ;;  %v2183_v25 = vmul.f32 %v2179_v41, %v2168_v32  ;;  %4371 = vset.pattern.permute.xlu1 %v6192_v55  ;;  %v4169_v14 = vpop.permute.xlu1 %4168  ;;  %v2354_v44 = vrot.slane %v2346_v17, %v4960_v2  ;;  %vm2946_vm12 = vcmp.lt.s32.totalorder %v4938_v43, 93 }
 0x1c0   : > { %v4171_v28 = vunpack.i.h.bf16 %v4169_v14  ;;  %v4170_v36 = vunpack.i.l.bf16 %v4169_v14  ;;  %4373 = vperm.xlu1 %4371, %v4866_v12  }
 0x1c1   : > { %v2197_v54 = vcombine.low %v2182_v42, %v2183_v25  ;;  %v2365_v25 = vld [vmem:[#allocation9 + $0x40] ss:$8 sm:$0x3] }
 0x1c2   : > { %v2211_v52 = vrot.slane %v4171_v28, %v4960_v2  ;;  %v2194_v18 = vrot.slane %v4170_v36, %v4960_v2  ;;  %v2476_v14 = vpop.permute.xlu0 %2475  ;;  %v2374_v13 = vrot.slane %v2365_v25, %v4944_v48 }
 0x1c3   : > { %v2225_v15 = vmul.f32 %v2224_v35, %v2197_v54  ;;  %v4175_v30 = vpop.permute.xlu1 %4174 }
 0x1c4   : > { %v2199_v11 = vmul.f32 %v2197_v54, %v2194_v18  ;;  %v2212_v5 = vmul.f32 %v2211_v52, %v2197_v54  ;;  %v4177_v22 = vunpack.i.h.bf16 %v4175_v30  ;;  %v4176_v51 = vunpack.i.l.bf16 %v4175_v30  ;;  %4382 = vset.pattern.permute.xlu1 %v6193_v50 }
 0x1c5   : > { %v2226_v6 = vadd.f32 %v2225_v15, %v2161_v63  ;;  %4384 = vperm.xlu1 %4382, %v4866_v12  }
 0x1c6   : > { %v2200_v53 = vadd.f32 %v2199_v11, %v2135_v23  ;;  %v2213_v24 = vadd.f32 %v2212_v5, %v2148_v10  ;;  %v2232_v60 = vsel %vm2231_vm13, %v4176_v51, %v4177_v22  ;;  %v2233_v4 = vsel %vm2231_vm13, %v4177_v22, %v4176_v51  ;;  %v2541_v30 = vpop.permute.xlu0 %2540 }
 0x1c7   : > { %v2247_v56 = vmul.f32 %v2240_v57, %v2232_v60  ;;  %v2248_v29 = vmul.f32 %v2244_v45, %v2233_v4  ;;  %v4181_v34 = vpop.permute.xlu1 %4180  ;;  %v2430_v4 = vld [vmem:[#allocation9 + $0x41] ss:$8 sm:$0x3]  ;;  %vm3011_vm13 = vcmp.lt.s32.totalorder %v4938_v43, 83 }
 0x1c8   : > { %v4183_v0 = vunpack.i.h.bf16 %v4181_v34  ;;  %v4182_v33 = vunpack.i.l.bf16 %v4181_v34  ;;  %v2439_v61 = vrot.slane %v2430_v4, %v4944_v48 }
 0x1c9   : > { %v2262_v27 = vcombine.low %v2247_v56, %v2248_v29  ;;  %4393 = vset.pattern.permute.xlu1 %v4685_v16 }
 0x1ca   : > { %v2276_v59 = vrot.slane %v4183_v0, %v4960_v2  ;;  %v2259_v12 = vrot.slane %v4182_v33, %v4960_v2  ;;  %2995 = vperm.xlu1 %4393, %v4854_v3   ;;  %v2606_v29 = vpop.permute.xlu0 %2605  ;;  %v2435_v33 = vrot.slane %v2430_v4, %v4942_v47 }
 0x1cb   : > { %v2290_v7 = vmul.f32 %v2289_v21, %v2262_v27  ;;  %v4187_v38 = vpop.permute.xlu1 %4186 }
 0x1cc   : > { %v2264_v49 = vmul.f32 %v2262_v27, %v2259_v12  ;;  %v2277_v40 = vmul.f32 %v2276_v59, %v2262_v27  ;;  %v4189_v41 = vunpack.i.h.bf16 %v4187_v38  ;;  %v4188_v1 = vunpack.i.l.bf16 %v4187_v38 }
 0x1cd   : > { %v2291_v16 = vadd.f32 %v2290_v7, %v2226_v6 }
 0x1ce   : > { %v2265_v39 = vadd.f32 %v2264_v49, %v2200_v53  ;;  %v2278_v8 = vadd.f32 %v2277_v40, %v2213_v24  ;;  %v2297_v20 = vsel %vm2296_vm14, %v4188_v1, %v4189_v41  ;;  %v2298_v46 = vsel %vm2296_vm14, %v4189_v41, %v4188_v1  ;;  %4394 = vset.pattern.permute.xlu1 %v4687_v9 }
 0x1cf   : > { %v2312_v63 = vmul.f32 %v2305_v31, %v2297_v20  ;;  %v2313_v23 = vmul.f32 %v2309_v62, %v2298_v46  ;;  %3125 = vperm.xlu1 %4394, %v4854_v3   ;;  %v4193_v10 = vpop.permute.xlu1 %4192  ;;  %v2370_v9 = vrot.slane %v2365_v25, %v4942_v47  ;;  %v2419_v53 = vrot.slane %v2411_v19, %v4960_v2  ;;  %v2671_v19 = vpop.permute.xlu0 %2670 }
 0x1d0   : > { %v4195_v32 = vunpack.i.h.bf16 %v4193_v10  ;;  %v4194_v42 = vunpack.i.l.bf16 %v4193_v10  ;;  %vm3336_vm14 = vcmp.lt.s32.totalorder %v4938_v43, 78 }
 0x1d1   : > { %v2327_v55 = vcombine.low %v2312_v63, %v2313_v23 }
 0x1d2   : > { %v2341_v35 = vrot.slane %v4195_v32, %v4960_v2  ;;  %v2324_v28 = vrot.slane %v4194_v42, %v4960_v2 }
 0x1d3   : > { %v2355_v36 = vmul.f32 %v2354_v44, %v2327_v55  ;;  %4396 = vset.pattern.permute.xlu1 %v4688_v26  ;;  %v4199_v54 = vpop.permute.xlu1 %4198  ;;  %v5696_v44 = vpop.permute.xlu0 %2735 }
 0x1d4   : > { %v2329_v52 = vmul.f32 %v2327_v55, %v2324_v28  ;;  %v2342_v18 = vmul.f32 %v2341_v35, %v2327_v55  ;;  %v4201_v15 = vunpack.i.h.bf16 %v4199_v54  ;;  %v4200_v57 = vunpack.i.l.bf16 %v4199_v54  ;;  %3255 = vperm.xlu1 %4396, %v4854_v3   ;;  %v2560_v28 = vld [vmem:[#allocation9 + $0x43] ss:$8 sm:$0x3] }
 0x1d5   : > { %v2356_v45 = vadd.f32 %v2355_v36, %v2291_v16  ;;  %v2484_v16 = vrot.slane %v2476_v14, %v4960_v2  ;;  %v2549_v35 = vrot.slane %v2541_v30, %v4960_v2  ;;  %v2569_v54 = vrot.slane %v2560_v28, %v4944_v48 }
 0x1d6   : > { %v2330_v11 = vadd.f32 %v2329_v52, %v2265_v39  ;;  %v2343_v5 = vadd.f32 %v2342_v18, %v2278_v8  ;;  %v2362_v22 = vsel %vm2361_vm15, %v4200_v57, %v4201_v15  ;;  %v2363_v51 = vsel %vm2361_vm15, %v4201_v15, %v4200_v57  ;;  %v2495_v39 = vld [vmem:[#allocation9 + $0x42] ss:$8 sm:$0x3] }
 0x1d7   : > { %v2377_v26 = vmul.f32 %v2370_v9, %v2362_v22  ;;  %v2378_v37 = vmul.f32 %v2374_v13, %v2363_v51  ;;  %v4205_v6 = vpop.permute.xlu1 %4204  ;;  %v2500_v20 = vrot.slane %v2495_v39, %v4942_v47  ;;  %v2504_v46 = vrot.slane %v2495_v39, %v4944_v48  ;;  %v5707_v18 = vpop.permute.xlu0 %2800 }
 0x1d8   : > { %v4207_v24 = vunpack.i.h.bf16 %v4205_v6  ;;  %v4206_v60 = vunpack.i.l.bf16 %v4205_v6  ;;  %4397 = vset.pattern.permute.xlu1 %v4689_v58  ;;  %v2565_v13 = vrot.slane %v2560_v28, %v4942_v47  ;;  %v5762_v28 = vld [vmem:[#allocation9 + $0x55] ss:$8 sm:$0x3]  ;;  %vm3401_vm15 = vcmp.lt.s32.totalorder %v4938_v43, 77 }
 0x1d9   : > { %v2392_v56 = vcombine.low %v2377_v26, %v2378_v37  ;;  %3320 = vperm.xlu1 %4397, %v4854_v3   ;;  %v2614_v26 = vrot.slane %v2606_v29, %v4960_v2  ;;  %v2625_v37 = vld [vmem:[#allocation9 + $0x44] ss:$8 sm:$0x3] }
 0x1da   : > { %v2406_v34 = vrot.slane %v4207_v24, %v4960_v2  ;;  %v2389_v21 = vrot.slane %v4206_v60, %v4960_v2  ;;  %v2630_v60 = vrot.slane %v2625_v37, %v4942_v47  ;;  %v2634_v4 = vrot.slane %v2625_v37, %v4944_v48  ;;  %v5779_v37 = vld [vmem:[#allocation9 + $0x52] ss:$8 sm:$0x3] }
 0x1db   : > { %v2420_v0 = vmul.f32 %v2419_v53, %v2392_v56  ;;  %v4211_v27 = vpop.permute.xlu1 %4210  ;;  %v5714_v53 = vpop.permute.xlu0 %2865 }
 0x1dc   : > { %v2394_v17 = vmul.f32 %v2392_v56, %v2389_v21  ;;  %v2407_v59 = vmul.f32 %v2406_v34, %v2392_v56  ;;  %v4213_v58 = vunpack.i.h.bf16 %v4211_v27  ;;  %v4212_v12 = vunpack.i.l.bf16 %v4211_v27 }
 0x1dd   : > { %v2421_v7 = vadd.f32 %v2420_v0, %v2356_v45  ;;  %4399 = vset.pattern.permute.xlu1 %v6193_v50 }
 0x1de   : > { %v5682_v31 = vadd.f32 %v2394_v17, %v2330_v11  ;;  %v5684_v62 = vadd.f32 %v2407_v59, %v2343_v5  ;;  %v2427_v38 = vsel %vm2426_vm0, %v4212_v12, %v4213_v58  ;;  %v2428_v49 = vsel %vm2426_vm0, %v4213_v58, %v4212_v12  ;;  %3450 = vperm.xlu1 %4399, %v4854_v3  }
 0x1df   : > { %v2442_v40 = vmul.f32 %v2435_v33, %v2427_v38  ;;  %v2443_v41 = vmul.f32 %v2439_v61, %v2428_v49  ;;  %v5687_v1 = vpop.permute.xlu1 %4216  ;;  %v2679_v17 = vrot.slane %v2671_v19, %v4960_v2  ;;  %v5723_v58 = vpop.permute.xlu0 %2930  ;;  %v5738_v19 = vld [vmem:[#allocation9 + $0x45] ss:$8 sm:$0x3] }
 0x1e1   : > { %v5690_v8 = vcombine.low %v2442_v40, %v2443_v41 }
 0x1e3   : > { %v2485_v50 = vmul.f32 %v2484_v16, %v5690_v8  ;;  %v4223_v63 = vpop.permute.xlu1 %4222  ;;  %v5732_v40 = vpop.permute.xlu0 %4318 }
 0x1e4   : > { %v4225_v3 = vunpack.i.h.bf16 %v4223_v63  ;;  %v4224_v23 = vunpack.i.l.bf16 %v4223_v63  ;;  %v5744_v63 = vld [vmem:[#allocation9 + $0x50] ss:$8 sm:$0x3] }
 0x1e5   : > { %v2486_v10 = vadd.f32 %v2485_v50, %v2421_v7  ;;  %v5740_v50 = vld [vmem:[#allocation9 + $0x46] ss:$8 sm:$0x3] }
 0x1e6   : > { %v2492_v32 = vsel %vm2491_vm1, %v4224_v23, %v4225_v3  ;;  %v2493_v42 = vsel %vm2491_vm1, %v4225_v3, %v4224_v23  ;;  %v2695_v3 = vrot.slane %v5738_v19, %v4942_v47  ;;  %v2699_v23 = vrot.slane %v5738_v19, %v4944_v48 }
 0x1e7   : > { %v2507_v25 = vmul.f32 %v2500_v20, %v2492_v32  ;;  %v2508_v55 = vmul.f32 %v2504_v46, %v2493_v42  ;;  %v5698_v14 = vpop.permute.xlu1 %4228  ;;  %v4335_v39 = vpop.permute.xlu0 %4334  ;;  %v5742_v20 = vld [vmem:[#allocation9 + $0x47] ss:$8 sm:$0x3]  ;;  %v3080_v46 = vld [vmem:[#allocation9 + $0x53] ss:$8 sm:$0x3] }
 0x1e9   : > { %v5701_v36 = vcombine.low %v2507_v25, %v2508_v55  ;;  %v3145_v25 = vld [vmem:[#allocation9 + $0x54] ss:$8 sm:$0x3] }
 0x1eb   : > { %v2550_v9 = vmul.f32 %v2549_v35, %v5701_v36  ;;  %v4235_v52 = vpop.permute.xlu1 %4234 }
 0x1ec   : > { %v4237_v15 = vunpack.i.h.bf16 %v4235_v52  ;;  %v4236_v57 = vunpack.i.l.bf16 %v4235_v52 }
 0x1ed   : > { %v2551_v45 = vadd.f32 %v2550_v9, %v2486_v10  ;;  %v2760_v10 = vrot.slane %v5740_v50, %v4942_v47  ;;  %v3085_v9 = vrot.slane %v3080_v46, %v4942_v47 }
 0x1ee   : > { %v2557_v11 = vsel %vm2556_vm2, %v4236_v57, %v4237_v15  ;;  %v2558_v5 = vsel %vm2556_vm2, %v4237_v15, %v4236_v57  ;;  %v5771_v57 = vld [vmem:[#allocation9 + $0x56] ss:$8 sm:$0x3] }
 0x1ef   : > { %v2572_v30 = vmul.f32 %v2565_v13, %v2557_v11  ;;  %v2573_v22 = vmul.f32 %v2569_v54, %v2558_v5  ;;  %v5709_v51 = vpop.permute.xlu1 %4240  ;;  %v3089_v13 = vrot.slane %v3080_v46, %v4944_v48  ;;  %v4346_v54 = vpop.permute.xlu0 %4345  ;;  %v4337_v11 = vunpack.i.h.bf16 %v4335_v39 }
 0x1f0   : > { %v4336_v5 = vunpack.i.l.bf16 %v4335_v39  ;;  %v4219_v46 = vunpack.i.h.bf16 %v5687_v1 }
 0x1f1   : > { %v5712_v6 = vcombine.low %v2572_v30, %v2573_v22  ;;  %v3150_v30 = vrot.slane %v3145_v25, %v4942_v47  ;;  %v3154_v22 = vrot.slane %v3145_v25, %v4944_v48  ;;  %v4321_v25 = vunpack.i.h.bf16 %v5732_v40 }
 0x1f2   : > { %v2471_v55 = vrot.slane %v4219_v46, %v4960_v2 }
 0x1f3   : > { %v2615_v24 = vmul.f32 %v2614_v26, %v5712_v6  ;;  %v4247_v56 = vpop.permute.xlu1 %4246  ;;  %v5777_v26 = vld [vmem:[#allocation9 + $0x57] ss:$8 sm:$0x3]  ;;  %v4357_v39 = vpop.permute.xlu0 %4356 }
 0x1f4   : > { %v4249_v34 = vunpack.i.h.bf16 %v4247_v56  ;;  %v4248_v21 = vunpack.i.l.bf16 %v4247_v56  ;;  %v3215_v56 = vrot.slane %v5762_v28, %v4942_v47 }
 0x1f5   : > { %v2616_v0 = vadd.f32 %v2615_v24, %v2551_v45  ;;  %v5773_v45 = vld [vmem:[#allocation9 + $0x51] ss:$8 sm:$0x3] }
 0x1f6   : > { %v2622_v33 = vsel %vm2621_vm3, %v4248_v21, %v4249_v34  ;;  %v2623_v61 = vsel %vm2621_vm3, %v4249_v34, %v4248_v21  ;;  %v3219_v34 = vrot.slane %v5762_v28, %v4944_v48  ;;  %v4320_v28 = vunpack.i.l.bf16 %v5732_v40 }
 0x1f7   : > { %v2637_v29 = vmul.f32 %v2630_v60, %v2622_v33  ;;  %v2638_v27 = vmul.f32 %v2634_v4, %v2623_v61  ;;  %v5721_v59 = vpop.permute.xlu1 %4252  ;;  %v4348_v60 = vunpack.i.h.bf16 %v4346_v54  ;;  %v4347_v4 = vunpack.i.l.bf16 %v4346_v54 }
 0x1f8   : > { %v3077_v54 = vsel %vm3076_vm4, %v4336_v5, %v4337_v11  ;;  %v4359_v61 = vunpack.i.h.bf16 %v4357_v39  ;;  %v4358_v33 = vunpack.i.l.bf16 %v4357_v39  ;;  %v4243_v40 = vunpack.i.h.bf16 %v5709_v51 }
 0x1f9   : > { %v5725_v12 = vcombine.low %v2637_v29, %v2638_v27  ;;  %v4218_v29 = vunpack.i.l.bf16 %v5687_v1  ;;  %v3078_v27 = vsel %vm3076_vm4, %v4337_v11, %v4336_v5  ;;  %v3142_v21 = vsel %vm3141_vm5, %v4347_v4, %v4348_v60 }
 0x1fa   : > { %v3143_v1 = vsel %vm3141_vm5, %v4348_v60, %v4347_v4  ;;  %v4231_v11 = vunpack.i.h.bf16 %v5698_v14  ;;  %v4242_v5 = vunpack.i.l.bf16 %v5709_v51  ;;  %v3092_v35 = vmul.f32 %v3085_v9, %v3077_v54 }
 0x1fb   : > { %v2680_v7 = vmul.f32 %v2679_v17, %v5725_v12  ;;  %v5728_v38 = vpop.permute.xlu1 %4258  ;;  %v2454_v52 = vrot.slane %v4218_v29, %v4960_v2  ;;  %v3093_v32 = vmul.f32 %v3089_v13, %v3078_v27  ;;  %v3157_v60 = vmul.f32 %v3150_v30, %v3142_v21 }
 0x1fc   : > { %v3158_v4 = vmul.f32 %v3154_v22, %v3143_v1  ;;  %v5832_v29 = vrot.slane %v4321_v25, %v4960_v2  ;;  %v4261_v13 = vunpack.i.h.bf16 %v5728_v38  ;;  %v4260_v30 = vunpack.i.l.bf16 %v5728_v38  ;;  %v5857_v1 = vpop.permute.xlu0 %4367 }
 0x1fd   : > { %v5730_v49 = vadd.f32 %v2680_v7, %v2616_v0  ;;  %v5801_v7 = vld [vmem:[#allocation9 + $0x60] ss:$8 sm:$0x3]  ;;  %v4230_v0 = vunpack.i.l.bf16 %v5698_v14  ;;  %v5835_v14 = vrot.slane %v4320_v28, %v4960_v2  ;;  %v3207_v22 = vsel %vm3206_vm6, %v4358_v33, %v4359_v61 }
 0x1fe   : > { %v2459_v21 = vmul.f32 %v5690_v8, %v2454_v52  ;;  %v2584_v27 = vrot.slane %v4242_v5, %v4960_v2  ;;  %v3208_v46 = vsel %vm3206_vm6, %v4359_v61, %v4358_v33  ;;  %v2472_v25 = vmul.f32 %v2471_v55, %v5690_v8 }
 0x1ff   : > { %v5734_v41 = vpop.permute.xlu1 %4264  ;;  %v2519_v39 = vrot.slane %v4230_v0, %v4960_v2  ;;  %v2536_v0 = vrot.slane %v4231_v11, %v4960_v2  ;;  %v4254_v38 = vunpack.i.l.bf16 %v5721_v59  ;;  %v5853_v28 = vcombine.low %v3092_v35, %v3093_v32 }
 0x200   : > { %v5855_v54 = vcombine.low %v3157_v60, %v3158_v4  ;;  %v2601_v11 = vrot.slane %v4243_v40, %v4960_v2  ;;  %v4255_v5 = vunpack.i.h.bf16 %v5721_v59  ;;  %v5862_v51 = vmul.f32 %v3215_v56, %v3207_v22 }
 0x201   : > { %v2524_v52 = vmul.f32 %v5701_v36, %v2519_v39  ;;  %v2687_v8 = vsel %vm2686_vm7, %v4260_v30, %v4261_v13  ;;  %v5869_v32 = vmul.f32 %v3219_v34, %v3208_v46  ;;  %v4370_v55 = vunpack.i.h.bf16 %v5857_v1 }
 0x202   : > { %v4369_v35 = vunpack.i.l.bf16 %v5857_v1  ;;  %v2460_v33 = vadd.f32 %v2459_v21, %v5682_v31  ;;  %v2537_v61 = vmul.f32 %v2536_v0, %v5701_v36  ;;  %v2589_v59 = vmul.f32 %v5712_v6, %v2584_v27 }
 0x203   : > { %v5736_v16 = vpop.permute.xlu1 %4270  ;;  %v2688_v56 = vsel %vm2686_vm7, %v4261_v13, %v4260_v30  ;;  %v2473_v40 = vadd.f32 %v2472_v25, %v5684_v62  ;;  %v2649_v60 = vrot.slane %v4254_v38, %v4960_v2  ;;  %v2602_v22 = vmul.f32 %v2601_v11, %v5712_v6  ;;  %v5894_v6 = vpop.permute.xlu0 %4378 }
 0x204   : > { %v4273_v34 = vunpack.i.h.bf16 %v5736_v16  ;;  %v4272_v4 = vunpack.i.l.bf16 %v5736_v16  ;;  %v2525_v39 = vadd.f32 %v2524_v52, %v2460_v33  ;;  %v2666_v31 = vrot.slane %v4255_v5, %v4960_v2 }
 0x205   : > { %v2702_v36 = vmul.f32 %v2695_v3, %v2687_v8  ;;  %v2703_v62 = vmul.f32 %v2699_v23, %v2688_v56  ;;  %v4266_v30 = vunpack.i.l.bf16 %v5734_v41  ;;  %v2538_v0 = vadd.f32 %v2537_v61, %v2473_v40 }
 0x206   : > { %v2590_v27 = vadd.f32 %v2589_v59, %v2525_v39  ;;  %v5902_v3 = vsel %vm3271_vm8, %v4369_v35, %v4370_v55  ;;  %v4381_v19 = vunpack.i.h.bf16 %v5894_v6  ;;  %v2654_v23 = vmul.f32 %v5725_v12, %v2649_v60 }
 0x207   : > { %v5754_v42 = vpop.permute.xlu1 %4276  ;;  %v2752_v46 = vsel %vm2751_vm9, %v4272_v4, %v4273_v34  ;;  %v2753_v25 = vsel %vm2751_vm9, %v4273_v34, %v4272_v4  ;;  %v2603_v38 = vadd.f32 %v2602_v22, %v2538_v0  ;;  %v2667_v52 = vmul.f32 %v2666_v31, %v5725_v12 }
 0x208   : > { %v5915_v33 = vcombine.low %v2702_v36, %v2703_v62  ;;  %v2714_v61 = vrot.slane %v4266_v30, %v4960_v2  ;;  %v2767_v56 = vmul.f32 %v2760_v10, %v2752_v46  ;;  %v6194_v12 = vrot.slane %v5740_v50, %v4944_v48 }
 0x209   : > { %v4278_v60 = vunpack.i.l.bf16 %v5754_v42  ;;  %v2655_v34 = vadd.f32 %v2654_v23, %v2590_v27  ;;  %v6195_v31 = vrot.slane %v5742_v20, %v4942_v47  ;;  %v6196_v10 = vrot.slane %v5742_v20, %v4944_v48 }
 0x20a   : > { %v2768_v40 = vmul.f32 %v6194_v12, %v2753_v25  ;;  %v2719_v27 = vmul.f32 %v5915_v33, %v2714_v61  ;;  %v6197_v46 = vrot.slane %v5744_v63, %v4942_v47 }
 0x20b   : > { %v5781_v24 = vpop.permute.xlu1 %4282 }
 0x20c   : > { %v4285_v16 = vunpack.i.h.bf16 %v5781_v24  ;;  %v4284_v21 = vunpack.i.l.bf16 %v5781_v24  ;;  %v4267_v24 = vunpack.i.h.bf16 %v5734_v41  ;;  %v5944_v23 = vcombine.low %v2767_v56, %v2768_v40 }
 0x20e   : > { %v2817_v41 = vsel %vm2816_vm10, %v4284_v21, %v4285_v16  ;;  %v2818_v59 = vsel %vm2816_vm10, %v4285_v16, %v4284_v21  ;;  %v2731_v4 = vrot.slane %v4267_v24, %v4960_v2  ;;  %v2779_v24 = vrot.slane %v4278_v60, %v4960_v2 }
 0x20f   : > { %v5813_v17 = vpop.permute.xlu1 %4288  ;;  %v2832_v36 = vmul.f32 %v6195_v31, %v2817_v41  ;;  %v2833_v62 = vmul.f32 %v6196_v10, %v2818_v59 }
 0x210   : > { %v4291_v16 = vunpack.i.h.bf16 %v5813_v17  ;;  %v4290_v21 = vunpack.i.l.bf16 %v5813_v17  ;;  %v2732_v41 = vmul.f32 %v2731_v4, %v5915_v33  ;;  %v6199_v4 = vrot.slane %v5773_v45, %v4942_v47 }
 0x211   : > { %v5959_v59 = vcombine.low %v2832_v36, %v2833_v62  ;;  %v2668_v62 = vadd.f32 %v2667_v52, %v2603_v38  ;;  %v2720_v52 = vadd.f32 %v2719_v27, %v2655_v34  ;;  %v4380_v27 = vunpack.i.l.bf16 %v5894_v6 }
 0x213   : > { %v5837_v9 = vpop.permute.xlu1 %4294 }
 0x214   : > { %v4297_v11 = vunpack.i.h.bf16 %v5837_v9  ;;  %v4296_v5 = vunpack.i.l.bf16 %v5837_v9  ;;  %v4279_v9 = vunpack.i.h.bf16 %v5754_v42 }
 0x216   : > { %v2882_v50 = vsel %vm2881_vm11, %v4296_v5, %v4297_v11  ;;  %v2883_v30 = vsel %vm2881_vm11, %v4297_v11, %v4296_v5  ;;  %v2796_v20 = vrot.slane %v4279_v9, %v4960_v2  ;;  %v6198_v11 = vrot.slane %v5744_v63, %v4944_v48 }
 0x217   : > { %v5864_v15 = vpop.permute.xlu1 %4300  ;;  %v2897_v25 = vmul.f32 %v6197_v46, %v2882_v50  ;;  %v2861_v9 = vrot.slane %v4291_v16, %v4960_v2  ;;  %v2844_v63 = vrot.slane %v4290_v21, %v4960_v2  ;;  %v2784_v50 = vmul.f32 %v5944_v23, %v2779_v24 }
 0x218   : > { %v2898_v5 = vmul.f32 %v6198_v11, %v2883_v30  ;;  %v4303_v56 = vunpack.i.h.bf16 %v5864_v15  ;;  %v4302_v12 = vunpack.i.l.bf16 %v5864_v15  ;;  %v2797_v30 = vmul.f32 %v2796_v20, %v5944_v23 }
 0x219   : > { %v2849_v20 = vmul.f32 %v5959_v59, %v2844_v63  ;;  %v3273_v24 = vsel %vm3271_vm8, %v4370_v55, %v4369_v35  ;;  %v2785_v34 = vadd.f32 %v2784_v50, %v2720_v52  ;;  %v4390_v55 = vpop.permute.xlu0 %4389  ;;  %v6204_v63 = vrot.slane %v5771_v57, %v4944_v48 }
 0x21a   : > { %v2926_v16 = vrot.slane %v4303_v56, %v4960_v2  ;;  %v2909_v21 = vrot.slane %v4302_v12, %v4960_v2  ;;  %v6203_v12 = vrot.slane %v5771_v57, %v4942_v47 }
 0x21b   : > { %v4307_v13 = vpop.permute.xlu1 %4306 }
 0x21c   : > { %v4309_v39 = vunpack.i.h.bf16 %v4307_v13  ;;  %v4308_v22 = vunpack.i.l.bf16 %v4307_v13 }
 0x21e   : > { %v2947_v17 = vsel %vm2946_vm12, %v4308_v22, %v4309_v39  ;;  %v2948_v61 = vsel %vm2946_vm12, %v4309_v39, %v4308_v22  ;;  %v6200_v22 = vrot.slane %v5773_v45, %v4944_v48  ;;  %v6201_v45 = vrot.slane %v5779_v37, %v4942_v47 }
 0x21f   : > { %v4313_v8 = vpop.permute.xlu1 %4312  ;;  %v2962_v39 = vmul.f32 %v6199_v4, %v2947_v17  ;;  %v4391_v4 = vunpack.i.l.bf16 %v4390_v55 }
 0x220   : > { %v2963_v36 = vmul.f32 %v6200_v22, %v2948_v61  ;;  %v4315_v15 = vunpack.i.h.bf16 %v4313_v8  ;;  %v4314_v10 = vunpack.i.l.bf16 %v4313_v8  ;;  %v6202_v8 = vrot.slane %v5779_v37, %v4944_v48 }
 0x222   : > { %v5997_v11 = vcombine.low %v2962_v39, %v2963_v36  ;;  %v2974_v37 = vrot.slane %v4314_v10, %v4960_v2 }
 0x223   : > { %v4324_v42 = vpop.permute.xlu1 %4323 }
 0x224   : > { %v4326_v13 = vunpack.i.h.bf16 %v4324_v42  ;;  %v4325_v0 = vunpack.i.l.bf16 %v4324_v42  ;;  %v5978_v42 = vcombine.low %v2897_v25, %v2898_v5  ;;  %v2862_v25 = vmul.f32 %v2861_v9, %v5959_v59 }
 0x225   : > { %v2991_v5 = vrot.slane %v4315_v15, %v4960_v2  ;;  %v3287_v9 = vmul.f32 %v6203_v12, %v5902_v3  ;;  %v2979_v22 = vmul.f32 %v5997_v11, %v2974_v37  ;;  %v6207_v12 = vrot.slane %v5801_v7, %v4942_v47 }
 0x226   : > { %v3012_v60 = vsel %vm3011_vm13, %v4325_v0, %v4326_v13  ;;  %v3013_v31 = vsel %vm3011_vm13, %v4326_v13, %v4325_v0  ;;  %v2733_v0 = vadd.f32 %v2732_v41, %v2668_v62  ;;  %v2914_v1 = vmul.f32 %v5978_v42, %v2909_v21 }
 0x227   : > { %v4330_v40 = vpop.permute.xlu1 %4329  ;;  %v3027_v13 = vmul.f32 %v6201_v45, %v3012_v60  ;;  %v3028_v38 = vmul.f32 %v6202_v8, %v3013_v31  ;;  %v2927_v56 = vmul.f32 %v2926_v16, %v5978_v42  ;;  %v3288_v60 = vmul.f32 %v6204_v63, %v3273_v24 }
 0x228   : > { %v4332_v17 = vunpack.i.h.bf16 %v4330_v40  ;;  %v4331_v61 = vunpack.i.l.bf16 %v4330_v40  ;;  %v2798_v41 = vadd.f32 %v2797_v30, %v2733_v0  ;;  %v4392_v31 = vunpack.i.h.bf16 %v4390_v55 }
 0x229   : > { %v6004_v35 = vcombine.low %v3027_v13, %v3028_v38  ;;  %v2850_v40 = vadd.f32 %v2849_v20, %v2785_v34  ;;  %v2992_v36 = vmul.f32 %v2991_v5, %v5997_v11  ;;  %v3337_v45 = vsel %vm3336_vm14, %v4380_v27, %v4381_v19 }
 0x22a   : > { %v2863_v39 = vadd.f32 %v2862_v25, %v2798_v41  ;;  %v3121_v10 = vrot.slane %v4332_v17, %v4960_v2  ;;  %v3104_v62 = vrot.slane %v4331_v61, %v4960_v2  ;;  %v3338_v13 = vsel %vm3336_vm14, %v4381_v19, %v4380_v27 }
 0x22b   : > { %v2915_v3 = vadd.f32 %v2914_v1, %v2850_v40  ;;  %v3044_v57 = vmul.f32 %v6004_v35, %v5835_v14  ;;  %v3057_v21 = vmul.f32 %v5832_v29, %v6004_v35  ;;  %v3402_v14 = vsel %vm3401_vm15, %v4391_v4, %v4392_v31 }
 0x22c   : > { %v4341_v46 = vpop.permute.xlu1 %4340  ;;  %v2928_v16 = vadd.f32 %v2927_v56, %v2863_v39  ;;  %v3403_v29 = vsel %vm3401_vm15, %v4392_v31, %v4391_v4  ;;  %v3122_v20 = vmul.f32 %v3121_v10, %v5853_v28  ;;  %v3109_v24 = vmul.f32 %v5853_v28, %v3104_v62 }
 0x22d   : > { %v4343_v50 = vunpack.i.h.bf16 %v4341_v46  ;;  %v4342_v30 = vunpack.i.l.bf16 %v4341_v46  ;;  %v2980_v52 = vadd.f32 %v2979_v22, %v2915_v3  ;;  %v6039_v27 = vcombine.low %v5862_v51, %v5869_v32 }
 0x22e   : > { %v2993_v0 = vadd.f32 %v2992_v36, %v2928_v16  ;;  %v6043_v61 = vcombine.low %v3287_v9, %v3288_v60  ;;  %v6205_v41 = vrot.slane %v5777_v26, %v4942_v47  ;;  %v6206_v56 = vrot.slane %v5777_v26, %v4944_v48 }
 0x22f   : > { %v3186_v46 = vrot.slane %v4343_v50, %v4960_v2  ;;  %v3169_v6 = vrot.slane %v4342_v30, %v4960_v2  ;;  %v3045_v19 = vadd.f32 %v3044_v57, %v2980_v52  ;;  %v3417_v63 = vmul.f32 %v6207_v12, %v3402_v14 }
 0x230   : > { %v3058_v5 = vadd.f32 %v3057_v21, %v2993_v0  ;;  %v3352_v1 = vmul.f32 %v6205_v41, %v3337_v45  ;;  %v3353_v55 = vmul.f32 %v6206_v56, %v3338_v13  ;;  %v6208_v51 = vrot.slane %v5801_v7, %v4944_v48 }
 0x231   : > { %v4352_v15 = vpop.permute.xlu1 %4351  ;;  %v3187_v31 = vmul.f32 %v3186_v46, %v5855_v54  ;;  %v3174_v9 = vmul.f32 %v5855_v54, %v3169_v6  ;;  %v3110_v60 = vadd.f32 %v3109_v24, %v3045_v19  ;;  %v2744_v19 = vrot.slane %v5696_v44, %v4960_v2 }
 0x232   : > { %v4354_v8 = vunpack.i.h.bf16 %v4352_v15  ;;  %v4353_v38 = vunpack.i.l.bf16 %v4352_v15  ;;  %v3418_v32 = vmul.f32 %v6208_v51, %v3403_v29  ;;  %v3123_v4 = vadd.f32 %v3122_v20, %v3058_v5 }
 0x233   : > { %v6063_v10 = vcombine.low %v3352_v1, %v3353_v55  ;;  %v3175_v48 = vadd.f32 %v3174_v9, %v3110_v60  ;;  %v2874_v41 = vrot.slane %v5714_v53, %v4960_v2  ;;  %v2939_v12 = vrot.slane %v5723_v58, %v4960_v2  ;;  %v3061_v58 = vpop.permute.xlu0 %3060 }
 0x234   : > { %v3251_v43 = vrot.slane %v4354_v8, %v4960_v2  ;;  %v3234_v17 = vrot.slane %v4353_v38, %v4960_v2  ;;  %v3188_v7 = vadd.f32 %v3187_v31, %v3123_v4  ;;  %v6069_v16 = vcombine.low %v3417_v63, %v3418_v32 }
 0x235   : > { %v2940_v53 = vmul.f32 %v2939_v12, %v5978_v42 }
 0x236   : > { %v4363_v25 = vpop.permute.xlu1 %4362  ;;  %v3252_v22 = vmul.f32 %v3251_v43, %v6039_v27  ;;  %v3239_v47 = vmul.f32 %v6039_v27, %v3234_v17  ;;  %v2745_v17 = vmul.f32 %v2744_v19, %v5915_v33 }
 0x237   : > { %v4365_v37 = vunpack.i.h.bf16 %v4363_v25  ;;  %v4364_v34 = vunpack.i.l.bf16 %v4363_v25 }
 0x238   : > { %v3240_v57 = vadd.f32 %v3239_v47, %v3175_v48  ;;  %v3253_v21 = vadd.f32 %v3252_v22, %v3188_v7  ;;  %v2746_v32 = vadd.f32 %v2745_v17, %v5730_v49  ;;  %v3191_v22 = vpop.permute.xlu0 %3190 }
 0x239   : > { %v3316_v40 = vrot.slane %v4365_v37, %v4960_v2  ;;  %v3299_v39 = vrot.slane %v4364_v34, %v4960_v2  ;;  %v2809_v34 = vrot.slane %v5707_v18, %v4960_v2  ;;  %v2875_v18 = vmul.f32 %v2874_v41, %v5959_v59 }
 0x23a   : > { %v3199_v42 = vrot.slane %v3191_v22, %v4960_v2 }
 0x23b   : > { %v4374_v26 = vpop.permute.xlu1 %4373  ;;  %v3317_v30 = vmul.f32 %v3316_v40, %v6043_v61  ;;  %v3304_v3 = vmul.f32 %v6043_v61, %v3299_v39  ;;  %v2810_v63 = vmul.f32 %v2809_v34, %v5944_v23  ;;  %v3069_v23 = vrot.slane %v3061_v58, %v4960_v2 }
 0x23c   : > { %v4376_v36 = vunpack.i.h.bf16 %v4374_v26  ;;  %v4375_v15 = vunpack.i.l.bf16 %v4374_v26 }
 0x23d   : > { %v3305_v0 = vadd.f32 %v3304_v3, %v3240_v57  ;;  %v3318_v14 = vadd.f32 %v3317_v30, %v3253_v21  ;;  %v2811_v33 = vadd.f32 %v2810_v63, %v2746_v32  ;;  %v3070_v59 = vmul.f32 %v3069_v23, %v6004_v35 }
 0x23e   : > { %v3381_v62 = vrot.slane %v4376_v36, %v4960_v2  ;;  %v3364_v50 = vrot.slane %v4375_v15, %v4960_v2  ;;  %v3200_v30 = vmul.f32 %v3199_v42, %v5855_v54 }
 0x23f   : > { %v2876_v60 = vadd.f32 %v2875_v18, %v2811_v33 }
 0x240   : > { %v4385_v45 = vpop.permute.xlu1 %4384  ;;  %v3382_v13 = vmul.f32 %v3381_v62, %v6063_v10  ;;  %v3369_v8 = vmul.f32 %v6063_v10, %v3364_v50 }
 0x241   : > { %v4387_v38 = vunpack.i.h.bf16 %v4385_v45  ;;  %v4386_v52 = vunpack.i.l.bf16 %v4385_v45  ;;  %v2941_v40 = vadd.f32 %v2940_v53, %v2876_v60 }
 0x242   : > { %v3370_v24 = vadd.f32 %v3369_v8, %v3305_v0  ;;  %v3383_v46 = vadd.f32 %v3382_v13, %v3318_v14 }
 0x243   : > { %v3446_v29 = vrot.slane %v4387_v38, %v4960_v2  ;;  %v3429_v20 = vrot.slane %v4386_v52, %v4960_v2 }
 0x245   : > { %v3447_v6 = vmul.f32 %v3446_v29, %v6069_v16  ;;  %v3434_v25 = vmul.f32 %v6069_v16, %v3429_v20  ;;  %v2996_v55 = vpop.permute.xlu1 %2995 }
 0x246   : > { %v3004_v31 = vrot.slane %v2996_v55, %v4960_v2 }
 0x247   : > { %v3435_v5 = vadd.f32 %v3434_v25, %v3370_v24  ;;  %v3448_v37 = vadd.f32 %v3447_v6, %v3383_v46 }
 0x248   : > { %v3005_v4 = vmul.f32 %v3004_v31, %v5997_v11 }
 0x249   : > { %v3462_v43 = vmax.f32 %v3435_v5, %v3448_v37 }
 0x24a   : > { %v3126_v9 = vpop.permute.xlu1 %3125  ;;  %v3006_v39 = vadd.f32 %v3005_v4, %v2941_v40 }
 0x24b   : > { %v3463_v1 = vsub.f32 %v3435_v5, %v3462_v43  ;;  %v3467_v56 = vsub.f32 %v3448_v37, %v3462_v43  ;;  %v3134_v49 = vrot.slane %v3126_v9, %v4960_v2 }
 0x24c   : > { %v3071_v47 = vadd.f32 %v3070_v59, %v3006_v39 }
 0x24d   : > { %v3464_v44 = vmul.f32 1.442695, %v3463_v1  ;;  %v3468_v51 = vmul.f32 1.442695, %v3467_v56  ;;  %v3135_v36 = vmul.f32 %v3134_v49, %v5853_v28  ;;  %v3386_v28 = vpop.permute.xlu0 %3385 }
 0x24e   : > { %v3394_v13 = vrot.slane %v3386_v28, %v4960_v2 }
 0x24f   : > { %4401 = vpow2.f32 %v3464_v44  ;;  %v3256_v26 = vpop.permute.xlu1 %3255  ;;  %v3136_v11 = vadd.f32 %v3135_v36, %v3071_v47 }
 0x250   : > { %4403 = vpow2.f32 %v3468_v51  ;;  %v3264_v62 = vrot.slane %v3256_v26, %v4960_v2  ;;  %v3395_v54 = vmul.f32 %v3394_v13, %v6063_v10 }
 0x251   : > { %v3201_v35 = vadd.f32 %v3200_v30, %v3136_v11 }
 0x252   : > { %v3265_v57 = vmul.f32 %v3264_v62, %v6039_v27 }
 0x254   : > { %v3321_v7 = vpop.permute.xlu1 %3320  ;;  %v3266_v8 = vadd.f32 %v3265_v57, %v3201_v35 }
 0x255   : > { %v3329_v3 = vrot.slane %v3321_v7, %v4960_v2 }
 0x257   : > { %v3330_v21 = vmul.f32 %v3329_v3, %v6043_v61 }
 0x259   : > { %v3451_v45 = vpop.permute.xlu1 %3450  ;;  %v3331_v38 = vadd.f32 %v3330_v21, %v3266_v8 }
 0x25a   : > { %v3459_v52 = vrot.slane %v3451_v45, %v4960_v2 }
 0x25b   : > { %v3396_v0 = vadd.f32 %v3395_v54, %v3331_v38 }
 0x25c   : > { %v4402_v15 = vpop.eup %4401  ;;  %v3460_v14 = vmul.f32 %v3459_v52, %v6069_v16 }
 0x25d   : > { %v4404_v48 = vpop.eup %4403 }
 0x25e   : > { %v3470_v50 = vadd.f32 %v4404_v48, %v4402_v15  ;;  %v3461_v61 = vadd.f32 %v3460_v14, %v3396_v0 }
 0x260   : > { %4405 = vlog2.f32 %v3470_v50 }
 0x26d   : > { %v4406_v29 = vpop.eup %4405 }
 0x26e   : > { %v3472_v27 = vmul.f32 0.6931472, %v4406_v29 }
 0x270   : > { %v3473_v20 = vadd.f32 %v3472_v27, %v3462_v43 }
 0x272   : > { %v3474_v24 = vadd.f32 %v3473_v20, %v3461_v61 }
 0x274   : > { %3475 = vst [vmem:[%s245_s0] sm:$0xff] %v3474_v24 }
 0x275   : > { %4508 = shalt.err (!%p4505_p5)
}
 0x276   : > { %s4509_s14 = scalar_lea.hbm %s3491_s9, 128  ;;  %s4513_s26 = scalar_lea.hbm %s6151_s4, 256 }
 0x277   : > { %p4510_p10 = scmp.ne.s32.totalorder %s3491_s9, %s4509_s14  ;;  %p4514_p6 = scmp.lt.s32.totalorder %s3491_s9, %s6151_s4 }
 0x278   : > { %p4515_p12 = scmp.lt.s32.totalorder %s4513_s26, %s4509_s14 }
 0x279   : > { %p4511_p1 = pnand %p4510_p10, %p4814_p7 }
 0x27a   : > { %p4516_p3 = por %p4515_p12, %p4514_p6 }
 0x27b   : > { %p4512_p4 = pneg %p4511_p1 }
 0x27d   : > { %p4517_p8 = pnand %p4516_p3, %p4512_p4 }
 0x27f   : > { %4520 = shalt.err (!%p4517_p8)
}
 0x280   : > { %3636 = dma.vmem_to_hbm [thread:$0]  (%p4814_p7), %s3494_s30, 128, %s3491_s9, %s3477_s11  }
 0x281 PF: > { %s3505_s16 = sand.u32 1, %s4561_s18   ;;  %p6209_p9 = scmp.ne.s32.totalorder %s6171_s28, 0 }
 0x282   : > { %p6210_p11 = scmp.ge.s32.totalorder %s4581_s23, 2  ;;  %s3506_s17 = scalar_lea.sflag [#allocation6], %s3505_s16 }
 0x284   : > { %p3650_p2 = pnand %p6210_p11, %p6209_p9 }
 0x286   : > { %p3651_p13 = pneg %p3650_p2 }
 0x288   : > { %4556 = dma.done.wait (%p3651_p13), %s3506_s17, 128  }
 0x289   : > { %4558 = vsyncadd (%p3651_p13), %s3506_s17, 4294967168  ;;  %s25_s23 = sadd.s32 1, %s4581_s23   ;;  %s6211_s18 = smov %s4565_s19 }
 0x28a   : > { %p22_p0 = scmp.ge.s32.totalorder %s25_s23, 4   ;;  %s6212_s19 = smov %s4569_s20 }
 0x28b   : > { %s6213_s20 = smov %s4823_s10  ;;  %s6214_s21 = smov %s4577_s22 }
 0x28c   : > { %s6215_s22 = smov %s6217_s24  ;;  %24 = sbr.rel (!%p22_p0) target bundleno = 12 (0xc), region = 136 }
 0x291   :  { %3511 = vsyncpa [#allocation5], 1 }
 0x292   :  { %3513 = vsyncpa [#allocation5 + $0x1], 1 }
 0x293   :  { %3514 = vsyncpa [#allocation8], 1 }
 0x294   :  { %3515 = vsyncpa [#allocation6], 1 }
 0x295   :  { %3517 = vsyncpa [#allocation6 + $0x1], 1 }

</bundles_post_ra>
